<compile_context>
chip_gen: v7x
topology: tpu7x:2x2x1
jax: 0.10.0
libtpu: 0.0.40
codegen_flags: <defaults>
</compile_context>

<pallas_src>
import functools

import jax
import jax.numpy as jnp
from jax.experimental import pallas as pl
from jax.experimental.pallas import tpu as pltpu


_VMEM = pl.BlockSpec(memory_space=pltpu.MemorySpace.VMEM)
_LANE = 128
_SUBLANE = 8


def _round_up(x, m):
    return (x + m - 1) // m * m


# ----------------------------------------------------------------------------
# Pallas kernels
# ----------------------------------------------------------------------------
def _bilstm_core(x_ref, len_ref, wih_ref, whh_ref, b_ref, *, T, Bp, Hp,
                 collect_seq):
    """Fused forward+backward LSTM recurrence, time-major, lane-dense.

    x_ref:   (T, Bp, E)     time-major inputs (bf16)
    len_ref: (Bp, 1) int32  valid length per (right-padded) batch row
    wih_ref: (E, 8*Hp)      [W_ih_fwd | W_ih_bwd], each gate in its own Hp slab (bf16)
    whh_ref: (2*Hp, 8*Hp)   block_diag(W_hh_fwd, W_hh_bwd)                   (bf16)
    b_ref:   (1, 8*Hp)      [b_fwd | b_bwd], b_ih + b_hh pre-summed          (f32)

    Returns (h_f, h_b, outs_f, outs_b); outs_* are per-step (Bp, Hp) hidden
    outputs (zeros at padded positions) when collect_seq=True.
    """
    E = x_ref.shape[-1]
    G = 4 * Hp  # lane width of one direction's gate block

    # ---- hoisted input->gate matmul for BOTH directions, bias folded in ----
    # time-major so the per-step read below is a leading-axis pick.
    x_flat = x_ref[...].reshape(T * Bp, E)
    gates_in = jnp.dot(x_flat, wih_ref[...],
                       preferred_element_type=jnp.float32) + b_ref[...]
    gates_in = gates_in.reshape(T, Bp, 2 * G)

    lengths = len_ref[...]                                   # (Bp, 1) int32

    h_f = jnp.zeros((Bp, Hp), jnp.float32)
    c_f = jnp.zeros((Bp, Hp), jnp.float32)
    h_b = jnp.zeros((Bp, Hp), jnp.float32)
    c_b = jnp.zeros((Bp, Hp), jnp.float32)
    outs_f = [None] * T
    outs_b = [None] * T

    def apply_gates(g, h, c, m):
        # every slice below is a full, 128-aligned lane slab
        i_g = jax.nn.sigmoid(g[:, 0 * Hp:1 * Hp])
        f_g = jax.nn.sigmoid(g[:, 1 * Hp:2 * Hp])
        g_g = jnp.tanh(g[:, 2 * Hp:3 * Hp])
        o_g = jax.nn.sigmoid(g[:, 3 * Hp:4 * Hp])
        c_new = f_g * c + i_g * g_g
        h_new = o_g * jnp.tanh(c_new)
        # packed-sequence semantics: freeze the state at padded timesteps
        return jnp.where(m, h_new, h), jnp.where(m, c_new, c)

    # Fully unrolled static time loop (T is small here).  Step i advances the
    # forward chain at t=i and the backward chain at t=T-1-i; ONE
    # block-diagonal recurrent matmul per step feeds both chains.
    # TODO(synk): for production T use lax.fori_loop with modest unroll.
    for i in range(T):
        tf = i
        tb = T - 1 - i
        m_f = lengths > tf                                   # (Bp, 1) bool
        m_b = lengths > tb
        h_cat = jnp.concatenate([h_f, h_b], axis=1).astype(jnp.bfloat16)
        g_rec = jnp.dot(h_cat, whh_ref[...],
                        preferred_element_type=jnp.float32)  # (Bp, 8*Hp)
        g_f = gates_in[tf][:, 0:G] + g_rec[:, 0:G]
        g_b = gates_in[tb][:, G:2 * G] + g_rec[:, G:2 * G]
        h_f, c_f = apply_gates(g_f, h_f, c_f, m_f)
        h_b, c_b = apply_gates(g_b, h_b, c_b, m_b)
        if collect_seq:
            # zeros at padded positions (pad_packed_sequence semantics)
            outs_f[tf] = jnp.where(m_f, h_f, 0.0)
            outs_b[tb] = jnp.where(m_b, h_b, 0.0)

    return h_f, h_b, outs_f, outs_b


def bilstm_fc_kernel(x_ref, len_ref, wih_ref, whh_ref, b_ref,
                     fcw_ref, fcb_ref, out_ref, *, T, Bp, Hp, C):
    """Last layer: fused bidirectional LSTM + concat + Linear + Softmax."""
    h_f, h_b, _, _ = _bilstm_core(x_ref, len_ref, wih_ref, whh_ref, b_ref,
                                  T=T, Bp=Bp, Hp=Hp, collect_seq=False)
    hidden = jnp.concatenate([h_f, h_b], axis=1).astype(jnp.bfloat16)
    logits = (jnp.dot(hidden, fcw_ref[...],
                      preferred_element_type=jnp.float32) + fcb_ref[...])
    # mask padded class lanes out of the softmax
    lane = jax.lax.broadcasted_iota(jnp.int32, logits.shape, 1)
    logits = jnp.where(lane < C, logits, -1e30)
    m = jnp.max(logits, axis=1, keepdims=True)
    e = jnp.exp(logits - m)
    denom = jnp.sum(e, axis=1, keepdims=True)
    out_ref[...] = e * pl.reciprocal(denom, approx=True)


def bilstm_seq_kernel(x_ref, len_ref, wih_ref, whh_ref, b_ref, out_ref,
                      *, T, Bp, Hp):
    """Intermediate layer: fused bidirectional LSTM, (T, Bp, 2Hp) output."""
    _, _, outs_f, outs_b = _bilstm_core(x_ref, len_ref, wih_ref, whh_ref,
                                        b_ref, T=T, Bp=Bp, Hp=Hp,
                                        collect_seq=True)
    seq_f = jnp.stack(outs_f, axis=0)                        # (T, Bp, Hp)
    seq_b = jnp.stack(outs_b, axis=0)
    # single lane-dense writeback (last dim 2*Hp, a multiple of 128)
    out_ref[...] = jnp.concatenate([seq_f, seq_b],
                                   axis=-1).astype(out_ref.dtype)


# ----------------------------------------------------------------------------
# Wrappers around pallas_call
# ----------------------------------------------------------------------------
def _compiler_params():
    # default scoped VMEM (16/32 MiB) is well below physical; raise it so the
    # whole-sequence-resident buffers never get artificially re-tiled.
    return pltpu.CompilerParams(vmem_limit_bytes=64 * 1024 * 1024)


def bilstm_fc(x, lengths, wih, whh, bias, fc_w, fc_b, *, T, Bp, Hp, C):
    Cp = fc_w.shape[1]
    kernel = functools.partial(bilstm_fc_kernel, T=T, Bp=Bp, Hp=Hp, C=C)
    return pl.pallas_call(
        kernel,
        out_shape=jax.ShapeDtypeStruct((Bp, Cp), jnp.float32),
        in_specs=[_VMEM] * 7,
        out_specs=_VMEM,
        compiler_params=_compiler_params(),
    )(x, lengths, wih, whh, bias, fc_w, fc_b)


def bilstm_seq(x, lengths, wih, whh, bias, *, T, Bp, Hp):
    kernel = functools.partial(bilstm_seq_kernel, T=T, Bp=Bp, Hp=Hp)
    return pl.pallas_call(
        kernel,
        out_shape=jax.ShapeDtypeStruct((T, Bp, 2 * Hp), jnp.bfloat16),
        in_specs=[_VMEM] * 5,
        out_specs=_VMEM,
        compiler_params=_compiler_params(),
    )(x, lengths, wih, whh, bias)


# ----------------------------------------------------------------------------
# One-time weight packing into the kernel layout (padded, block-diag, bf16)
# ----------------------------------------------------------------------------
def pack_params(params, *, hidden_size, num_class, num_layers):
    H = hidden_size
    Hp = _round_up(H, _LANE)
    Cp = _round_up(num_class, _LANE)
    packed = {"Hp": Hp, "C": num_class, "num_layers": num_layers,
              "embedding": params["embedding"].astype(jnp.bfloat16)}

    def pad_gate_cols(w):  # (rows, 4H) -> (rows, 4Hp), each gate in own slab
        out = jnp.zeros((w.shape[0], 4 * Hp), jnp.float32)
        for g in range(4):
            out = out.at[:, g * Hp:g * Hp + H].set(w[:, g * H:(g + 1) * H])
        return out

    for l in range(num_layers):
        in_is_hidden = l > 0
        wih_parts = []
        for tag in ("f", "b"):
            w = pad_gate_cols(params[f"wih_{tag}{l}"])        # (E_in, 4Hp)
            if in_is_hidden:
                # previous-layer output is (.., 2Hp) with real fwd hidden at
                # [0:H] and real bwd hidden at [Hp:Hp+H]
                wp = jnp.zeros((2 * Hp, 4 * Hp), jnp.float32)
                wp = wp.at[0:H].set(w[0:H])
                wp = wp.at[Hp:Hp + H].set(w[H:2 * H])
                w = wp
            wih_parts.append(w)
        packed[f"wih{l}"] = jnp.concatenate(wih_parts,
                                            axis=1).astype(jnp.bfloat16)

        whh_bd = jnp.zeros((2 * Hp, 8 * Hp), jnp.float32)
        whh_f = pad_gate_cols(params[f"whh_f{l}"])            # (H, 4Hp)
        whh_b = pad_gate_cols(params[f"whh_b{l}"])
        whh_bd = whh_bd.at[0:H, 0:4 * Hp].set(whh_f)
        whh_bd = whh_bd.at[Hp:Hp + H, 4 * Hp:8 * Hp].set(whh_b)
        packed[f"whh{l}"] = whh_bd.astype(jnp.bfloat16)

        b_f = pad_gate_cols(params[f"b_f{l}"])                # (1, 4Hp)
        b_b = pad_gate_cols(params[f"b_b{l}"])
        packed[f"b{l}"] = jnp.concatenate([b_f, b_b], axis=1)  # f32 (1, 8Hp)

    fcw = jnp.zeros((2 * Hp, Cp), jnp.float32)
    fcw = fcw.at[0:H, 0:num_class].set(params["fc_w"][0:H])
    fcw = fcw.at[Hp:Hp + H, 0:num_class].set(params["fc_w"][H:2 * H])
    packed["fc_w"] = fcw.astype(jnp.bfloat16)
    fcb = jnp.zeros((1, Cp), jnp.float32)
    fcb = fcb.at[:, 0:num_class].set(params["fc_b"])
    packed["fc_b"] = fcb
    return packed


# ----------------------------------------------------------------------------
# Model forward (packed kernel-layout weights)
# ----------------------------------------------------------------------------
def model_forward(text, text_lengths, packed):
    """Forward pass equivalent to Vulnerability_Detection.forward."""
    Hp = packed["Hp"]
    C = packed["C"]
    num_layers = packed["num_layers"]
    B, T = text.shape
    Bp = _round_up(B, _SUBLANE)

    # Embedding lookup: frozen table gather, done in JAX glue (irregular
    # gather); produced directly time-major so no activation transpose.
    x = jnp.take(packed["embedding"], text.T, axis=0)        # (T, B, E) bf16
    x = jnp.pad(x, ((0, 0), (0, Bp - B), (0, 0)))            # (T, Bp, E)

    # pack_padded_sequence emulation: valid lengths per (right-padded) row
    lengths = jnp.zeros((Bp, 1), jnp.int32).at[:B, 0].set(
        text_lengths.astype(jnp.int32))

    for l in range(num_layers):
        args = (x, lengths, packed[f"wih{l}"], packed[f"whh{l}"],
                packed[f"b{l}"])
        if l == num_layers - 1:
            # hidden = cat(hidden[-2], hidden[-1]) -> Linear -> Softmax,
            # fused into the kernel tail
            out = bilstm_fc(*args, packed["fc_w"], packed["fc_b"],
                            T=T, Bp=Bp, Hp=Hp, C=C)
            return out[:B, :C]
        x = bilstm_seq(*args, T=T, Bp=Bp, Hp=Hp)             # (T, Bp, 2Hp)


# ----------------------------------------------------------------------------
# Pure-JAX reference (same math, python time loop) for validation
# ----------------------------------------------------------------------------
def reference_forward(text, text_lengths, params, *, num_layers, hidden_size):
    H = hidden_size
    emb = jnp.take(params["embedding"], text, axis=0).astype(jnp.float32)
    B, T, _ = emb.shape
    lengths = text_lengths.astype(jnp.int32)
    inp = emb
    finals = {}
    for l in range(num_layers):
        seq_outs = {}
        for tag, rev in (("f", False), ("b", True)):
            wih = params[f"wih_{tag}{l}"]
            whh = params[f"whh_{tag}{l}"]
            b = params[f"b_{tag}{l}"]
            h = jnp.zeros((B, H), jnp.float32)
            c = jnp.zeros((B, H), jnp.float32)
            out = [None] * T
            order = range(T - 1, -1, -1) if rev else range(T)
            for t in order:
                x_t = inp[:, t, :]
                m = (t < lengths).astype(jnp.float32)[:, None]
                g = x_t @ wih + h @ whh + b
                i_g = jax.nn.sigmoid(g[:, :H])
                f_g = jax.nn.sigmoid(g[:, H:2 * H])
                g_g = jnp.tanh(g[:, 2 * H:3 * H])
                o_g = jax.nn.sigmoid(g[:, 3 * H:])
                c_new = f_g * c + i_g * g_g
                h_new = o_g * jnp.tanh(c_new)
                c = m * c_new + (1.0 - m) * c
                h = m * h_new + (1.0 - m) * h
                out[t] = m * h
            seq_outs[tag] = jnp.stack(out, axis=1)
            finals[tag] = h
        inp = jnp.concatenate([seq_outs["f"], seq_outs["b"]], axis=-1)
    hidden = jnp.concatenate([finals["f"], finals["b"]], axis=1)
    logits = hidden @ params["fc_w"] + params["fc_b"]
    return jax.nn.softmax(logits, axis=1)


# ----------------------------------------------------------------------------
# Deterministic parameter construction (PyTorch-default-like uniform init)
# ----------------------------------------------------------------------------
def make_params(key, vocab_size, embed_size, hidden_size, num_class, num_layers):
    H = hidden_size
    params = {}
    key, ke = jax.random.split(key)
    params["embedding"] = jax.random.normal(ke, (vocab_size, embed_size),
                                            jnp.float32)
    k_lstm = 1.0 / jnp.sqrt(jnp.float32(H))
    for l in range(num_layers):
        in_size = embed_size if l == 0 else 2 * H
        for tag in ("f", "b"):
            key, k1, k2, k3, k4 = jax.random.split(key, 5)
            # stored transposed: (in, 4H) and (H, 4H); gate order i, f, g, o
            params[f"wih_{tag}{l}"] = jax.random.uniform(
                k1, (in_size, 4 * H), jnp.float32, -k_lstm, k_lstm)
            params[f"whh_{tag}{l}"] = jax.random.uniform(
                k2, (H, 4 * H), jnp.float32, -k_lstm, k_lstm)
            b_ih = jax.random.uniform(k3, (4 * H,), jnp.float32, -k_lstm, k_lstm)
            b_hh = jax.random.uniform(k4, (4 * H,), jnp.float32, -k_lstm, k_lstm)
            params[f"b_{tag}{l}"] = (b_ih + b_hh)[None, :]      # (1, 4H)
    k_fc = 1.0 / jnp.sqrt(jnp.float32(2 * H))
    key, kw, kb = jax.random.split(key, 3)
    params["fc_w"] = jax.random.uniform(kw, (2 * H, num_class), jnp.float32,
                                        -k_fc, k_fc)
    params["fc_b"] = jax.random.uniform(kb, (1, num_class), jnp.float32,
                                        -k_fc, k_fc)
    return params


# ----------------------------------------------------------------------------
if __name__ == "__main__":
    VOCAB, EMBED, HIDDEN, NUM_CLASS = 32, 16, 32, 4
    B, T = 2, 8

    key = jax.random.PRNGKey(0)
    key, k_text = jax.random.split(key)
    text = jax.random.randint(k_text, (B, T), 0, VOCAB, dtype=jnp.int32)
    # pack_padded_sequence default requires descending lengths (right-padded)
    text_lengths = jnp.array([T, T - 3], dtype=jnp.int32)

    # bf16 MXU inputs -> loosened (but still tight for a softmax output) tol
    TOL = 2e-2

    # --- primary config: single bidirectional layer (fused LSTM+FC kernel) ---
    params1 = make_params(key, VOCAB, EMBED, HIDDEN, NUM_CLASS, num_layers=1)
    packed1 = pack_params(params1, hidden_size=HIDDEN, num_class=NUM_CLASS,
                          num_layers=1)
    out1 = jax.block_until_ready(model_forward(text, text_lengths, packed1))
    ref1 = jax.block_until_ready(
        reference_forward(text, text_lengths, params1,
                          num_layers=1, hidden_size=HIDDEN))
    assert out1.shape == (B, NUM_CLASS)
    assert jnp.allclose(out1, ref1, rtol=TOL, atol=TOL), (out1, ref1)

    # --- stacked config: 2 layers (also exercises the sequence-output kernel)
    params2 = make_params(jax.random.PRNGKey(1), VOCAB, EMBED, HIDDEN,
                          NUM_CLASS, num_layers=2)
    packed2 = pack_params(params2, hidden_size=HIDDEN, num_class=NUM_CLASS,
                          num_layers=2)
    out2 = jax.block_until_ready(model_forward(text, text_lengths, packed2))
    ref2 = jax.block_until_ready(
        reference_forward(text, text_lengths, params2,
                          num_layers=2, hidden_size=HIDDEN))
    assert out2.shape == (B, NUM_CLASS)
    assert jnp.allclose(out2, ref2, rtol=TOL, atol=TOL), (out2, ref2)

    print("KERNEL_OK")
</pallas_src>

<mosaic_0001>
module attributes {stable_mosaic.version = 11 : i64} {
  func.func @bilstm_fc_kernel(%arg0: memref<8x8x16xbf16, #tpu.memory_space<vmem>>, %arg1: memref<8x1xi32, #tpu.memory_space<vmem>>, %arg2: memref<16x1024xbf16, #tpu.memory_space<vmem>>, %arg3: memref<256x1024xbf16, #tpu.memory_space<vmem>>, %arg4: memref<1x1024xf32, #tpu.memory_space<vmem>>, %arg5: memref<256x128xbf16, #tpu.memory_space<vmem>>, %arg6: memref<1x128xf32, #tpu.memory_space<vmem>>, %arg7: memref<8x128xf32, #tpu.memory_space<vmem>>) attributes {dimension_semantics = [], scalar_prefetch = 0 : i64, scratch_operands = 0 : i64, tpu.core_type = #tpu.core_type<tc>} {
    %c0 = arith.constant 0 : index
    %c0_0 = arith.constant 0 : index
    %c0_1 = arith.constant 0 : index
    %0 = vector.load %arg0[%c0, %c0_0, %c0_1] : memref<8x8x16xbf16, #tpu.memory_space<vmem>>, vector<8x8x16xbf16>
    %1 = vector.shape_cast %0 : vector<8x8x16xbf16> to vector<64x16xbf16>
    %c0_2 = arith.constant 0 : index
    %c0_3 = arith.constant 0 : index
    %2 = vector.load %arg2[%c0_2, %c0_3] : memref<16x1024xbf16, #tpu.memory_space<vmem>>, vector<16x1024xbf16>
    %cst = arith.constant dense<0.000000e+00> : vector<64x1024xf32>
    %3 = tpu.matmul %1, %2, %cst {dimension_numbers = #tpu.dot_dimension_numbers<[1], [0], [0], [1], [0, 0, 1, 1], [], []>} : vector<64x16xbf16>, vector<16x1024xbf16>, vector<64x1024xf32> -> vector<64x1024xf32>
    %c0_4 = arith.constant 0 : index
    %c0_5 = arith.constant 0 : index
    %4 = vector.load %arg4[%c0_4, %c0_5] : memref<1x1024xf32, #tpu.memory_space<vmem>>, vector<1x1024xf32>
    %5 = vector.broadcast %4 : vector<1x1024xf32> to vector<64x1024xf32>
    %6 = arith.addf %3, %5 : vector<64x1024xf32>
    %7 = vector.shape_cast %6 : vector<64x1024xf32> to vector<8x8x1024xf32>
    %c0_6 = arith.constant 0 : index
    %c0_7 = arith.constant 0 : index
    %8 = vector.load %arg1[%c0_6, %c0_7] : memref<8x1xi32, #tpu.memory_space<vmem>>, vector<8x1xi32>
    %cst_8 = arith.constant 0.000000e+00 : f32
    %9 = vector.broadcast %cst_8 : f32 to vector<8x128xf32>
    %cst_9 = arith.constant 0.000000e+00 : f32
    %10 = vector.broadcast %cst_9 : f32 to vector<8x128xf32>
    %cst_10 = arith.constant 0.000000e+00 : f32
    %11 = vector.broadcast %cst_10 : f32 to vector<8x128xf32>
    %cst_11 = arith.constant 0.000000e+00 : f32
    %12 = vector.broadcast %cst_11 : f32 to vector<8x128xf32>
    %c0_i32 = arith.constant 0 : i32
    %13 = vector.broadcast %c0_i32 : i32 to vector<8x1xi32>
    %14 = arith.cmpi sgt, %8, %13 : vector<8x1xi32>
    %c7_i32 = arith.constant 7 : i32
    %15 = vector.broadcast %c7_i32 : i32 to vector<8x1xi32>
    %16 = arith.cmpi sgt, %8, %15 : vector<8x1xi32>
    %17 = tpu.concatenate %9, %11 in 1 : vector<8x128xf32>, vector<8x128xf32> -> vector<8x256xf32>
    %18 = arith.truncf %17 : vector<8x256xf32> to vector<8x256xbf16>
    %c0_12 = arith.constant 0 : index
    %c0_13 = arith.constant 0 : index
    %19 = vector.load %arg3[%c0_12, %c0_13] : memref<256x1024xbf16, #tpu.memory_space<vmem>>, vector<256x1024xbf16>
    %cst_14 = arith.constant dense<0.000000e+00> : vector<8x1024xf32>
    %20 = tpu.matmul %18, %19, %cst_14 {dimension_numbers = #tpu.dot_dimension_numbers<[1], [0], [0], [1], [0, 0, 1, 1], [], []>} : vector<8x256xbf16>, vector<256x1024xbf16>, vector<8x1024xf32> -> vector<8x1024xf32>
    %21 = vector.extract_strided_slice %7 {offsets = [0, 0, 0], sizes = [1, 8, 1024], strides = [1, 1, 1]} : vector<8x8x1024xf32> to vector<1x8x1024xf32>
    %22 = vector.shape_cast %21 : vector<1x8x1024xf32> to vector<8x1024xf32>
    %23 = vector.extract_strided_slice %22 {offsets = [0, 0], sizes = [8, 512], strides = [1, 1]} : vector<8x1024xf32> to vector<8x512xf32>
    %24 = vector.extract_strided_slice %20 {offsets = [0, 0], sizes = [8, 512], strides = [1, 1]} : vector<8x1024xf32> to vector<8x512xf32>
    %25 = arith.addf %23, %24 : vector<8x512xf32>
    %26 = vector.extract_strided_slice %7 {offsets = [7, 0, 0], sizes = [1, 8, 1024], strides = [1, 1, 1]} : vector<8x8x1024xf32> to vector<1x8x1024xf32>
    %27 = vector.shape_cast %26 : vector<1x8x1024xf32> to vector<8x1024xf32>
    %28 = vector.extract_strided_slice %27 {offsets = [0, 512], sizes = [8, 512], strides = [1, 1]} : vector<8x1024xf32> to vector<8x512xf32>
    %29 = vector.extract_strided_slice %20 {offsets = [0, 512], sizes = [8, 512], strides = [1, 1]} : vector<8x1024xf32> to vector<8x512xf32>
    %30 = arith.addf %28, %29 : vector<8x512xf32>
    %31 = vector.extract_strided_slice %25 {offsets = [0, 0], sizes = [8, 128], strides = [1, 1]} : vector<8x512xf32> to vector<8x128xf32>
    %32 = arith.negf %31 : vector<8x128xf32>
    %33 = math.exp %32 : vector<8x128xf32>
    %cst_15 = arith.constant 1.000000e+00 : f32
    %34 = vector.broadcast %cst_15 : f32 to vector<8x128xf32>
    %35 = arith.addf %34, %33 : vector<8x128xf32>
    %36 = arith.divf %34, %35 : vector<8x128xf32>
    %37 = vector.extract_strided_slice %25 {offsets = [0, 128], sizes = [8, 128], strides = [1, 1]} : vector<8x512xf32> to vector<8x128xf32>
    %38 = arith.negf %37 : vector<8x128xf32>
    %39 = math.exp %38 : vector<8x128xf32>
    %cst_16 = arith.constant 1.000000e+00 : f32
    %40 = vector.broadcast %cst_16 : f32 to vector<8x128xf32>
    %41 = arith.addf %40, %39 : vector<8x128xf32>
    %42 = arith.divf %40, %41 : vector<8x128xf32>
    %43 = vector.extract_strided_slice %25 {offsets = [0, 256], sizes = [8, 128], strides = [1, 1]} : vector<8x512xf32> to vector<8x128xf32>
    %44 = math.tanh %43 : vector<8x128xf32>
    %45 = vector.extract_strided_slice %25 {offsets = [0, 384], sizes = [8, 128], strides = [1, 1]} : vector<8x512xf32> to vector<8x128xf32>
    %46 = arith.negf %45 : vector<8x128xf32>
    %47 = math.exp %46 : vector<8x128xf32>
    %cst_17 = arith.constant 1.000000e+00 : f32
    %48 = vector.broadcast %cst_17 : f32 to vector<8x128xf32>
    %49 = arith.addf %48, %47 : vector<8x128xf32>
    %50 = arith.divf %48, %49 : vector<8x128xf32>
    %51 = arith.mulf %42, %10 : vector<8x128xf32>
    %52 = arith.mulf %36, %44 : vector<8x128xf32>
    %53 = arith.addf %51, %52 : vector<8x128xf32>
    %54 = math.tanh %53 : vector<8x128xf32>
    %55 = arith.mulf %50, %54 : vector<8x128xf32>
    %56 = vector.shape_cast %14 : vector<8x1xi1> to vector<8x1xi1>
    %57 = vector.broadcast %56 : vector<8x1xi1> to vector<8x128xi1>
    %58 = arith.select %57, %55, %9 : vector<8x128xi1>, vector<8x128xf32>
    %59 = vector.shape_cast %14 : vector<8x1xi1> to vector<8x1xi1>
    %60 = vector.broadcast %59 : vector<8x1xi1> to vector<8x128xi1>
    %61 = arith.select %60, %53, %10 : vector<8x128xi1>, vector<8x128xf32>
    %62 = vector.extract_strided_slice %30 {offsets = [0, 0], sizes = [8, 128], strides = [1, 1]} : vector<8x512xf32> to vector<8x128xf32>
    %63 = arith.negf %62 : vector<8x128xf32>
    %64 = math.exp %63 : vector<8x128xf32>
    %cst_18 = arith.constant 1.000000e+00 : f32
    %65 = vector.broadcast %cst_18 : f32 to vector<8x128xf32>
    %66 = arith.addf %65, %64 : vector<8x128xf32>
    %67 = arith.divf %65, %66 : vector<8x128xf32>
    %68 = vector.extract_strided_slice %30 {offsets = [0, 128], sizes = [8, 128], strides = [1, 1]} : vector<8x512xf32> to vector<8x128xf32>
    %69 = arith.negf %68 : vector<8x128xf32>
    %70 = math.exp %69 : vector<8x128xf32>
    %cst_19 = arith.constant 1.000000e+00 : f32
    %71 = vector.broadcast %cst_19 : f32 to vector<8x128xf32>
    %72 = arith.addf %71, %70 : vector<8x128xf32>
    %73 = arith.divf %71, %72 : vector<8x128xf32>
    %74 = vector.extract_strided_slice %30 {offsets = [0, 256], sizes = [8, 128], strides = [1, 1]} : vector<8x512xf32> to vector<8x128xf32>
    %75 = math.tanh %74 : vector<8x128xf32>
    %76 = vector.extract_strided_slice %30 {offsets = [0, 384], sizes = [8, 128], strides = [1, 1]} : vector<8x512xf32> to vector<8x128xf32>
    %77 = arith.negf %76 : vector<8x128xf32>
    %78 = math.exp %77 : vector<8x128xf32>
    %cst_20 = arith.constant 1.000000e+00 : f32
    %79 = vector.broadcast %cst_20 : f32 to vector<8x128xf32>
    %80 = arith.addf %79, %78 : vector<8x128xf32>
    %81 = arith.divf %79, %80 : vector<8x128xf32>
    %82 = arith.mulf %73, %12 : vector<8x128xf32>
    %83 = arith.mulf %67, %75 : vector<8x128xf32>
    %84 = arith.addf %82, %83 : vector<8x128xf32>
    %85 = math.tanh %84 : vector<8x128xf32>
    %86 = arith.mulf %81, %85 : vector<8x128xf32>
    %87 = vector.shape_cast %16 : vector<8x1xi1> to vector<8x1xi1>
    %88 = vector.broadcast %87 : vector<8x1xi1> to vector<8x128xi1>
    %89 = arith.select %88, %86, %11 : vector<8x128xi1>, vector<8x128xf32>
    %90 = vector.shape_cast %16 : vector<8x1xi1> to vector<8x1xi1>
    %91 = vector.broadcast %90 : vector<8x1xi1> to vector<8x128xi1>
    %92 = arith.select %91, %84, %12 : vector<8x128xi1>, vector<8x128xf32>
    %c1_i32 = arith.constant 1 : i32
    %93 = vector.broadcast %c1_i32 : i32 to vector<8x1xi32>
    %94 = arith.cmpi sgt, %8, %93 : vector<8x1xi32>
    %c6_i32 = arith.constant 6 : i32
    %95 = vector.broadcast %c6_i32 : i32 to vector<8x1xi32>
    %96 = arith.cmpi sgt, %8, %95 : vector<8x1xi32>
    %97 = tpu.concatenate %58, %89 in 1 : vector<8x128xf32>, vector<8x128xf32> -> vector<8x256xf32>
    %98 = arith.truncf %97 : vector<8x256xf32> to vector<8x256xbf16>
    %c0_21 = arith.constant 0 : index
    %c0_22 = arith.constant 0 : index
    %99 = vector.load %arg3[%c0_21, %c0_22] : memref<256x1024xbf16, #tpu.memory_space<vmem>>, vector<256x1024xbf16>
    %cst_23 = arith.constant dense<0.000000e+00> : vector<8x1024xf32>
    %100 = tpu.matmul %98, %99, %cst_23 {dimension_numbers = #tpu.dot_dimension_numbers<[1], [0], [0], [1], [0, 0, 1, 1], [], []>} : vector<8x256xbf16>, vector<256x1024xbf16>, vector<8x1024xf32> -> vector<8x1024xf32>
    %101 = vector.extract_strided_slice %7 {offsets = [1, 0, 0], sizes = [1, 8, 1024], strides = [1, 1, 1]} : vector<8x8x1024xf32> to vector<1x8x1024xf32>
    %102 = vector.shape_cast %101 : vector<1x8x1024xf32> to vector<8x1024xf32>
    %103 = vector.extract_strided_slice %102 {offsets = [0, 0], sizes = [8, 512], strides = [1, 1]} : vector<8x1024xf32> to vector<8x512xf32>
    %104 = vector.extract_strided_slice %100 {offsets = [0, 0], sizes = [8, 512], strides = [1, 1]} : vector<8x1024xf32> to vector<8x512xf32>
    %105 = arith.addf %103, %104 : vector<8x512xf32>
    %106 = vector.extract_strided_slice %7 {offsets = [6, 0, 0], sizes = [1, 8, 1024], strides = [1, 1, 1]} : vector<8x8x1024xf32> to vector<1x8x1024xf32>
    %107 = vector.shape_cast %106 : vector<1x8x1024xf32> to vector<8x1024xf32>
    %108 = vector.extract_strided_slice %107 {offsets = [0, 512], sizes = [8, 512], strides = [1, 1]} : vector<8x1024xf32> to vector<8x512xf32>
    %109 = vector.extract_strided_slice %100 {offsets = [0, 512], sizes = [8, 512], strides = [1, 1]} : vector<8x1024xf32> to vector<8x512xf32>
    %110 = arith.addf %108, %109 : vector<8x512xf32>
    %111 = vector.extract_strided_slice %105 {offsets = [0, 0], sizes = [8, 128], strides = [1, 1]} : vector<8x512xf32> to vector<8x128xf32>
    %112 = arith.negf %111 : vector<8x128xf32>
    %113 = math.exp %112 : vector<8x128xf32>
    %cst_24 = arith.constant 1.000000e+00 : f32
    %114 = vector.broadcast %cst_24 : f32 to vector<8x128xf32>
    %115 = arith.addf %114, %113 : vector<8x128xf32>
    %116 = arith.divf %114, %115 : vector<8x128xf32>
    %117 = vector.extract_strided_slice %105 {offsets = [0, 128], sizes = [8, 128], strides = [1, 1]} : vector<8x512xf32> to vector<8x128xf32>
    %118 = arith.negf %117 : vector<8x128xf32>
    %119 = math.exp %118 : vector<8x128xf32>
    %cst_25 = arith.constant 1.000000e+00 : f32
    %120 = vector.broadcast %cst_25 : f32 to vector<8x128xf32>
    %121 = arith.addf %120, %119 : vector<8x128xf32>
    %122 = arith.divf %120, %121 : vector<8x128xf32>
    %123 = vector.extract_strided_slice %105 {offsets = [0, 256], sizes = [8, 128], strides = [1, 1]} : vector<8x512xf32> to vector<8x128xf32>
    %124 = math.tanh %123 : vector<8x128xf32>
    %125 = vector.extract_strided_slice %105 {offsets = [0, 384], sizes = [8, 128], strides = [1, 1]} : vector<8x512xf32> to vector<8x128xf32>
    %126 = arith.negf %125 : vector<8x128xf32>
    %127 = math.exp %126 : vector<8x128xf32>
    %cst_26 = arith.constant 1.000000e+00 : f32
    %128 = vector.broadcast %cst_26 : f32 to vector<8x128xf32>
    %129 = arith.addf %128, %127 : vector<8x128xf32>
    %130 = arith.divf %128, %129 : vector<8x128xf32>
    %131 = arith.mulf %122, %61 : vector<8x128xf32>
    %132 = arith.mulf %116, %124 : vector<8x128xf32>
    %133 = arith.addf %131, %132 : vector<8x128xf32>
    %134 = math.tanh %133 : vector<8x128xf32>
    %135 = arith.mulf %130, %134 : vector<8x128xf32>
    %136 = vector.shape_cast %94 : vector<8x1xi1> to vector<8x1xi1>
    %137 = vector.broadcast %136 : vector<8x1xi1> to vector<8x128xi1>
    %138 = arith.select %137, %135, %58 : vector<8x128xi1>, vector<8x128xf32>
    %139 = vector.shape_cast %94 : vector<8x1xi1> to vector<8x1xi1>
    %140 = vector.broadcast %139 : vector<8x1xi1> to vector<8x128xi1>
    %141 = arith.select %140, %133, %61 : vector<8x128xi1>, vector<8x128xf32>
    %142 = vector.extract_strided_slice %110 {offsets = [0, 0], sizes = [8, 128], strides = [1, 1]} : vector<8x512xf32> to vector<8x128xf32>
    %143 = arith.negf %142 : vector<8x128xf32>
    %144 = math.exp %143 : vector<8x128xf32>
    %cst_27 = arith.constant 1.000000e+00 : f32
    %145 = vector.broadcast %cst_27 : f32 to vector<8x128xf32>
    %146 = arith.addf %145, %144 : vector<8x128xf32>
    %147 = arith.divf %145, %146 : vector<8x128xf32>
    %148 = vector.extract_strided_slice %110 {offsets = [0, 128], sizes = [8, 128], strides = [1, 1]} : vector<8x512xf32> to vector<8x128xf32>
    %149 = arith.negf %148 : vector<8x128xf32>
    %150 = math.exp %149 : vector<8x128xf32>
    %cst_28 = arith.constant 1.000000e+00 : f32
    %151 = vector.broadcast %cst_28 : f32 to vector<8x128xf32>
    %152 = arith.addf %151, %150 : vector<8x128xf32>
    %153 = arith.divf %151, %152 : vector<8x128xf32>
    %154 = vector.extract_strided_slice %110 {offsets = [0, 256], sizes = [8, 128], strides = [1, 1]} : vector<8x512xf32> to vector<8x128xf32>
    %155 = math.tanh %154 : vector<8x128xf32>
    %156 = vector.extract_strided_slice %110 {offsets = [0, 384], sizes = [8, 128], strides = [1, 1]} : vector<8x512xf32> to vector<8x128xf32>
    %157 = arith.negf %156 : vector<8x128xf32>
    %158 = math.exp %157 : vector<8x128xf32>
    %cst_29 = arith.constant 1.000000e+00 : f32
    %159 = vector.broadcast %cst_29 : f32 to vector<8x128xf32>
    %160 = arith.addf %159, %158 : vector<8x128xf32>
    %161 = arith.divf %159, %160 : vector<8x128xf32>
    %162 = arith.mulf %153, %92 : vector<8x128xf32>
    %163 = arith.mulf %147, %155 : vector<8x128xf32>
    %164 = arith.addf %162, %163 : vector<8x128xf32>
    %165 = math.tanh %164 : vector<8x128xf32>
    %166 = arith.mulf %161, %165 : vector<8x128xf32>
    %167 = vector.shape_cast %96 : vector<8x1xi1> to vector<8x1xi1>
    %168 = vector.broadcast %167 : vector<8x1xi1> to vector<8x128xi1>
    %169 = arith.select %168, %166, %89 : vector<8x128xi1>, vector<8x128xf32>
    %170 = vector.shape_cast %96 : vector<8x1xi1> to vector<8x1xi1>
    %171 = vector.broadcast %170 : vector<8x1xi1> to vector<8x128xi1>
    %172 = arith.select %171, %164, %92 : vector<8x128xi1>, vector<8x128xf32>
    %c2_i32 = arith.constant 2 : i32
    %173 = vector.broadcast %c2_i32 : i32 to vector<8x1xi32>
    %174 = arith.cmpi sgt, %8, %173 : vector<8x1xi32>
    %c5_i32 = arith.constant 5 : i32
    %175 = vector.broadcast %c5_i32 : i32 to vector<8x1xi32>
    %176 = arith.cmpi sgt, %8, %175 : vector<8x1xi32>
    %177 = tpu.concatenate %138, %169 in 1 : vector<8x128xf32>, vector<8x128xf32> -> vector<8x256xf32>
    %178 = arith.truncf %177 : vector<8x256xf32> to vector<8x256xbf16>
    %c0_30 = arith.constant 0 : index
    %c0_31 = arith.constant 0 : index
    %179 = vector.load %arg3[%c0_30, %c0_31] : memref<256x1024xbf16, #tpu.memory_space<vmem>>, vector<256x1024xbf16>
    %cst_32 = arith.constant dense<0.000000e+00> : vector<8x1024xf32>
    %180 = tpu.matmul %178, %179, %cst_32 {dimension_numbers = #tpu.dot_dimension_numbers<[1], [0], [0], [1], [0, 0, 1, 1], [], []>} : vector<8x256xbf16>, vector<256x1024xbf16>, vector<8x1024xf32> -> vector<8x1024xf32>
    %181 = vector.extract_strided_slice %7 {offsets = [2, 0, 0], sizes = [1, 8, 1024], strides = [1, 1, 1]} : vector<8x8x1024xf32> to vector<1x8x1024xf32>
    %182 = vector.shape_cast %181 : vector<1x8x1024xf32> to vector<8x1024xf32>
    %183 = vector.extract_strided_slice %182 {offsets = [0, 0], sizes = [8, 512], strides = [1, 1]} : vector<8x1024xf32> to vector<8x512xf32>
    %184 = vector.extract_strided_slice %180 {offsets = [0, 0], sizes = [8, 512], strides = [1, 1]} : vector<8x1024xf32> to vector<8x512xf32>
    %185 = arith.addf %183, %184 : vector<8x512xf32>
    %186 = vector.extract_strided_slice %7 {offsets = [5, 0, 0], sizes = [1, 8, 1024], strides = [1, 1, 1]} : vector<8x8x1024xf32> to vector<1x8x1024xf32>
    %187 = vector.shape_cast %186 : vector<1x8x1024xf32> to vector<8x1024xf32>
    %188 = vector.extract_strided_slice %187 {offsets = [0, 512], sizes = [8, 512], strides = [1, 1]} : vector<8x1024xf32> to vector<8x512xf32>
    %189 = vector.extract_strided_slice %180 {offsets = [0, 512], sizes = [8, 512], strides = [1, 1]} : vector<8x1024xf32> to vector<8x512xf32>
    %190 = arith.addf %188, %189 : vector<8x512xf32>
    %191 = vector.extract_strided_slice %185 {offsets = [0, 0], sizes = [8, 128], strides = [1, 1]} : vector<8x512xf32> to vector<8x128xf32>
    %192 = arith.negf %191 : vector<8x128xf32>
    %193 = math.exp %192 : vector<8x128xf32>
    %cst_33 = arith.constant 1.000000e+00 : f32
    %194 = vector.broadcast %cst_33 : f32 to vector<8x128xf32>
    %195 = arith.addf %194, %193 : vector<8x128xf32>
    %196 = arith.divf %194, %195 : vector<8x128xf32>
    %197 = vector.extract_strided_slice %185 {offsets = [0, 128], sizes = [8, 128], strides = [1, 1]} : vector<8x512xf32> to vector<8x128xf32>
    %198 = arith.negf %197 : vector<8x128xf32>
    %199 = math.exp %198 : vector<8x128xf32>
    %cst_34 = arith.constant 1.000000e+00 : f32
    %200 = vector.broadcast %cst_34 : f32 to vector<8x128xf32>
    %201 = arith.addf %200, %199 : vector<8x128xf32>
    %202 = arith.divf %200, %201 : vector<8x128xf32>
    %203 = vector.extract_strided_slice %185 {offsets = [0, 256], sizes = [8, 128], strides = [1, 1]} : vector<8x512xf32> to vector<8x128xf32>
    %204 = math.tanh %203 : vector<8x128xf32>
    %205 = vector.extract_strided_slice %185 {offsets = [0, 384], sizes = [8, 128], strides = [1, 1]} : vector<8x512xf32> to vector<8x128xf32>
    %206 = arith.negf %205 : vector<8x128xf32>
    %207 = math.exp %206 : vector<8x128xf32>
    %cst_35 = arith.constant 1.000000e+00 : f32
    %208 = vector.broadcast %cst_35 : f32 to vector<8x128xf32>
    %209 = arith.addf %208, %207 : vector<8x128xf32>
    %210 = arith.divf %208, %209 : vector<8x128xf32>
    %211 = arith.mulf %202, %141 : vector<8x128xf32>
    %212 = arith.mulf %196, %204 : vector<8x128xf32>
    %213 = arith.addf %211, %212 : vector<8x128xf32>
    %214 = math.tanh %213 : vector<8x128xf32>
    %215 = arith.mulf %210, %214 : vector<8x128xf32>
    %216 = vector.shape_cast %174 : vector<8x1xi1> to vector<8x1xi1>
    %217 = vector.broadcast %216 : vector<8x1xi1> to vector<8x128xi1>
    %218 = arith.select %217, %215, %138 : vector<8x128xi1>, vector<8x128xf32>
    %219 = vector.shape_cast %174 : vector<8x1xi1> to vector<8x1xi1>
    %220 = vector.broadcast %219 : vector<8x1xi1> to vector<8x128xi1>
    %221 = arith.select %220, %213, %141 : vector<8x128xi1>, vector<8x128xf32>
    %222 = vector.extract_strided_slice %190 {offsets = [0, 0], sizes = [8, 128], strides = [1, 1]} : vector<8x512xf32> to vector<8x128xf32>
    %223 = arith.negf %222 : vector<8x128xf32>
    %224 = math.exp %223 : vector<8x128xf32>
    %cst_36 = arith.constant 1.000000e+00 : f32
    %225 = vector.broadcast %cst_36 : f32 to vector<8x128xf32>
    %226 = arith.addf %225, %224 : vector<8x128xf32>
    %227 = arith.divf %225, %226 : vector<8x128xf32>
    %228 = vector.extract_strided_slice %190 {offsets = [0, 128], sizes = [8, 128], strides = [1, 1]} : vector<8x512xf32> to vector<8x128xf32>
    %229 = arith.negf %228 : vector<8x128xf32>
    %230 = math.exp %229 : vector<8x128xf32>
    %cst_37 = arith.constant 1.000000e+00 : f32
    %231 = vector.broadcast %cst_37 : f32 to vector<8x128xf32>
    %232 = arith.addf %231, %230 : vector<8x128xf32>
    %233 = arith.divf %231, %232 : vector<8x128xf32>
    %234 = vector.extract_strided_slice %190 {offsets = [0, 256], sizes = [8, 128], strides = [1, 1]} : vector<8x512xf32> to vector<8x128xf32>
    %235 = math.tanh %234 : vector<8x128xf32>
    %236 = vector.extract_strided_slice %190 {offsets = [0, 384], sizes = [8, 128], strides = [1, 1]} : vector<8x512xf32> to vector<8x128xf32>
    %237 = arith.negf %236 : vector<8x128xf32>
    %238 = math.exp %237 : vector<8x128xf32>
    %cst_38 = arith.constant 1.000000e+00 : f32
    %239 = vector.broadcast %cst_38 : f32 to vector<8x128xf32>
    %240 = arith.addf %239, %238 : vector<8x128xf32>
    %241 = arith.divf %239, %240 : vector<8x128xf32>
    %242 = arith.mulf %233, %172 : vector<8x128xf32>
    %243 = arith.mulf %227, %235 : vector<8x128xf32>
    %244 = arith.addf %242, %243 : vector<8x128xf32>
    %245 = math.tanh %244 : vector<8x128xf32>
    %246 = arith.mulf %241, %245 : vector<8x128xf32>
    %247 = vector.shape_cast %176 : vector<8x1xi1> to vector<8x1xi1>
    %248 = vector.broadcast %247 : vector<8x1xi1> to vector<8x128xi1>
    %249 = arith.select %248, %246, %169 : vector<8x128xi1>, vector<8x128xf32>
    %250 = vector.shape_cast %176 : vector<8x1xi1> to vector<8x1xi1>
    %251 = vector.broadcast %250 : vector<8x1xi1> to vector<8x128xi1>
    %252 = arith.select %251, %244, %172 : vector<8x128xi1>, vector<8x128xf32>
    %c3_i32 = arith.constant 3 : i32
    %253 = vector.broadcast %c3_i32 : i32 to vector<8x1xi32>
    %254 = arith.cmpi sgt, %8, %253 : vector<8x1xi32>
    %c4_i32 = arith.constant 4 : i32
    %255 = vector.broadcast %c4_i32 : i32 to vector<8x1xi32>
    %256 = arith.cmpi sgt, %8, %255 : vector<8x1xi32>
    %257 = tpu.concatenate %218, %249 in 1 : vector<8x128xf32>, vector<8x128xf32> -> vector<8x256xf32>
    %258 = arith.truncf %257 : vector<8x256xf32> to vector<8x256xbf16>
    %c0_39 = arith.constant 0 : index
    %c0_40 = arith.constant 0 : index
    %259 = vector.load %arg3[%c0_39, %c0_40] : memref<256x1024xbf16, #tpu.memory_space<vmem>>, vector<256x1024xbf16>
    %cst_41 = arith.constant dense<0.000000e+00> : vector<8x1024xf32>
    %260 = tpu.matmul %258, %259, %cst_41 {dimension_numbers = #tpu.dot_dimension_numbers<[1], [0], [0], [1], [0, 0, 1, 1], [], []>} : vector<8x256xbf16>, vector<256x1024xbf16>, vector<8x1024xf32> -> vector<8x1024xf32>
    %261 = vector.extract_strided_slice %7 {offsets = [3, 0, 0], sizes = [1, 8, 1024], strides = [1, 1, 1]} : vector<8x8x1024xf32> to vector<1x8x1024xf32>
    %262 = vector.shape_cast %261 : vector<1x8x1024xf32> to vector<8x1024xf32>
    %263 = vector.extract_strided_slice %262 {offsets = [0, 0], sizes = [8, 512], strides = [1, 1]} : vector<8x1024xf32> to vector<8x512xf32>
    %264 = vector.extract_strided_slice %260 {offsets = [0, 0], sizes = [8, 512], strides = [1, 1]} : vector<8x1024xf32> to vector<8x512xf32>
    %265 = arith.addf %263, %264 : vector<8x512xf32>
    %266 = vector.extract_strided_slice %7 {offsets = [4, 0, 0], sizes = [1, 8, 1024], strides = [1, 1, 1]} : vector<8x8x1024xf32> to vector<1x8x1024xf32>
    %267 = vector.shape_cast %266 : vector<1x8x1024xf32> to vector<8x1024xf32>
    %268 = vector.extract_strided_slice %267 {offsets = [0, 512], sizes = [8, 512], strides = [1, 1]} : vector<8x1024xf32> to vector<8x512xf32>
    %269 = vector.extract_strided_slice %260 {offsets = [0, 512], sizes = [8, 512], strides = [1, 1]} : vector<8x1024xf32> to vector<8x512xf32>
    %270 = arith.addf %268, %269 : vector<8x512xf32>
    %271 = vector.extract_strided_slice %265 {offsets = [0, 0], sizes = [8, 128], strides = [1, 1]} : vector<8x512xf32> to vector<8x128xf32>
    %272 = arith.negf %271 : vector<8x128xf32>
    %273 = math.exp %272 : vector<8x128xf32>
    %cst_42 = arith.constant 1.000000e+00 : f32
    %274 = vector.broadcast %cst_42 : f32 to vector<8x128xf32>
    %275 = arith.addf %274, %273 : vector<8x128xf32>
    %276 = arith.divf %274, %275 : vector<8x128xf32>
    %277 = vector.extract_strided_slice %265 {offsets = [0, 128], sizes = [8, 128], strides = [1, 1]} : vector<8x512xf32> to vector<8x128xf32>
    %278 = arith.negf %277 : vector<8x128xf32>
    %279 = math.exp %278 : vector<8x128xf32>
    %cst_43 = arith.constant 1.000000e+00 : f32
    %280 = vector.broadcast %cst_43 : f32 to vector<8x128xf32>
    %281 = arith.addf %280, %279 : vector<8x128xf32>
    %282 = arith.divf %280, %281 : vector<8x128xf32>
    %283 = vector.extract_strided_slice %265 {offsets = [0, 256], sizes = [8, 128], strides = [1, 1]} : vector<8x512xf32> to vector<8x128xf32>
    %284 = math.tanh %283 : vector<8x128xf32>
    %285 = vector.extract_strided_slice %265 {offsets = [0, 384], sizes = [8, 128], strides = [1, 1]} : vector<8x512xf32> to vector<8x128xf32>
    %286 = arith.negf %285 : vector<8x128xf32>
    %287 = math.exp %286 : vector<8x128xf32>
    %cst_44 = arith.constant 1.000000e+00 : f32
    %288 = vector.broadcast %cst_44 : f32 to vector<8x128xf32>
    %289 = arith.addf %288, %287 : vector<8x128xf32>
    %290 = arith.divf %288, %289 : vector<8x128xf32>
    %291 = arith.mulf %282, %221 : vector<8x128xf32>
    %292 = arith.mulf %276, %284 : vector<8x128xf32>
    %293 = arith.addf %291, %292 : vector<8x128xf32>
    %294 = math.tanh %293 : vector<8x128xf32>
    %295 = arith.mulf %290, %294 : vector<8x128xf32>
    %296 = vector.shape_cast %254 : vector<8x1xi1> to vector<8x1xi1>
    %297 = vector.broadcast %296 : vector<8x1xi1> to vector<8x128xi1>
    %298 = arith.select %297, %295, %218 : vector<8x128xi1>, vector<8x128xf32>
    %299 = vector.shape_cast %254 : vector<8x1xi1> to vector<8x1xi1>
    %300 = vector.broadcast %299 : vector<8x1xi1> to vector<8x128xi1>
    %301 = arith.select %300, %293, %221 : vector<8x128xi1>, vector<8x128xf32>
    %302 = vector.extract_strided_slice %270 {offsets = [0, 0], sizes = [8, 128], strides = [1, 1]} : vector<8x512xf32> to vector<8x128xf32>
    %303 = arith.negf %302 : vector<8x128xf32>
    %304 = math.exp %303 : vector<8x128xf32>
    %cst_45 = arith.constant 1.000000e+00 : f32
    %305 = vector.broadcast %cst_45 : f32 to vector<8x128xf32>
    %306 = arith.addf %305, %304 : vector<8x128xf32>
    %307 = arith.divf %305, %306 : vector<8x128xf32>
    %308 = vector.extract_strided_slice %270 {offsets = [0, 128], sizes = [8, 128], strides = [1, 1]} : vector<8x512xf32> to vector<8x128xf32>
    %309 = arith.negf %308 : vector<8x128xf32>
    %310 = math.exp %309 : vector<8x128xf32>
    %cst_46 = arith.constant 1.000000e+00 : f32
    %311 = vector.broadcast %cst_46 : f32 to vector<8x128xf32>
    %312 = arith.addf %311, %310 : vector<8x128xf32>
    %313 = arith.divf %311, %312 : vector<8x128xf32>
    %314 = vector.extract_strided_slice %270 {offsets = [0, 256], sizes = [8, 128], strides = [1, 1]} : vector<8x512xf32> to vector<8x128xf32>
    %315 = math.tanh %314 : vector<8x128xf32>
    %316 = vector.extract_strided_slice %270 {offsets = [0, 384], sizes = [8, 128], strides = [1, 1]} : vector<8x512xf32> to vector<8x128xf32>
    %317 = arith.negf %316 : vector<8x128xf32>
    %318 = math.exp %317 : vector<8x128xf32>
    %cst_47 = arith.constant 1.000000e+00 : f32
    %319 = vector.broadcast %cst_47 : f32 to vector<8x128xf32>
    %320 = arith.addf %319, %318 : vector<8x128xf32>
    %321 = arith.divf %319, %320 : vector<8x128xf32>
    %322 = arith.mulf %313, %252 : vector<8x128xf32>
    %323 = arith.mulf %307, %315 : vector<8x128xf32>
    %324 = arith.addf %322, %323 : vector<8x128xf32>
    %325 = math.tanh %324 : vector<8x128xf32>
    %326 = arith.mulf %321, %325 : vector<8x128xf32>
    %327 = vector.shape_cast %256 : vector<8x1xi1> to vector<8x1xi1>
    %328 = vector.broadcast %327 : vector<8x1xi1> to vector<8x128xi1>
    %329 = arith.select %328, %326, %249 : vector<8x128xi1>, vector<8x128xf32>
    %330 = vector.shape_cast %256 : vector<8x1xi1> to vector<8x1xi1>
    %331 = vector.broadcast %330 : vector<8x1xi1> to vector<8x128xi1>
    %332 = arith.select %331, %324, %252 : vector<8x128xi1>, vector<8x128xf32>
    %c4_i32_48 = arith.constant 4 : i32
    %333 = vector.broadcast %c4_i32_48 : i32 to vector<8x1xi32>
    %334 = arith.cmpi sgt, %8, %333 : vector<8x1xi32>
    %c3_i32_49 = arith.constant 3 : i32
    %335 = vector.broadcast %c3_i32_49 : i32 to vector<8x1xi32>
    %336 = arith.cmpi sgt, %8, %335 : vector<8x1xi32>
    %337 = tpu.concatenate %298, %329 in 1 : vector<8x128xf32>, vector<8x128xf32> -> vector<8x256xf32>
    %338 = arith.truncf %337 : vector<8x256xf32> to vector<8x256xbf16>
    %c0_50 = arith.constant 0 : index
    %c0_51 = arith.constant 0 : index
    %339 = vector.load %arg3[%c0_50, %c0_51] : memref<256x1024xbf16, #tpu.memory_space<vmem>>, vector<256x1024xbf16>
    %cst_52 = arith.constant dense<0.000000e+00> : vector<8x1024xf32>
    %340 = tpu.matmul %338, %339, %cst_52 {dimension_numbers = #tpu.dot_dimension_numbers<[1], [0], [0], [1], [0, 0, 1, 1], [], []>} : vector<8x256xbf16>, vector<256x1024xbf16>, vector<8x1024xf32> -> vector<8x1024xf32>
    %341 = vector.extract_strided_slice %7 {offsets = [4, 0, 0], sizes = [1, 8, 1024], strides = [1, 1, 1]} : vector<8x8x1024xf32> to vector<1x8x1024xf32>
    %342 = vector.shape_cast %341 : vector<1x8x1024xf32> to vector<8x1024xf32>
    %343 = vector.extract_strided_slice %342 {offsets = [0, 0], sizes = [8, 512], strides = [1, 1]} : vector<8x1024xf32> to vector<8x512xf32>
    %344 = vector.extract_strided_slice %340 {offsets = [0, 0], sizes = [8, 512], strides = [1, 1]} : vector<8x1024xf32> to vector<8x512xf32>
    %345 = arith.addf %343, %344 : vector<8x512xf32>
    %346 = vector.extract_strided_slice %7 {offsets = [3, 0, 0], sizes = [1, 8, 1024], strides = [1, 1, 1]} : vector<8x8x1024xf32> to vector<1x8x1024xf32>
    %347 = vector.shape_cast %346 : vector<1x8x1024xf32> to vector<8x1024xf32>
    %348 = vector.extract_strided_slice %347 {offsets = [0, 512], sizes = [8, 512], strides = [1, 1]} : vector<8x1024xf32> to vector<8x512xf32>
    %349 = vector.extract_strided_slice %340 {offsets = [0, 512], sizes = [8, 512], strides = [1, 1]} : vector<8x1024xf32> to vector<8x512xf32>
    %350 = arith.addf %348, %349 : vector<8x512xf32>
    %351 = vector.extract_strided_slice %345 {offsets = [0, 0], sizes = [8, 128], strides = [1, 1]} : vector<8x512xf32> to vector<8x128xf32>
    %352 = arith.negf %351 : vector<8x128xf32>
    %353 = math.exp %352 : vector<8x128xf32>
    %cst_53 = arith.constant 1.000000e+00 : f32
    %354 = vector.broadcast %cst_53 : f32 to vector<8x128xf32>
    %355 = arith.addf %354, %353 : vector<8x128xf32>
    %356 = arith.divf %354, %355 : vector<8x128xf32>
    %357 = vector.extract_strided_slice %345 {offsets = [0, 128], sizes = [8, 128], strides = [1, 1]} : vector<8x512xf32> to vector<8x128xf32>
    %358 = arith.negf %357 : vector<8x128xf32>
    %359 = math.exp %358 : vector<8x128xf32>
    %cst_54 = arith.constant 1.000000e+00 : f32
    %360 = vector.broadcast %cst_54 : f32 to vector<8x128xf32>
    %361 = arith.addf %360, %359 : vector<8x128xf32>
    %362 = arith.divf %360, %361 : vector<8x128xf32>
    %363 = vector.extract_strided_slice %345 {offsets = [0, 256], sizes = [8, 128], strides = [1, 1]} : vector<8x512xf32> to vector<8x128xf32>
    %364 = math.tanh %363 : vector<8x128xf32>
    %365 = vector.extract_strided_slice %345 {offsets = [0, 384], sizes = [8, 128], strides = [1, 1]} : vector<8x512xf32> to vector<8x128xf32>
    %366 = arith.negf %365 : vector<8x128xf32>
    %367 = math.exp %366 : vector<8x128xf32>
    %cst_55 = arith.constant 1.000000e+00 : f32
    %368 = vector.broadcast %cst_55 : f32 to vector<8x128xf32>
    %369 = arith.addf %368, %367 : vector<8x128xf32>
    %370 = arith.divf %368, %369 : vector<8x128xf32>
    %371 = arith.mulf %362, %301 : vector<8x128xf32>
    %372 = arith.mulf %356, %364 : vector<8x128xf32>
    %373 = arith.addf %371, %372 : vector<8x128xf32>
    %374 = math.tanh %373 : vector<8x128xf32>
    %375 = arith.mulf %370, %374 : vector<8x128xf32>
    %376 = vector.shape_cast %334 : vector<8x1xi1> to vector<8x1xi1>
    %377 = vector.broadcast %376 : vector<8x1xi1> to vector<8x128xi1>
    %378 = arith.select %377, %375, %298 : vector<8x128xi1>, vector<8x128xf32>
    %379 = vector.shape_cast %334 : vector<8x1xi1> to vector<8x1xi1>
    %380 = vector.broadcast %379 : vector<8x1xi1> to vector<8x128xi1>
    %381 = arith.select %380, %373, %301 : vector<8x128xi1>, vector<8x128xf32>
    %382 = vector.extract_strided_slice %350 {offsets = [0, 0], sizes = [8, 128], strides = [1, 1]} : vector<8x512xf32> to vector<8x128xf32>
    %383 = arith.negf %382 : vector<8x128xf32>
    %384 = math.exp %383 : vector<8x128xf32>
    %cst_56 = arith.constant 1.000000e+00 : f32
    %385 = vector.broadcast %cst_56 : f32 to vector<8x128xf32>
    %386 = arith.addf %385, %384 : vector<8x128xf32>
    %387 = arith.divf %385, %386 : vector<8x128xf32>
    %388 = vector.extract_strided_slice %350 {offsets = [0, 128], sizes = [8, 128], strides = [1, 1]} : vector<8x512xf32> to vector<8x128xf32>
    %389 = arith.negf %388 : vector<8x128xf32>
    %390 = math.exp %389 : vector<8x128xf32>
    %cst_57 = arith.constant 1.000000e+00 : f32
    %391 = vector.broadcast %cst_57 : f32 to vector<8x128xf32>
    %392 = arith.addf %391, %390 : vector<8x128xf32>
    %393 = arith.divf %391, %392 : vector<8x128xf32>
    %394 = vector.extract_strided_slice %350 {offsets = [0, 256], sizes = [8, 128], strides = [1, 1]} : vector<8x512xf32> to vector<8x128xf32>
    %395 = math.tanh %394 : vector<8x128xf32>
    %396 = vector.extract_strided_slice %350 {offsets = [0, 384], sizes = [8, 128], strides = [1, 1]} : vector<8x512xf32> to vector<8x128xf32>
    %397 = arith.negf %396 : vector<8x128xf32>
    %398 = math.exp %397 : vector<8x128xf32>
    %cst_58 = arith.constant 1.000000e+00 : f32
    %399 = vector.broadcast %cst_58 : f32 to vector<8x128xf32>
    %400 = arith.addf %399, %398 : vector<8x128xf32>
    %401 = arith.divf %399, %400 : vector<8x128xf32>
    %402 = arith.mulf %393, %332 : vector<8x128xf32>
    %403 = arith.mulf %387, %395 : vector<8x128xf32>
    %404 = arith.addf %402, %403 : vector<8x128xf32>
    %405 = math.tanh %404 : vector<8x128xf32>
    %406 = arith.mulf %401, %405 : vector<8x128xf32>
    %407 = vector.shape_cast %336 : vector<8x1xi1> to vector<8x1xi1>
    %408 = vector.broadcast %407 : vector<8x1xi1> to vector<8x128xi1>
    %409 = arith.select %408, %406, %329 : vector<8x128xi1>, vector<8x128xf32>
    %410 = vector.shape_cast %336 : vector<8x1xi1> to vector<8x1xi1>
    %411 = vector.broadcast %410 : vector<8x1xi1> to vector<8x128xi1>
    %412 = arith.select %411, %404, %332 : vector<8x128xi1>, vector<8x128xf32>
    %c5_i32_59 = arith.constant 5 : i32
    %413 = vector.broadcast %c5_i32_59 : i32 to vector<8x1xi32>
    %414 = arith.cmpi sgt, %8, %413 : vector<8x1xi32>
    %c2_i32_60 = arith.constant 2 : i32
    %415 = vector.broadcast %c2_i32_60 : i32 to vector<8x1xi32>
    %416 = arith.cmpi sgt, %8, %415 : vector<8x1xi32>
    %417 = tpu.concatenate %378, %409 in 1 : vector<8x128xf32>, vector<8x128xf32> -> vector<8x256xf32>
    %418 = arith.truncf %417 : vector<8x256xf32> to vector<8x256xbf16>
    %c0_61 = arith.constant 0 : index
    %c0_62 = arith.constant 0 : index
    %419 = vector.load %arg3[%c0_61, %c0_62] : memref<256x1024xbf16, #tpu.memory_space<vmem>>, vector<256x1024xbf16>
    %cst_63 = arith.constant dense<0.000000e+00> : vector<8x1024xf32>
    %420 = tpu.matmul %418, %419, %cst_63 {dimension_numbers = #tpu.dot_dimension_numbers<[1], [0], [0], [1], [0, 0, 1, 1], [], []>} : vector<8x256xbf16>, vector<256x1024xbf16>, vector<8x1024xf32> -> vector<8x1024xf32>
    %421 = vector.extract_strided_slice %7 {offsets = [5, 0, 0], sizes = [1, 8, 1024], strides = [1, 1, 1]} : vector<8x8x1024xf32> to vector<1x8x1024xf32>
    %422 = vector.shape_cast %421 : vector<1x8x1024xf32> to vector<8x1024xf32>
    %423 = vector.extract_strided_slice %422 {offsets = [0, 0], sizes = [8, 512], strides = [1, 1]} : vector<8x1024xf32> to vector<8x512xf32>
    %424 = vector.extract_strided_slice %420 {offsets = [0, 0], sizes = [8, 512], strides = [1, 1]} : vector<8x1024xf32> to vector<8x512xf32>
    %425 = arith.addf %423, %424 : vector<8x512xf32>
    %426 = vector.extract_strided_slice %7 {offsets = [2, 0, 0], sizes = [1, 8, 1024], strides = [1, 1, 1]} : vector<8x8x1024xf32> to vector<1x8x1024xf32>
    %427 = vector.shape_cast %426 : vector<1x8x1024xf32> to vector<8x1024xf32>
    %428 = vector.extract_strided_slice %427 {offsets = [0, 512], sizes = [8, 512], strides = [1, 1]} : vector<8x1024xf32> to vector<8x512xf32>
    %429 = vector.extract_strided_slice %420 {offsets = [0, 512], sizes = [8, 512], strides = [1, 1]} : vector<8x1024xf32> to vector<8x512xf32>
    %430 = arith.addf %428, %429 : vector<8x512xf32>
    %431 = vector.extract_strided_slice %425 {offsets = [0, 0], sizes = [8, 128], strides = [1, 1]} : vector<8x512xf32> to vector<8x128xf32>
    %432 = arith.negf %431 : vector<8x128xf32>
    %433 = math.exp %432 : vector<8x128xf32>
    %cst_64 = arith.constant 1.000000e+00 : f32
    %434 = vector.broadcast %cst_64 : f32 to vector<8x128xf32>
    %435 = arith.addf %434, %433 : vector<8x128xf32>
    %436 = arith.divf %434, %435 : vector<8x128xf32>
    %437 = vector.extract_strided_slice %425 {offsets = [0, 128], sizes = [8, 128], strides = [1, 1]} : vector<8x512xf32> to vector<8x128xf32>
    %438 = arith.negf %437 : vector<8x128xf32>
    %439 = math.exp %438 : vector<8x128xf32>
    %cst_65 = arith.constant 1.000000e+00 : f32
    %440 = vector.broadcast %cst_65 : f32 to vector<8x128xf32>
    %441 = arith.addf %440, %439 : vector<8x128xf32>
    %442 = arith.divf %440, %441 : vector<8x128xf32>
    %443 = vector.extract_strided_slice %425 {offsets = [0, 256], sizes = [8, 128], strides = [1, 1]} : vector<8x512xf32> to vector<8x128xf32>
    %444 = math.tanh %443 : vector<8x128xf32>
    %445 = vector.extract_strided_slice %425 {offsets = [0, 384], sizes = [8, 128], strides = [1, 1]} : vector<8x512xf32> to vector<8x128xf32>
    %446 = arith.negf %445 : vector<8x128xf32>
    %447 = math.exp %446 : vector<8x128xf32>
    %cst_66 = arith.constant 1.000000e+00 : f32
    %448 = vector.broadcast %cst_66 : f32 to vector<8x128xf32>
    %449 = arith.addf %448, %447 : vector<8x128xf32>
    %450 = arith.divf %448, %449 : vector<8x128xf32>
    %451 = arith.mulf %442, %381 : vector<8x128xf32>
    %452 = arith.mulf %436, %444 : vector<8x128xf32>
    %453 = arith.addf %451, %452 : vector<8x128xf32>
    %454 = math.tanh %453 : vector<8x128xf32>
    %455 = arith.mulf %450, %454 : vector<8x128xf32>
    %456 = vector.shape_cast %414 : vector<8x1xi1> to vector<8x1xi1>
    %457 = vector.broadcast %456 : vector<8x1xi1> to vector<8x128xi1>
    %458 = arith.select %457, %455, %378 : vector<8x128xi1>, vector<8x128xf32>
    %459 = vector.shape_cast %414 : vector<8x1xi1> to vector<8x1xi1>
    %460 = vector.broadcast %459 : vector<8x1xi1> to vector<8x128xi1>
    %461 = arith.select %460, %453, %381 : vector<8x128xi1>, vector<8x128xf32>
    %462 = vector.extract_strided_slice %430 {offsets = [0, 0], sizes = [8, 128], strides = [1, 1]} : vector<8x512xf32> to vector<8x128xf32>
    %463 = arith.negf %462 : vector<8x128xf32>
    %464 = math.exp %463 : vector<8x128xf32>
    %cst_67 = arith.constant 1.000000e+00 : f32
    %465 = vector.broadcast %cst_67 : f32 to vector<8x128xf32>
    %466 = arith.addf %465, %464 : vector<8x128xf32>
    %467 = arith.divf %465, %466 : vector<8x128xf32>
    %468 = vector.extract_strided_slice %430 {offsets = [0, 128], sizes = [8, 128], strides = [1, 1]} : vector<8x512xf32> to vector<8x128xf32>
    %469 = arith.negf %468 : vector<8x128xf32>
    %470 = math.exp %469 : vector<8x128xf32>
    %cst_68 = arith.constant 1.000000e+00 : f32
    %471 = vector.broadcast %cst_68 : f32 to vector<8x128xf32>
    %472 = arith.addf %471, %470 : vector<8x128xf32>
    %473 = arith.divf %471, %472 : vector<8x128xf32>
    %474 = vector.extract_strided_slice %430 {offsets = [0, 256], sizes = [8, 128], strides = [1, 1]} : vector<8x512xf32> to vector<8x128xf32>
    %475 = math.tanh %474 : vector<8x128xf32>
    %476 = vector.extract_strided_slice %430 {offsets = [0, 384], sizes = [8, 128], strides = [1, 1]} : vector<8x512xf32> to vector<8x128xf32>
    %477 = arith.negf %476 : vector<8x128xf32>
    %478 = math.exp %477 : vector<8x128xf32>
    %cst_69 = arith.constant 1.000000e+00 : f32
    %479 = vector.broadcast %cst_69 : f32 to vector<8x128xf32>
    %480 = arith.addf %479, %478 : vector<8x128xf32>
    %481 = arith.divf %479, %480 : vector<8x128xf32>
    %482 = arith.mulf %473, %412 : vector<8x128xf32>
    %483 = arith.mulf %467, %475 : vector<8x128xf32>
    %484 = arith.addf %482, %483 : vector<8x128xf32>
    %485 = math.tanh %484 : vector<8x128xf32>
    %486 = arith.mulf %481, %485 : vector<8x128xf32>
    %487 = vector.shape_cast %416 : vector<8x1xi1> to vector<8x1xi1>
    %488 = vector.broadcast %487 : vector<8x1xi1> to vector<8x128xi1>
    %489 = arith.select %488, %486, %409 : vector<8x128xi1>, vector<8x128xf32>
    %490 = vector.shape_cast %416 : vector<8x1xi1> to vector<8x1xi1>
    %491 = vector.broadcast %490 : vector<8x1xi1> to vector<8x128xi1>
    %492 = arith.select %491, %484, %412 : vector<8x128xi1>, vector<8x128xf32>
    %c6_i32_70 = arith.constant 6 : i32
    %493 = vector.broadcast %c6_i32_70 : i32 to vector<8x1xi32>
    %494 = arith.cmpi sgt, %8, %493 : vector<8x1xi32>
    %c1_i32_71 = arith.constant 1 : i32
    %495 = vector.broadcast %c1_i32_71 : i32 to vector<8x1xi32>
    %496 = arith.cmpi sgt, %8, %495 : vector<8x1xi32>
    %497 = tpu.concatenate %458, %489 in 1 : vector<8x128xf32>, vector<8x128xf32> -> vector<8x256xf32>
    %498 = arith.truncf %497 : vector<8x256xf32> to vector<8x256xbf16>
    %c0_72 = arith.constant 0 : index
    %c0_73 = arith.constant 0 : index
    %499 = vector.load %arg3[%c0_72, %c0_73] : memref<256x1024xbf16, #tpu.memory_space<vmem>>, vector<256x1024xbf16>
    %cst_74 = arith.constant dense<0.000000e+00> : vector<8x1024xf32>
    %500 = tpu.matmul %498, %499, %cst_74 {dimension_numbers = #tpu.dot_dimension_numbers<[1], [0], [0], [1], [0, 0, 1, 1], [], []>} : vector<8x256xbf16>, vector<256x1024xbf16>, vector<8x1024xf32> -> vector<8x1024xf32>
    %501 = vector.extract_strided_slice %7 {offsets = [6, 0, 0], sizes = [1, 8, 1024], strides = [1, 1, 1]} : vector<8x8x1024xf32> to vector<1x8x1024xf32>
    %502 = vector.shape_cast %501 : vector<1x8x1024xf32> to vector<8x1024xf32>
    %503 = vector.extract_strided_slice %502 {offsets = [0, 0], sizes = [8, 512], strides = [1, 1]} : vector<8x1024xf32> to vector<8x512xf32>
    %504 = vector.extract_strided_slice %500 {offsets = [0, 0], sizes = [8, 512], strides = [1, 1]} : vector<8x1024xf32> to vector<8x512xf32>
    %505 = arith.addf %503, %504 : vector<8x512xf32>
    %506 = vector.extract_strided_slice %7 {offsets = [1, 0, 0], sizes = [1, 8, 1024], strides = [1, 1, 1]} : vector<8x8x1024xf32> to vector<1x8x1024xf32>
    %507 = vector.shape_cast %506 : vector<1x8x1024xf32> to vector<8x1024xf32>
    %508 = vector.extract_strided_slice %507 {offsets = [0, 512], sizes = [8, 512], strides = [1, 1]} : vector<8x1024xf32> to vector<8x512xf32>
    %509 = vector.extract_strided_slice %500 {offsets = [0, 512], sizes = [8, 512], strides = [1, 1]} : vector<8x1024xf32> to vector<8x512xf32>
    %510 = arith.addf %508, %509 : vector<8x512xf32>
    %511 = vector.extract_strided_slice %505 {offsets = [0, 0], sizes = [8, 128], strides = [1, 1]} : vector<8x512xf32> to vector<8x128xf32>
    %512 = arith.negf %511 : vector<8x128xf32>
    %513 = math.exp %512 : vector<8x128xf32>
    %cst_75 = arith.constant 1.000000e+00 : f32
    %514 = vector.broadcast %cst_75 : f32 to vector<8x128xf32>
    %515 = arith.addf %514, %513 : vector<8x128xf32>
    %516 = arith.divf %514, %515 : vector<8x128xf32>
    %517 = vector.extract_strided_slice %505 {offsets = [0, 128], sizes = [8, 128], strides = [1, 1]} : vector<8x512xf32> to vector<8x128xf32>
    %518 = arith.negf %517 : vector<8x128xf32>
    %519 = math.exp %518 : vector<8x128xf32>
    %cst_76 = arith.constant 1.000000e+00 : f32
    %520 = vector.broadcast %cst_76 : f32 to vector<8x128xf32>
    %521 = arith.addf %520, %519 : vector<8x128xf32>
    %522 = arith.divf %520, %521 : vector<8x128xf32>
    %523 = vector.extract_strided_slice %505 {offsets = [0, 256], sizes = [8, 128], strides = [1, 1]} : vector<8x512xf32> to vector<8x128xf32>
    %524 = math.tanh %523 : vector<8x128xf32>
    %525 = vector.extract_strided_slice %505 {offsets = [0, 384], sizes = [8, 128], strides = [1, 1]} : vector<8x512xf32> to vector<8x128xf32>
    %526 = arith.negf %525 : vector<8x128xf32>
    %527 = math.exp %526 : vector<8x128xf32>
    %cst_77 = arith.constant 1.000000e+00 : f32
    %528 = vector.broadcast %cst_77 : f32 to vector<8x128xf32>
    %529 = arith.addf %528, %527 : vector<8x128xf32>
    %530 = arith.divf %528, %529 : vector<8x128xf32>
    %531 = arith.mulf %522, %461 : vector<8x128xf32>
    %532 = arith.mulf %516, %524 : vector<8x128xf32>
    %533 = arith.addf %531, %532 : vector<8x128xf32>
    %534 = math.tanh %533 : vector<8x128xf32>
    %535 = arith.mulf %530, %534 : vector<8x128xf32>
    %536 = vector.shape_cast %494 : vector<8x1xi1> to vector<8x1xi1>
    %537 = vector.broadcast %536 : vector<8x1xi1> to vector<8x128xi1>
    %538 = arith.select %537, %535, %458 : vector<8x128xi1>, vector<8x128xf32>
    %539 = vector.shape_cast %494 : vector<8x1xi1> to vector<8x1xi1>
    %540 = vector.broadcast %539 : vector<8x1xi1> to vector<8x128xi1>
    %541 = arith.select %540, %533, %461 : vector<8x128xi1>, vector<8x128xf32>
    %542 = vector.extract_strided_slice %510 {offsets = [0, 0], sizes = [8, 128], strides = [1, 1]} : vector<8x512xf32> to vector<8x128xf32>
    %543 = arith.negf %542 : vector<8x128xf32>
    %544 = math.exp %543 : vector<8x128xf32>
    %cst_78 = arith.constant 1.000000e+00 : f32
    %545 = vector.broadcast %cst_78 : f32 to vector<8x128xf32>
    %546 = arith.addf %545, %544 : vector<8x128xf32>
    %547 = arith.divf %545, %546 : vector<8x128xf32>
    %548 = vector.extract_strided_slice %510 {offsets = [0, 128], sizes = [8, 128], strides = [1, 1]} : vector<8x512xf32> to vector<8x128xf32>
    %549 = arith.negf %548 : vector<8x128xf32>
    %550 = math.exp %549 : vector<8x128xf32>
    %cst_79 = arith.constant 1.000000e+00 : f32
    %551 = vector.broadcast %cst_79 : f32 to vector<8x128xf32>
    %552 = arith.addf %551, %550 : vector<8x128xf32>
    %553 = arith.divf %551, %552 : vector<8x128xf32>
    %554 = vector.extract_strided_slice %510 {offsets = [0, 256], sizes = [8, 128], strides = [1, 1]} : vector<8x512xf32> to vector<8x128xf32>
    %555 = math.tanh %554 : vector<8x128xf32>
    %556 = vector.extract_strided_slice %510 {offsets = [0, 384], sizes = [8, 128], strides = [1, 1]} : vector<8x512xf32> to vector<8x128xf32>
    %557 = arith.negf %556 : vector<8x128xf32>
    %558 = math.exp %557 : vector<8x128xf32>
    %cst_80 = arith.constant 1.000000e+00 : f32
    %559 = vector.broadcast %cst_80 : f32 to vector<8x128xf32>
    %560 = arith.addf %559, %558 : vector<8x128xf32>
    %561 = arith.divf %559, %560 : vector<8x128xf32>
    %562 = arith.mulf %553, %492 : vector<8x128xf32>
    %563 = arith.mulf %547, %555 : vector<8x128xf32>
    %564 = arith.addf %562, %563 : vector<8x128xf32>
    %565 = math.tanh %564 : vector<8x128xf32>
    %566 = arith.mulf %561, %565 : vector<8x128xf32>
    %567 = vector.shape_cast %496 : vector<8x1xi1> to vector<8x1xi1>
    %568 = vector.broadcast %567 : vector<8x1xi1> to vector<8x128xi1>
    %569 = arith.select %568, %566, %489 : vector<8x128xi1>, vector<8x128xf32>
    %570 = vector.shape_cast %496 : vector<8x1xi1> to vector<8x1xi1>
    %571 = vector.broadcast %570 : vector<8x1xi1> to vector<8x128xi1>
    %572 = arith.select %571, %564, %492 : vector<8x128xi1>, vector<8x128xf32>
    %c7_i32_81 = arith.constant 7 : i32
    %573 = vector.broadcast %c7_i32_81 : i32 to vector<8x1xi32>
    %574 = arith.cmpi sgt, %8, %573 : vector<8x1xi32>
    %c0_i32_82 = arith.constant 0 : i32
    %575 = vector.broadcast %c0_i32_82 : i32 to vector<8x1xi32>
    %576 = arith.cmpi sgt, %8, %575 : vector<8x1xi32>
    %577 = tpu.concatenate %538, %569 in 1 : vector<8x128xf32>, vector<8x128xf32> -> vector<8x256xf32>
    %578 = arith.truncf %577 : vector<8x256xf32> to vector<8x256xbf16>
    %c0_83 = arith.constant 0 : index
    %c0_84 = arith.constant 0 : index
    %579 = vector.load %arg3[%c0_83, %c0_84] : memref<256x1024xbf16, #tpu.memory_space<vmem>>, vector<256x1024xbf16>
    %cst_85 = arith.constant dense<0.000000e+00> : vector<8x1024xf32>
    %580 = tpu.matmul %578, %579, %cst_85 {dimension_numbers = #tpu.dot_dimension_numbers<[1], [0], [0], [1], [0, 0, 1, 1], [], []>} : vector<8x256xbf16>, vector<256x1024xbf16>, vector<8x1024xf32> -> vector<8x1024xf32>
    %581 = vector.extract_strided_slice %7 {offsets = [7, 0, 0], sizes = [1, 8, 1024], strides = [1, 1, 1]} : vector<8x8x1024xf32> to vector<1x8x1024xf32>
    %582 = vector.shape_cast %581 : vector<1x8x1024xf32> to vector<8x1024xf32>
    %583 = vector.extract_strided_slice %582 {offsets = [0, 0], sizes = [8, 512], strides = [1, 1]} : vector<8x1024xf32> to vector<8x512xf32>
    %584 = vector.extract_strided_slice %580 {offsets = [0, 0], sizes = [8, 512], strides = [1, 1]} : vector<8x1024xf32> to vector<8x512xf32>
    %585 = arith.addf %583, %584 : vector<8x512xf32>
    %586 = vector.extract_strided_slice %7 {offsets = [0, 0, 0], sizes = [1, 8, 1024], strides = [1, 1, 1]} : vector<8x8x1024xf32> to vector<1x8x1024xf32>
    %587 = vector.shape_cast %586 : vector<1x8x1024xf32> to vector<8x1024xf32>
    %588 = vector.extract_strided_slice %587 {offsets = [0, 512], sizes = [8, 512], strides = [1, 1]} : vector<8x1024xf32> to vector<8x512xf32>
    %589 = vector.extract_strided_slice %580 {offsets = [0, 512], sizes = [8, 512], strides = [1, 1]} : vector<8x1024xf32> to vector<8x512xf32>
    %590 = arith.addf %588, %589 : vector<8x512xf32>
    %591 = vector.extract_strided_slice %585 {offsets = [0, 0], sizes = [8, 128], strides = [1, 1]} : vector<8x512xf32> to vector<8x128xf32>
    %592 = arith.negf %591 : vector<8x128xf32>
    %593 = math.exp %592 : vector<8x128xf32>
    %cst_86 = arith.constant 1.000000e+00 : f32
    %594 = vector.broadcast %cst_86 : f32 to vector<8x128xf32>
    %595 = arith.addf %594, %593 : vector<8x128xf32>
    %596 = arith.divf %594, %595 : vector<8x128xf32>
    %597 = vector.extract_strided_slice %585 {offsets = [0, 128], sizes = [8, 128], strides = [1, 1]} : vector<8x512xf32> to vector<8x128xf32>
    %598 = arith.negf %597 : vector<8x128xf32>
    %599 = math.exp %598 : vector<8x128xf32>
    %cst_87 = arith.constant 1.000000e+00 : f32
    %600 = vector.broadcast %cst_87 : f32 to vector<8x128xf32>
    %601 = arith.addf %600, %599 : vector<8x128xf32>
    %602 = arith.divf %600, %601 : vector<8x128xf32>
    %603 = vector.extract_strided_slice %585 {offsets = [0, 256], sizes = [8, 128], strides = [1, 1]} : vector<8x512xf32> to vector<8x128xf32>
    %604 = math.tanh %603 : vector<8x128xf32>
    %605 = vector.extract_strided_slice %585 {offsets = [0, 384], sizes = [8, 128], strides = [1, 1]} : vector<8x512xf32> to vector<8x128xf32>
    %606 = arith.negf %605 : vector<8x128xf32>
    %607 = math.exp %606 : vector<8x128xf32>
    %cst_88 = arith.constant 1.000000e+00 : f32
    %608 = vector.broadcast %cst_88 : f32 to vector<8x128xf32>
    %609 = arith.addf %608, %607 : vector<8x128xf32>
    %610 = arith.divf %608, %609 : vector<8x128xf32>
    %611 = arith.mulf %602, %541 : vector<8x128xf32>
    %612 = arith.mulf %596, %604 : vector<8x128xf32>
    %613 = arith.addf %611, %612 : vector<8x128xf32>
    %614 = math.tanh %613 : vector<8x128xf32>
    %615 = arith.mulf %610, %614 : vector<8x128xf32>
    %616 = vector.shape_cast %574 : vector<8x1xi1> to vector<8x1xi1>
    %617 = vector.broadcast %616 : vector<8x1xi1> to vector<8x128xi1>
    %618 = arith.select %617, %615, %538 : vector<8x128xi1>, vector<8x128xf32>
    %619 = vector.extract_strided_slice %590 {offsets = [0, 0], sizes = [8, 128], strides = [1, 1]} : vector<8x512xf32> to vector<8x128xf32>
    %620 = arith.negf %619 : vector<8x128xf32>
    %621 = math.exp %620 : vector<8x128xf32>
    %cst_89 = arith.constant 1.000000e+00 : f32
    %622 = vector.broadcast %cst_89 : f32 to vector<8x128xf32>
    %623 = arith.addf %622, %621 : vector<8x128xf32>
    %624 = arith.divf %622, %623 : vector<8x128xf32>
    %625 = vector.extract_strided_slice %590 {offsets = [0, 128], sizes = [8, 128], strides = [1, 1]} : vector<8x512xf32> to vector<8x128xf32>
    %626 = arith.negf %625 : vector<8x128xf32>
    %627 = math.exp %626 : vector<8x128xf32>
    %cst_90 = arith.constant 1.000000e+00 : f32
    %628 = vector.broadcast %cst_90 : f32 to vector<8x128xf32>
    %629 = arith.addf %628, %627 : vector<8x128xf32>
    %630 = arith.divf %628, %629 : vector<8x128xf32>
    %631 = vector.extract_strided_slice %590 {offsets = [0, 256], sizes = [8, 128], strides = [1, 1]} : vector<8x512xf32> to vector<8x128xf32>
    %632 = math.tanh %631 : vector<8x128xf32>
    %633 = vector.extract_strided_slice %590 {offsets = [0, 384], sizes = [8, 128], strides = [1, 1]} : vector<8x512xf32> to vector<8x128xf32>
    %634 = arith.negf %633 : vector<8x128xf32>
    %635 = math.exp %634 : vector<8x128xf32>
    %cst_91 = arith.constant 1.000000e+00 : f32
    %636 = vector.broadcast %cst_91 : f32 to vector<8x128xf32>
    %637 = arith.addf %636, %635 : vector<8x128xf32>
    %638 = arith.divf %636, %637 : vector<8x128xf32>
    %639 = arith.mulf %630, %572 : vector<8x128xf32>
    %640 = arith.mulf %624, %632 : vector<8x128xf32>
    %641 = arith.addf %639, %640 : vector<8x128xf32>
    %642 = math.tanh %641 : vector<8x128xf32>
    %643 = arith.mulf %638, %642 : vector<8x128xf32>
    %644 = vector.shape_cast %576 : vector<8x1xi1> to vector<8x1xi1>
    %645 = vector.broadcast %644 : vector<8x1xi1> to vector<8x128xi1>
    %646 = arith.select %645, %643, %569 : vector<8x128xi1>, vector<8x128xf32>
    %647 = tpu.concatenate %618, %646 in 1 : vector<8x128xf32>, vector<8x128xf32> -> vector<8x256xf32>
    %648 = arith.truncf %647 : vector<8x256xf32> to vector<8x256xbf16>
    %c0_92 = arith.constant 0 : index
    %c0_93 = arith.constant 0 : index
    %649 = vector.load %arg5[%c0_92, %c0_93] : memref<256x128xbf16, #tpu.memory_space<vmem>>, vector<256x128xbf16>
    %cst_94 = arith.constant dense<0.000000e+00> : vector<8x128xf32>
    %650 = tpu.matmul %648, %649, %cst_94 {dimension_numbers = #tpu.dot_dimension_numbers<[1], [0], [0], [1], [0, 0, 1, 1], [], []>} : vector<8x256xbf16>, vector<256x128xbf16>, vector<8x128xf32> -> vector<8x128xf32>
    %c0_95 = arith.constant 0 : index
    %c0_96 = arith.constant 0 : index
    %651 = vector.load %arg6[%c0_95, %c0_96] : memref<1x128xf32, #tpu.memory_space<vmem>>, vector<1x128xf32>
    %652 = vector.broadcast %651 : vector<1x128xf32> to vector<8x128xf32>
    %653 = arith.addf %650, %652 : vector<8x128xf32>
    %654 = tpu.iota {dimensions = array<i32: 1>} : vector<8x128xi32>
    %c4_i32_97 = arith.constant 4 : i32
    %655 = vector.broadcast %c4_i32_97 : i32 to vector<8x128xi32>
    %656 = arith.cmpi slt, %654, %655 : vector<8x128xi32>
    %cst_98 = arith.constant -1.000000e+30 : f32
    %657 = vector.broadcast %cst_98 : f32 to vector<8x128xf32>
    %658 = arith.select %656, %653, %657 : vector<8x128xi1>, vector<8x128xf32>
    %cst_99 = arith.constant dense<0xFF800000> : vector<8xf32>
    %659 = vector.multi_reduction <maximumf>, %658, %cst_99 [1] : vector<8x128xf32> to vector<8xf32>
    %660 = vector.shape_cast %659 : vector<8xf32> to vector<8x1xf32>
    %661 = vector.broadcast %660 : vector<8x1xf32> to vector<8x128xf32>
    %662 = arith.subf %658, %661 : vector<8x128xf32>
    %663 = math.exp %662 : vector<8x128xf32>
    %cst_100 = arith.constant dense<0.000000e+00> : vector<8xf32>
    %664 = vector.multi_reduction <add>, %663, %cst_100 [1] : vector<8x128xf32> to vector<8xf32>
    %665 = vector.shape_cast %664 : vector<8xf32> to vector<8x1xf32>
    %666 = tpu.reciprocal %665 {approx = true} : vector<8x1xf32> -> vector<8x1xf32>
    %667 = vector.broadcast %666 : vector<8x1xf32> to vector<8x128xf32>
    %668 = arith.mulf %663, %667 : vector<8x128xf32>
    %c0_101 = arith.constant 0 : index
    %c0_102 = arith.constant 0 : index
    %669 = vector.load %arg7[%c0_101, %c0_102] : memref<8x128xf32, #tpu.memory_space<vmem>>, vector<8x128xf32>
    tpu.vector_store %arg7[%c0_101, %c0_102], %668 {strides = array<i32>} : memref<8x128xf32, #tpu.memory_space<vmem>>, vector<8x128xf32>,
    return
  }
}

</mosaic_0001>

<bundles_post_ra>
// kernel: tpu_custom_call.1
= control target key start
LH: loop header
LB: loop body
LE: loop exit
PB: predicated region body
PF: predicated region fallthrough
CT: control target
= control target key end

     0   :  { %12 = vsyncpa [#allocation3], 0  ;;  %s6216_s0 = inlined_call_operand.hbm [shape: bf16[8,8,16], index: 0, kind: input, shape index: {}]   ;;  %s6217_s1 = inlined_call_operand.hbm [shape: s32[8,1], index: 1, kind: input, shape index: {}]   ;;  %s6218_s2 = inlined_call_operand.hbm [shape: bf16[16,1024], index: 2, kind: input, shape index: {}]   ;;  %s6219_s3 = inlined_call_operand.hbm [shape: bf16[256,1024], index: 3, kind: input, shape index: {}]   ;;  %s6220_s4 = inlined_call_operand.hbm [shape: f32[1,1024], index: 4, kind: input, shape index: {}]   ;;  %s6221_s5 = inlined_call_operand.hbm [shape: bf16[256,128], index: 5, kind: input, shape index: {}]   ;;  %s6222_s6 = inlined_call_operand.hbm [shape: f32[1,128], index: 6, kind: input, shape index: {}]   ;;  %s6223_s7 = inlined_call_operand.hbm [shape: f32[8,128], index: 7, kind: output, shape index: {}]  }
   0x1   :  { %13 = vsyncpa [#allocation6], 0 }
   0x2   :  { %14 = vsyncpa [#allocation9], 0 }
   0x3   :  { %15 = vsyncpa [#allocation12], 0 }
   0x4   :  { %16 = vsyncpa [#allocation4], 0  ;;  %s4123_s24 = smov [#allocation5]   ;;  %s3937_s28 = scalar_lea.hbm %s6217_s1, 128 }
   0x5   :  { %s35_s25 = sshll.u32 %s4123_s24, 4  ;;  %p3938_p0 = scmp.ne.s32.totalorder %s6217_s1, %s3937_s28  ;;  %s36_s25 = int_to_ptr.vmem [resolvable:$true] %s35_s25 }
   0x6   :  { %p3941_p1 = scmp.lt.u32.totalorder %s3937_s28, %s6217_s1 }
   0x8   :  { %p3943_p2 = pnand %p3941_p1, %p3938_p0 }
   0xa   :  { %3946 = shalt.err (!%p3943_p2)
}
   0xb   :  { %s3947_s10 = scalar_lea.vmem %s36_s25, 128  ;;  %p3952_p4 = scmp.lt.s32.totalorder %s36_s25, %s36_s25 }
   0xc   :  { %p3948_p3 = scmp.ne.s32.totalorder %s36_s25, %s3947_s10  ;;  %p3953_p5 = scmp.lt.s32.totalorder %s3947_s10, %s3947_s10 }
   0xe   :  { %p3954_p6 = por %p3953_p5, %p3952_p4 }
  0x10   :  { %p3955_p7 = pnand %p3954_p6, %p3948_p3 }
  0x12   :  { %3958 = shalt.err (!%p3955_p7)
}
  0x13   :  { %38 = dma.hbm_to_vmem [thread:$0]  %s6217_s1, 128, %s36_s25, [#allocation6]  }
  0x14   :  { %s4124_s13 = smov [#allocation8]   ;;  %s3959_s17 = scalar_lea.hbm %s6219_s3, 16384 }
  0x15   :  { %s56_s14 = sshll.u32 %s4124_s13, 4  ;;  %p3960_p8 = scmp.ne.s32.totalorder %s6219_s3, %s3959_s17  ;;  %s57_s14 = int_to_ptr.vmem [resolvable:$true] %s56_s14 }
  0x16   :  { %p3963_p9 = scmp.lt.u32.totalorder %s3959_s17, %s6219_s3 }
  0x18   :  { %p3965_p10 = pnand %p3963_p9, %p3960_p8 }
  0x1a   :  { %3968 = shalt.err (!%p3965_p10)
}
  0x1b   :  { %s3969_s22 = scalar_lea.vmem %s57_s14, 16384  ;;  %p3974_p12 = scmp.lt.s32.totalorder %s57_s14, %s57_s14 }
  0x1c   :  { %p3970_p11 = scmp.ne.s32.totalorder %s57_s14, %s3969_s22  ;;  %p3975_p13 = scmp.lt.s32.totalorder %s3969_s22, %s3969_s22 }
  0x1e   :  { %p3976_p0 = por %p3975_p13, %p3974_p12 }
  0x20   :  { %p3977_p1 = pnand %p3976_p0, %p3970_p11 }
  0x22   :  { %3980 = shalt.err (!%p3977_p1)
}
  0x23   :  { %s4125_s1 = smov 512   ;;  %s4126_s23 = smov 32  }
  0x24   :  { %62 = dma.hbm_to_vmem [thread:$0]  %s6219_s3, 16384, %s57_s14, [#allocation9], %s4125_s1, %s4125_s1, %s4126_s23  }
  0x25   :  { %s4127_s26 = smov [#allocation11]   ;;  %s4128_s28 = smov [#allocation2]  }
  0x26   :  { %s78_s27 = sshll.u32 %s4127_s26, 4  ;;  %s22_s29 = sshll.u32 %s4128_s28, 4  ;;  %s79_s27 = int_to_ptr.vmem [resolvable:$true] %s78_s27  ;;  %s4204_s29 = int_to_ptr.vmem [resolvable:$true] %s22_s29 }
  0x27   :  { %s3981_s9 = scalar_lea.hbm %s6221_s5, 2048 }
  0x28   :  { %p3982_p2 = scmp.ne.s32.totalorder %s6221_s5, %s3981_s9  ;;  %p3985_p3 = scmp.lt.u32.totalorder %s3981_s9, %s6221_s5 }
  0x2a   :  { %p3987_p4 = pnand %p3985_p3, %p3982_p2 }
  0x2c   :  { %3990 = shalt.err (!%p3987_p4)
}
  0x2d   :  { %s3991_s3 = scalar_lea.vmem %s79_s27, 2048  ;;  %p3996_p6 = scmp.lt.s32.totalorder %s79_s27, %s79_s27 }
  0x2e   :  { %p3992_p5 = scmp.ne.s32.totalorder %s79_s27, %s3991_s3  ;;  %p3997_p7 = scmp.lt.s32.totalorder %s3991_s3, %s3991_s3 }
  0x30   :  { %p3998_p8 = por %p3997_p7, %p3996_p6 }
  0x32   :  { %p3999_p9 = pnand %p3998_p8, %p3992_p5 }
  0x34   :  { %4002 = shalt.err (!%p3999_p9)
}
  0x35   :  { %s4129_s14 = smov 64   ;;  %s4130_s15 = smov 4  }
  0x36   :  { %84 = dma.hbm_to_vmem [thread:$0]  %s6221_s5, 2048, %s79_s27, [#allocation12], %s4129_s14, %s4129_s14, %s4130_s15  }
  0x37   :  { %s4003_s20 = scalar_lea.hbm %s6216_s0, 512 }
  0x38   :  { %p4004_p10 = scmp.ne.s32.totalorder %s6216_s0, %s4003_s20  ;;  %p4007_p11 = scmp.lt.u32.totalorder %s4003_s20, %s6216_s0 }
  0x3a   :  { %p4009_p12 = pnand %p4007_p11, %p4004_p10 }
  0x3c   :  { %4012 = shalt.err (!%p4009_p12)
}
  0x3d   :  { %s4013_s26 = scalar_lea.vmem %s4204_s29, 512  ;;  %p4018_p0 = scmp.lt.s32.totalorder %s4204_s29, %s4204_s29 }
  0x3e   :  { %p4014_p13 = scmp.ne.s32.totalorder %s4204_s29, %s4013_s26  ;;  %p4019_p1 = scmp.lt.s32.totalorder %s4013_s26, %s4013_s26 }
  0x40   :  { %p4020_p2 = por %p4019_p1, %p4018_p0 }
  0x42   :  { %p4021_p3 = pnand %p4020_p2, %p4014_p13 }
  0x44   :  { %4024 = shalt.err (!%p4021_p3)
}
  0x45   :  { %28 = dma.hbm_to_vmem [thread:$0]  %s6216_s0, 512, %s4204_s29, [#allocation3], %s4129_s14, %s4129_s14, %s4130_s15  }
  0x46   :  { %s4131_s28 = smov [#allocation7]   ;;  %s4132_s8 = smov [#allocation10]  }
  0x47   :  { %s44_s30 = sshll.u32 %s4131_s28, 4  ;;  %s69_s9 = sshll.u32 %s4132_s8, 4  ;;  %s45_s30 = int_to_ptr.vmem [resolvable:$true] %s44_s30  ;;  %s70_s9 = int_to_ptr.vmem [resolvable:$true] %s69_s9 }
  0x48   :  { %s4025_s12 = scalar_lea.hbm %s6218_s2, 1024 }
  0x49   :  { %p4026_p4 = scmp.ne.s32.totalorder %s6218_s2, %s4025_s12  ;;  %p4029_p5 = scmp.lt.u32.totalorder %s4025_s12, %s6218_s2 }
  0x4b   :  { %p4031_p6 = pnand %p4029_p5, %p4026_p4 }
  0x4d   :  { %4034 = shalt.err (!%p4031_p6)
}
  0x4e   :  { %s4035_s0 = scalar_lea.vmem %s45_s30, 1024  ;;  %p4040_p8 = scmp.lt.s32.totalorder %s45_s30, %s45_s30 }
  0x4f   :  { %p4036_p7 = scmp.ne.s32.totalorder %s45_s30, %s4035_s0  ;;  %p4041_p9 = scmp.lt.s32.totalorder %s4035_s0, %s4035_s0 }
  0x51   :  { %p4042_p10 = por %p4041_p9, %p4040_p8 }
  0x53   :  { %p4043_p11 = pnand %p4042_p10, %p4036_p7 }
  0x55   :  { %4046 = shalt.err (!%p4043_p11)
}
  0x56   :  { %50 = dma.hbm_to_vmem [thread:$0]  %s6218_s2, 1024, %s45_s30, [#allocation6], %s4125_s1, %s4125_s1, %s4126_s23  }
  0x57   :  { %s4047_s19 = scalar_lea.hbm %s6220_s4, 128 }
  0x58   :  { %p4048_p12 = scmp.ne.s32.totalorder %s6220_s4, %s4047_s19  ;;  %p4051_p13 = scmp.lt.u32.totalorder %s4047_s19, %s6220_s4 }
  0x5a   :  { %p4053_p0 = pnand %p4051_p13, %p4048_p12 }
  0x5c   :  { %4056 = shalt.err (!%p4053_p0)
}
  0x5d   :  { %s4057_s25 = scalar_lea.vmem %s70_s9, 128  ;;  %p4062_p2 = scmp.lt.s32.totalorder %s70_s9, %s70_s9 }
  0x5e   :  { %p4058_p1 = scmp.ne.s32.totalorder %s70_s9, %s4057_s25  ;;  %p4063_p3 = scmp.lt.s32.totalorder %s4057_s25, %s4057_s25 }
  0x60   :  { %p4064_p4 = por %p4063_p3, %p4062_p2 }
  0x62   :  { %p4065_p5 = pnand %p4064_p4, %p4058_p1 }
  0x64   :  { %4068 = shalt.err (!%p4065_p5)
}
  0x65   :  { %72 = dma.hbm_to_vmem [thread:$0]  %s6220_s4, 128, %s70_s9, [#allocation9]  }
  0x66   :  { %s4133_s23 = smov [#allocation13]   ;;  %s4069_s28 = scalar_lea.hbm %s6222_s6, 16 }
  0x67   :  { %s91_s26 = sshll.u32 %s4133_s23, 4  ;;  %p4070_p6 = scmp.ne.s32.totalorder %s6222_s6, %s4069_s28  ;;  %s92_s26 = int_to_ptr.vmem [resolvable:$true] %s91_s26 }
  0x68   :  { %p4073_p7 = scmp.lt.u32.totalorder %s4069_s28, %s6222_s6 }
  0x6a   :  { %p4075_p8 = pnand %p4073_p7, %p4070_p6 }
  0x6c   :  { %4078 = shalt.err (!%p4075_p8)
}
  0x6d   :  { %s4079_s12 = scalar_lea.vmem %s92_s26, 16  ;;  %s4083_s4 = scalar_lea.vmem %s92_s26, 32 }
  0x6e   :  { %p4080_p9 = scmp.ne.s32.totalorder %s92_s26, %s4079_s12  ;;  %p4084_p10 = scmp.lt.s32.totalorder %s92_s26, %s92_s26 }
  0x6f   :  { %p4085_p11 = scmp.lt.s32.totalorder %s4083_s4, %s4079_s12 }
  0x71   :  { %p4086_p12 = por %p4085_p11, %p4084_p10 }
  0x73   :  { %p4087_p13 = pnand %p4086_p12, %p4080_p9 }
  0x75   :  { %4090 = shalt.err (!%p4087_p13)
}
  0x76   :  { %94 = dma.hbm_to_vmem [thread:$0]  %s6222_s6, 16, %s92_s26, [#allocation12]  }
  0x77   :  { %4113 = dma.done.wait [#allocation3], 512  }
  0x78   :  { %4114 = vsyncadd [#allocation3], 4294966784 }
  0x79   :  { %4115 = dma.done.wait [#allocation6], 1152  }
  0x7a   :  { %4116 = vsyncadd [#allocation6], 4294966144 }
  0x7b   :  { %4117 = dma.done.wait [#allocation9], 16512  }
  0x7c   :  { %4118 = vsyncadd [#allocation9], 4294950784 }
  0x7d   :  { %4119 = dma.done.wait [#allocation12], 2064  }
  0x7e   :  { %4120 = vsyncadd [#allocation12], 4294965232  ;;  %v6224_v0 = vmov 0   ;;  %v125_v1 = vld [vmem:[#allocation7] sm:$0xff]  ;;  %v4278_v5 = vld [vmem:[#allocation2] sm:$0xff]   ;;  %vm235_vm0 = vcmask 130048  }
  0x7f   :  { %280 = vmatprep.mubr.bf16.mxu0 %v6224_v0  ;;  %300 = vmatprep.mubr.bf16.mxu1 %v6224_v0  ;;  %v129_v2 = vld [vmem:[#allocation7 + $0x20] sm:$0xff]  ;;  %v4280_v6 = vld [vmem:[#allocation2 + $0x10] sm:$0xff]   ;;  %v127_v11 = vld [vmem:[#allocation7 + $0x10] sm:$0xff]  ;;  %v6232_v63 = vmov 0.0|0.0   ;;  %s4136_s6 = smov [#allocation14]  }
  0x80   :  { %3654 = vset.pattern.permute.xlu0 %v6224_v0  ;;  %3655 = vset.pattern.permute.xlu1 %v6224_v0  ;;  %v3376_v3 = vcombine.high %v125_v1, %v129_v2  ;;  %v3375_v4 = vcombine.low %v125_v1, %v129_v2  ;;  %v126_v7 = vld [vmem:[#allocation7 + $0x8] sm:$0xff]  ;;  %v131_v12 = vld [vmem:[#allocation7 + $0x30] sm:$0xff]  ;;  %v544_v15 = vld [vmem:[#allocation8] sm:$0xff]  ;;  %s3359_s3 = sshll.u32 %s4136_s6, 4  ;;  %s3360_s3 = int_to_ptr.vmem [resolvable:$true] %s3359_s3 }
  0x81   :  { %v130_v8 = vld [vmem:[#allocation7 + $0x28] sm:$0xff]  ;;  %v3379_v13 = vcombine.low %v127_v11, %v131_v12  ;;  %v3380_v14 = vcombine.high %v127_v11, %v131_v12  ;;  %v548_v16 = vld [vmem:[#allocation8 + $0x20] sm:$0xff]  ;;  %v128_v17 = vld [vmem:[#allocation7 + $0x18] sm:$0xff]  ;;  %s4091_s16 = scalar_lea.vmem %s3360_s3, 128  ;;  %p4096_p1 = scmp.lt.s32.totalorder %s3360_s3, %s3360_s3 }
  0x82   :  { %248 = vmatprep.subr.bf16.mxu0 %v3376_v3  ;;  %3638 = vmatprep.subr.bf16.mxu1 %v3376_v3  ;;  %v3377_v9 = vcombine.low %v126_v7, %v130_v8  ;;  %v3378_v10 = vcombine.high %v126_v7, %v130_v8  ;;  %v4286_v18 = vcombine.high %v544_v15, %v548_v16  ;;  %v132_v19 = vld [vmem:[#allocation7 + $0x38] sm:$0xff]  ;;  %v4290_v21 = vld [vmem:[#allocation2 + $0x8] sm:$0xff]   ;;  %v4292_v22 = vld [vmem:[#allocation2 + $0x18] sm:$0xff]   ;;  %p4092_p0 = scmp.ne.s32.totalorder %s3360_s3, %s4091_s16  ;;  %p4097_p2 = scmp.lt.s32.totalorder %s4091_s16, %s4091_s16 }
  0x83   :  { %249 = vmatpush1.bf16.msra.mxu0 %v3375_v4  ;;  %3639 = vmatpush1.bf16.msra.mxu1 %v3375_v4  ;;  %v3382_v20 = vcombine.high %v128_v17, %v132_v19  ;;  %v552_v23 = vld [vmem:[#allocation8 + $0x40] sm:$0xff]  ;;  %v4301_v25 = vld [vmem:[#allocation8 + $0x8] sm:$0xff]  ;;  %v3381_v27 = vcombine.low %v128_v17, %v132_v19  ;;  %v4305_v28 = vcombine.low %v544_v15, %v548_v16  ;;  %v4394_v11 = vld [vmem:[#allocation5] sm:$0xff] }
  0x84   :  { %321 = vmatprep.subr.bf16.mxu1 %v3378_v10  ;;  %6508 = vst [vmem:[#allocation20_spill] sm:$0xff] %v4286_v18  ;;  %394 = vmatprep.subr.bf16.mxu0 %v3380_v14  ;;  %v556_v24 = vld [vmem:[#allocation8 + $0x60] sm:$0xff]  ;;  %v4303_v26 = vld [vmem:[#allocation8 + $0x28] sm:$0xff]  ;;  %vm542_vm1 = vcmp.gt.s32.totalorder %v4394_v11, 7  ;;  %vm541_vm2 = vcmp.gt.s32.totalorder %v4394_v11, 0  ;;  %vm1785_vm3 = vcmp.gt.s32.totalorder %v4394_v11, 5  ;;  %p4098_p3 = por %p4097_p2, %p4096_p1 }
  0x85   :  { %6509 = vst [vmem:[#allocation21_spill] sm:$0xff] %v4305_v28  ;;  %v4307_v29 = vcombine.high %v552_v23, %v556_v24  ;;  %v560_v30 = vld [vmem:[#allocation8 + $0x80] sm:$0xff]  ;;  %v4311_v32 = vcombine.high %v4301_v25, %v4303_v26  ;;  %v4318_v33 = vcombine.low %v552_v23, %v556_v24  ;;  %v553_v60 = vld [vmem:[#allocation8 + $0x48] sm:$0xff]  ;;  %v4385_v2 = vcombine.low %v4301_v25, %v4303_v26 }
  0x86   :  { %3383 = vmatmul.mubr.msk.bf16.vlgmr.msra.gmra.mrb[0].mxu0 %vm235_vm0, %v4278_v5  ;;  %3385 = vmatmul.mubr.msk.bf16.vlgmr.msra.gmra.mrb[0].mxu1 %vm235_vm0, %v4280_v6  ;;  %v564_v31 = vld [vmem:[#allocation8 + $0xa0] sm:$0xff]  ;;  %v557_v62 = vld [vmem:[#allocation8 + $0x68] sm:$0xff]  ;;  %v1508_v23 = vsel %vm541_vm2, 1, %v6224_v0  ;;  %vm2023_vm4 = vcmp.gt.s32.totalorder %v4394_v11, 4  ;;  %p4099_p4 = pnand %p4098_p3, %p4092_p0 }
  0x87   :  { %322 = vmatpush1.bf16.msra.mxu1 %v3377_v9  ;;  %290 = vmatprep.mubr.bf16.mxu0 %v6224_v0  ;;  %6510 = vst [vmem:[#allocation22_spill] sm:$0xff] %v4307_v29  ;;  %6511 = vst [vmem:[#allocation23_spill] sm:$0xff] %v4311_v32  ;;  %v4322_v34 = vcombine.high %v560_v30, %v564_v31  ;;  %v568_v35 = vld [vmem:[#allocation8 + $0xc0] sm:$0xff]  ;;  %v4327_v37 = vcombine.low %v560_v30, %v564_v31  ;;  %v561_v7 = vld [vmem:[#allocation8 + $0x88] sm:$0xff] }
  0x88   :  { %310 = vmatprep.mubr.bf16.mxu1 %v6224_v0  ;;  %395 = vmatpush1.bf16.msra.mxu0 %v3379_v13  ;;  %6512 = vst [vmem:[#allocation24_spill] sm:$0xff] %v4318_v33  ;;  %v572_v36 = vld [vmem:[#allocation8 + $0xe0] sm:$0xff]  ;;  %6527 = vst [vmem:[#allocation39_spill] sm:$0xff] %v4385_v2  ;;  %v565_v8 = vld [vmem:[#allocation8 + $0xa8] sm:$0xff]  ;;  %v4390_v10 = vcombine.high %v553_v60, %v557_v62  ;;  %v4400_v13 = vcombine.low %v553_v60, %v557_v62 }
  0x89   :  { %467 = vmatprep.subr.bf16.mxu1 %v3382_v20  ;;  %1312 = vmatprep.subr.bf16.mxu0 %v4286_v18  ;;  %6513 = vst [vmem:[#allocation25_spill] sm:$0xff] %v4322_v34  ;;  %6514 = vst [vmem:[#allocation26_spill] sm:$0xff] %v4327_v37  ;;  %v4330_v38 = vcombine.high %v568_v35, %v572_v36  ;;  %v576_v39 = vld [vmem:[#allocation8 + $0x100] sm:$0xff]  ;;  %v4337_v41 = vcombine.low %v568_v35, %v572_v36  ;;  %v569_v17 = vld [vmem:[#allocation8 + $0xc8] sm:$0xff]  ;;  %v1539_v20 = vsel %vm542_vm1, 1, %v6224_v0 }
  0x8a   :  { %v580_v40 = vld [vmem:[#allocation8 + $0x120] sm:$0xff]  ;;  %6529 = vst [vmem:[#allocation41_spill] sm:$0xff] %v4390_v10  ;;  %6531 = vst [vmem:[#allocation43_spill] sm:$0xff] %v4400_v13  ;;  %v4408_v16 = vcombine.high %v561_v7, %v565_v8  ;;  %v573_v19 = vld [vmem:[#allocation8 + $0xe8] sm:$0xff]  ;;  %1541 = vperm.xlu0 %3654, %v1539_v20   ;;  %v4417_v25 = vcombine.low %v561_v7, %v565_v8 }
  0x8b   :  { %6515 = vst [vmem:[#allocation27_spill] sm:$0xff] %v4330_v38  ;;  %6516 = vst [vmem:[#allocation28_spill] sm:$0xff] %v4337_v41  ;;  %v4341_v42 = vcombine.high %v576_v39, %v580_v40  ;;  %v584_v43 = vld [vmem:[#allocation8 + $0x140] sm:$0xff]  ;;  %v4345_v45 = vcombine.low %v576_v39, %v580_v40  ;;  %v4423_v30 = vcombine.high %v569_v17, %v573_v19  ;;  %v577_v35 = vld [vmem:[#allocation8 + $0x108] sm:$0xff] }
  0x8c   :  { %v588_v44 = vld [vmem:[#allocation8 + $0x160] sm:$0xff]  ;;  %6533 = vst [vmem:[#allocation45_spill] sm:$0xff] %v4408_v16  ;;  %6535 = vst [vmem:[#allocation47_spill] sm:$0xff] %v4417_v25  ;;  %v581_v36 = vld [vmem:[#allocation8 + $0x128] sm:$0xff]  ;;  %v4431_v40 = vcombine.low %v569_v17, %v573_v19 }
  0x8d   :  { %6517 = vst [vmem:[#allocation29_spill] sm:$0xff] %v4341_v42  ;;  %6518 = vst [vmem:[#allocation30_spill] sm:$0xff] %v4345_v45  ;;  %v4348_v46 = vcombine.high %v584_v43, %v588_v44  ;;  %v592_v47 = vld [vmem:[#allocation8 + $0x180] sm:$0xff]  ;;  %v4355_v49 = vcombine.low %v584_v43, %v588_v44  ;;  %v4437_v44 = vcombine.high %v577_v35, %v581_v36  ;;  %v593_v62 = vld [vmem:[#allocation8 + $0x188] sm:$0xff] }
  0x8e   :  { %3384 = vmatmul.mubr.msk.bf16.gmra.mrb[4].mxu0 %vm235_vm0, %v4290_v21  ;;  %3386 = vmatmul.mubr.msk.bf16.gmra.mrb[4].mxu1 %vm235_vm0, %v4292_v22  ;;  %v596_v48 = vld [vmem:[#allocation8 + $0x1a0] sm:$0xff]  ;;  %6537 = vst [vmem:[#allocation49_spill] sm:$0xff] %v4423_v30  ;;  %6539 = vst [vmem:[#allocation51_spill] sm:$0xff] %v4431_v40  ;;  %v601_v19 = vld [vmem:[#allocation8 + $0x1c8] sm:$0xff] }
  0x8f   :  { %353 = vmatprep.mubr.bf16.mxu1 %v6224_v0  ;;  %426 = vmatprep.mubr.bf16.mxu0 %v6224_v0  ;;  %6519 = vst [vmem:[#allocation31_spill] sm:$0xff] %v4348_v46  ;;  %6520 = vst [vmem:[#allocation32_spill] sm:$0xff] %v4355_v49  ;;  %v4359_v50 = vcombine.high %v592_v47, %v596_v48  ;;  %v600_v51 = vld [vmem:[#allocation8 + $0x1c0] sm:$0xff]  ;;  %v4363_v53 = vcombine.low %v592_v47, %v596_v48 }
  0x90   :  { %v604_v52 = vld [vmem:[#allocation8 + $0x1e0] sm:$0xff]  ;;  %1510 = vperm.xlu0 %3654, %v1508_v23   ;;  %6541 = vst [vmem:[#allocation53_spill] sm:$0xff] %v4437_v44 }
  0x91   :  { %6521 = vst [vmem:[#allocation33_spill] sm:$0xff] %v4359_v50  ;;  %6522 = vst [vmem:[#allocation34_spill] sm:$0xff] %v4363_v53  ;;  %v4366_v54 = vcombine.high %v600_v51, %v604_v52  ;;  %v608_v55 = vld [vmem:[#allocation8 + $0x200] sm:$0xff]  ;;  %v4373_v57 = vcombine.low %v600_v51, %v604_v52  ;;  %v585_v51 = vld [vmem:[#allocation8 + $0x148] sm:$0xff] }
  0x92   :  { %v612_v56 = vld [vmem:[#allocation8 + $0x220] sm:$0xff] }
  0x93   :  { %6523 = vst [vmem:[#allocation35_spill] sm:$0xff] %v4366_v54  ;;  %6524 = vst [vmem:[#allocation36_spill] sm:$0xff] %v4373_v57  ;;  %v616_v58 = vld [vmem:[#allocation8 + $0x240] sm:$0xff]  ;;  %v4377_v61 = vcombine.high %v608_v55, %v612_v56  ;;  %v4381_v1 = vcombine.low %v608_v55, %v612_v56  ;;  %v4444_v55 = vcombine.low %v577_v35, %v581_v36  ;;  %v609_v35 = vld [vmem:[#allocation8 + $0x208] sm:$0xff] }
  0x94   :  { %v620_v59 = vld [vmem:[#allocation8 + $0x260] sm:$0xff]  ;;  %v613_v36 = vld [vmem:[#allocation8 + $0x228] sm:$0xff] }
  0x95   :  { %6525 = vst [vmem:[#allocation37_spill] sm:$0xff] %v4377_v61  ;;  %6526 = vst [vmem:[#allocation38_spill] sm:$0xff] %v4381_v1  ;;  %v624_v3 = vld [vmem:[#allocation8 + $0x280] sm:$0xff]  ;;  %v4388_v9 = vcombine.high %v616_v58, %v620_v59  ;;  %v4398_v12 = vcombine.low %v616_v58, %v620_v59 }
  0x96   :  { %3387 = vmatmul.mubr.msk.bf16.vlgmr.msra.gmra.mrb[8].mxu1 %vm235_vm0, %v4278_v5  ;;  %3391 = vmatmul.mubr.msk.bf16.vlgmr.msra.gmra.mrb[8].mxu0 %vm235_vm0, %v4278_v5  ;;  %v628_v4 = vld [vmem:[#allocation8 + $0x2a0] sm:$0xff]  ;;  %6543 = vst [vmem:[#allocation55_spill] sm:$0xff] %v4444_v55 }
  0x97   :  { %1313 = vmatpush1.bf16.msra.mxu0 %v4305_v28  ;;  %468 = vmatpush1.bf16.msra.mxu1 %v3381_v27  ;;  %6528 = vst [vmem:[#allocation40_spill] sm:$0xff] %v4388_v9  ;;  %6530 = vst [vmem:[#allocation42_spill] sm:$0xff] %v4398_v12  ;;  %v632_v14 = vld [vmem:[#allocation8 + $0x2c0] sm:$0xff]  ;;  %v4415_v24 = vcombine.low %v624_v3, %v628_v4 }
  0x98   :  { %1314 = vmatprep.subr.bf16.mxu0 %v4307_v29  ;;  %363 = vmatprep.mubr.bf16.mxu1 %v6224_v0  ;;  %v636_v15 = vld [vmem:[#allocation8 + $0x2e0] sm:$0xff] }
  0x99   :  { %1353 = vmatprep.subr.bf16.mxu1 %v4311_v32  ;;  %436 = vmatprep.mubr.bf16.mxu0 %v6224_v0  ;;  %6534 = vst [vmem:[#allocation46_spill] sm:$0xff] %v4415_v24  ;;  %v640_v26 = vld [vmem:[#allocation8 + $0x300] sm:$0xff]  ;;  %v4421_v27 = vcombine.high %v632_v14, %v636_v15  ;;  %v4429_v39 = vcombine.low %v632_v14, %v636_v15 }
  0x9a   :  { %v644_v31 = vld [vmem:[#allocation8 + $0x320] sm:$0xff] }
  0x9b   :  { %1315 = vmatpush1.bf16.msra.mxu0 %v4318_v33  ;;  %6536 = vst [vmem:[#allocation48_spill] sm:$0xff] %v4421_v27  ;;  %6538 = vst [vmem:[#allocation50_spill] sm:$0xff] %v4429_v39  ;;  %v4435_v43 = vcombine.high %v640_v26, %v644_v31  ;;  %v648_v47 = vld [vmem:[#allocation8 + $0x340] sm:$0xff]  ;;  %v4442_v52 = vcombine.low %v640_v26, %v644_v31 }
  0x9c   :  { %1316 = vmatprep.subr.bf16.mxu0 %v4322_v34  ;;  %v652_v48 = vld [vmem:[#allocation8 + $0x360] sm:$0xff] }
  0x9d   :  { %6540 = vst [vmem:[#allocation52_spill] sm:$0xff] %v4435_v43  ;;  %6542 = vst [vmem:[#allocation54_spill] sm:$0xff] %v4442_v52  ;;  %v4448_v56 = vcombine.high %v648_v47, %v652_v48  ;;  %v656_v59 = vld [vmem:[#allocation8 + $0x380] sm:$0xff] }
  0x9e   :  { %3388 = vmatmul.mubr.msk.bf16.gmra.mrb[12].mxu1 %vm235_vm0, %v4290_v21  ;;  %3392 = vmatmul.mubr.msk.bf16.gmra.mrb[12].mxu0 %vm235_vm0, %v4290_v21  ;;  %v660_v60 = vld [vmem:[#allocation8 + $0x3a0] sm:$0xff] }
  0x9f   :  { %1317 = vmatpush1.bf16.msra.mxu0 %v4327_v37  ;;  %373 = vmatprep.mubr.bf16.mxu1 %v6224_v0  ;;  %6544 = vst [vmem:[#allocation56_spill] sm:$0xff] %v4448_v56  ;;  %v4462_v8 = vcombine.high %v656_v59, %v660_v60  ;;  %v664_v15 = vld [vmem:[#allocation8 + $0x3c0] sm:$0xff]  ;;  %v4469_v20 = vcombine.low %v656_v59, %v660_v60 }
  0xa0   :  { %1318 = vmatprep.subr.bf16.mxu0 %v4330_v38  ;;  %446 = vmatprep.mubr.bf16.mxu0 %v6224_v0  ;;  %v668_v17 = vld [vmem:[#allocation8 + $0x3e0] sm:$0xff]  ;;  %v4489_v59 = vcombine.high %v609_v35, %v613_v36 }
  0xa1   :  { %6548 = vst [vmem:[#allocation60_spill] sm:$0xff] %v4462_v8  ;;  %6550 = vst [vmem:[#allocation62_spill] sm:$0xff] %v4469_v20  ;;  %v4475_v26 = vcombine.high %v664_v15, %v668_v17 }
  0xa2   :  { %6556 = vst [vmem:[#allocation68_spill] sm:$0xff] %v4489_v59 }
  0xa3   :  { %1319 = vmatpush1.bf16.msra.mxu0 %v4337_v41  ;;  %6552 = vst [vmem:[#allocation64_spill] sm:$0xff] %v4475_v26 }
  0xa4   :  { %1320 = vmatprep.subr.bf16.mxu0 %v4341_v42 }
  0xa6   :  { %3389 = vmatmul.mubr.msk.bf16.gmra.mrb[16].mxu1 %vm235_vm0, %v4280_v6  ;;  %3393 = vmatmul.mubr.msk.bf16.gmra.mrb[16].mxu0 %vm235_vm0, %v4280_v6 }
  0xa7   :  { %1321 = vmatpush1.bf16.msra.mxu0 %v4345_v45  ;;  %383 = vmatprep.mubr.bf16.mxu1 %v6224_v0 }
  0xa8   :  { %1322 = vmatprep.subr.bf16.mxu0 %v4348_v46  ;;  %456 = vmatprep.mubr.bf16.mxu0 %v6224_v0 }
  0xab   :  { %1323 = vmatpush1.bf16.msra.mxu0 %v4355_v49 }
  0xac   :  { %1324 = vmatprep.subr.bf16.mxu0 %v4359_v50 }
  0xae   :  { %3390 = vmatmul.mubr.msk.bf16.gmra.mrb[20].mxu1 %vm235_vm0, %v4292_v22  ;;  %3394 = vmatmul.mubr.msk.bf16.gmra.mrb[20].mxu0 %vm235_vm0, %v4292_v22 }
  0xaf   :  { %1325 = vmatpush1.bf16.msra.mxu0 %v4363_v53  ;;  %499 = vmatprep.mubr.bf16.mxu1 %v6224_v0 }
  0xb0   :  { %1326 = vmatprep.subr.bf16.mxu0 %v4366_v54  ;;  %1344 = vmatprep.mubr.bf16.mxu0 %v6232_v63 }
  0xb3   :  { %1327 = vmatpush1.bf16.msra.mxu0 %v4373_v57 }
  0xb4   :  { %1328 = vmatprep.subr.bf16.mxu0 %v4377_v61 }
  0xb6   :  { %3395 = vmatmul.mubr.msk.bf16.vlgmr.msra.gmra.mrb[24].mxu1 %vm235_vm0, %v4278_v5  ;;  %v4406_v5 = vcombine.high %v624_v3, %v628_v4  ;;  %v597_v3 = vld [vmem:[#allocation8 + $0x1a8] sm:$0xff]  ;;  %v4456_v4 = vcombine.low %v648_v47, %v652_v48  ;;  %v546_v47 = vld [vmem:[#allocation8 + $0x10] sm:$0xff] }
  0xb7   :  { %1329 = vmatpush1.bf16.msra.mxu0 %v4381_v1  ;;  %1354 = vmatpush1.bf16.msra.mxu1 %v4385_v2  ;;  %v4464_v14 = vcombine.high %v593_v62, %v597_v3  ;;  %v4471_v23 = vcombine.low %v593_v62, %v597_v3  ;;  %v550_v48 = vld [vmem:[#allocation8 + $0x30] sm:$0xff]  ;;  %v617_v62 = vld [vmem:[#allocation8 + $0x248] sm:$0xff] }
  0xb8   :  { %1330 = vmatprep.subr.bf16.mxu0 %v4388_v9  ;;  %1355 = vmatprep.subr.bf16.mxu1 %v4390_v10  ;;  %6532 = vst [vmem:[#allocation44_spill] sm:$0xff] %v4406_v5  ;;  %6546 = vst [vmem:[#allocation58_spill] sm:$0xff] %v4456_v4  ;;  %v4491_v60 = vcombine.high %v546_v47, %v550_v48  ;;  %v621_v3 = vld [vmem:[#allocation8 + $0x268] sm:$0xff] }
  0xb9   :  { %509 = vmatprep.mubr.bf16.mxu1 %v6224_v0  ;;  %6549 = vst [vmem:[#allocation61_spill] sm:$0xff] %v4464_v14  ;;  %6551 = vst [vmem:[#allocation63_spill] sm:$0xff] %v4471_v23 }
  0xba   :  { %6557 = vst [vmem:[#allocation69_spill] sm:$0xff] %v4491_v60 }
  0xbb   :  { %1331 = vmatpush1.bf16.msra.mxu0 %v4398_v12  ;;  %1356 = vmatpush1.bf16.msra.mxu1 %v4400_v13 }
  0xbc   :  { %1332 = vmatprep.subr.bf16.mxu0 %v4406_v5  ;;  %1357 = vmatprep.subr.bf16.mxu1 %v4408_v16 }
  0xbe   :  { %3396 = vmatmul.mubr.msk.bf16.gmra.mrb[28].mxu1 %vm235_vm0, %v4290_v21  ;;  %v589_v21 = vld [vmem:[#allocation8 + $0x168] sm:$0xff] }
  0xbf   :  { %1333 = vmatpush1.bf16.msra.mxu0 %v4415_v24  ;;  %1358 = vmatpush1.bf16.msra.mxu1 %v4417_v25  ;;  %v4450_v58 = vcombine.high %v585_v51, %v589_v21  ;;  %v4458_v7 = vcombine.low %v585_v51, %v589_v21  ;;  %v4483_v51 = vcombine.low %v664_v15, %v668_v17 }
  0xc0   :  { %1334 = vmatprep.subr.bf16.mxu0 %v4421_v27  ;;  %1359 = vmatprep.subr.bf16.mxu1 %v4423_v30  ;;  %v4496_v15 = vcombine.low %v609_v35, %v613_v36  ;;  %v4498_v17 = vcombine.low %v546_v47, %v550_v48  ;;  %v4509_v35 = vcombine.low %v617_v62, %v621_v3 }
  0xc1   :  { %519 = vmatprep.mubr.bf16.mxu1 %v6224_v0  ;;  %6545 = vst [vmem:[#allocation57_spill] sm:$0xff] %v4450_v58  ;;  %6547 = vst [vmem:[#allocation59_spill] sm:$0xff] %v4458_v7 }
  0xc2   :  { %6554 = vst [vmem:[#allocation66_spill] sm:$0xff] %v4483_v51  ;;  %6558 = vst [vmem:[#allocation70_spill] sm:$0xff] %v4496_v15 }
  0xc3   :  { %1335 = vmatpush1.bf16.msra.mxu0 %v4429_v39  ;;  %1360 = vmatpush1.bf16.msra.mxu1 %v4431_v40  ;;  %6559 = vst [vmem:[#allocation71_spill] sm:$0xff] %v4498_v17  ;;  %6563 = vst [vmem:[#allocation74_spill] sm:$0xff] %v4509_v35 }
  0xc4   :  { %1336 = vmatprep.subr.bf16.mxu0 %v4435_v43  ;;  %1361 = vmatprep.subr.bf16.mxu1 %v4437_v44 }
  0xc6   :  { %3397 = vmatmul.mubr.msk.bf16.gmra.mrb[32].mxu1 %vm235_vm0, %v4280_v6  ;;  %v605_v6 = vld [vmem:[#allocation8 + $0x1e8] sm:$0xff] }
  0xc7   :  { %1337 = vmatpush1.bf16.msra.mxu0 %v4442_v52  ;;  %1362 = vmatpush1.bf16.msra.mxu1 %v4444_v55  ;;  %v4477_v31 = vcombine.high %v601_v19, %v605_v6  ;;  %v4485_v21 = vcombine.low %v601_v19, %v605_v6  ;;  %v4502_v19 = vcombine.high %v617_v62, %v621_v3 }
  0xc8   :  { %1338 = vmatprep.subr.bf16.mxu0 %v4448_v56  ;;  %1363 = vmatprep.subr.bf16.mxu1 %v4450_v58 }
  0xc9   :  { %529 = vmatprep.mubr.bf16.mxu1 %v6224_v0  ;;  %6553 = vst [vmem:[#allocation65_spill] sm:$0xff] %v4477_v31  ;;  %6555 = vst [vmem:[#allocation67_spill] sm:$0xff] %v4485_v21  ;;  %v554_v0 = vld [vmem:[#allocation8 + $0x50] sm:$0xff] }
  0xca   :  { %6560 = vst [vmem:[#allocation72_spill] sm:$0xff] %v4502_v19 }
  0xcb   :  { %1339 = vmatpush1.bf16.msra.mxu0 %v4456_v4  ;;  %1364 = vmatpush1.bf16.msra.mxu1 %v4458_v7 }
  0xcc   :  { %1340 = vmatprep.subr.bf16.mxu0 %v4462_v8  ;;  %1365 = vmatprep.subr.bf16.mxu1 %v4464_v14 }
  0xce   :  { %3398 = vmatmul.mubr.msk.bf16.gmra.mrb[36].mxu1 %vm235_vm0, %v4292_v22  ;;  %v558_v22 = vld [vmem:[#allocation8 + $0x70] sm:$0xff] }
  0xcf   :  { %1341 = vmatpush1.bf16.msra.mxu0 %v4469_v20  ;;  %1366 = vmatpush1.bf16.msra.mxu1 %v4471_v23  ;;  %v4504_v6 = vcombine.high %v554_v0, %v558_v22  ;;  %v562_v20 = vld [vmem:[#allocation8 + $0x90] sm:$0xff]  ;;  %v6562_v23 = vmov 0.0|0.0   ;;  %v4511_v36 = vcombine.low %v554_v0, %v558_v22 }
  0xd0   :  { %1342 = vmatprep.subr.bf16.mxu0 %v4475_v26  ;;  %1367 = vmatprep.subr.bf16.mxu1 %v4477_v31  ;;  %v625_v26 = vld [vmem:[#allocation8 + $0x288] sm:$0xff] }
  0xd1   :  { %1385 = vmatprep.mubr.bf16.mxu1 %v6232_v63  ;;  %6561 = vst [vmem:[#allocation73_spill] sm:$0xff] %v4504_v6  ;;  %v629_v31 = vld [vmem:[#allocation8 + $0x2a8] sm:$0xff]  ;;  %v566_v63 = vld [vmem:[#allocation8 + $0xb0] sm:$0xff]  ;;  %6564 = vst [vmem:[#allocation75_spill] sm:$0xff] %v4511_v36 }
  0xd2   :  { %v4515_v47 = vcombine.high %v625_v26, %v629_v31  ;;  %v4517_v48 = vcombine.high %v562_v20, %v566_v63  ;;  %v4522_v0 = vcombine.low %v625_v26, %v629_v31  ;;  %v4524_v62 = vcombine.low %v562_v20, %v566_v63 }
  0xd3   :  { %1343 = vmatpush1.bf16.msra.mxu0 %v4483_v51  ;;  %1368 = vmatpush1.bf16.msra.mxu1 %v4485_v21  ;;  %v570_v51 = vld [vmem:[#allocation8 + $0xd0] sm:$0xff] }
  0xd4   :  { %1369 = vmatprep.subr.bf16.mxu1 %v4489_v59  ;;  %1394 = vmatprep.subr.bf16.mxu0 %v4491_v60  ;;  %6565 = vst [vmem:[#allocation76_spill] sm:$0xff] %v4515_v47  ;;  %6566 = vst [vmem:[#allocation77_spill] sm:$0xff] %v4517_v48  ;;  %v633_v60 = vld [vmem:[#allocation8 + $0x2c8] sm:$0xff]  ;;  %v574_v21 = vld [vmem:[#allocation8 + $0xf0] sm:$0xff] }
  0xd5   :  { %v637_v59 = vld [vmem:[#allocation8 + $0x2e8] sm:$0xff]  ;;  %6567 = vst [vmem:[#allocation78_spill] sm:$0xff] %v4522_v0  ;;  %6568 = vst [vmem:[#allocation79_spill] sm:$0xff] %v4524_v62  ;;  %v4530_v22 = vcombine.high %v570_v51, %v574_v21  ;;  %v4536_v63 = vcombine.low %v570_v51, %v574_v21 }
  0xd6   :  { %1345 = vmatmul.mubr.bf16.vlgmr.msra.gmra.mrb[24].mxu0 %v6562_v23  ;;  %v4528_v3 = vcombine.high %v633_v60, %v637_v59  ;;  %v4534_v26 = vcombine.low %v633_v60, %v637_v59 }
  0xd7   :  { %1370 = vmatpush1.bf16.msra.mxu1 %v4496_v15  ;;  %1395 = vmatpush1.bf16.msra.mxu0 %v4498_v17  ;;  %6570 = vst [vmem:[#allocation81_spill] sm:$0xff] %v4530_v22  ;;  %v645_v17 = vld [vmem:[#allocation8 + $0x328] sm:$0xff]  ;;  %v582_v15 = vld [vmem:[#allocation8 + $0x130] sm:$0xff]  ;;  %6572 = vst [vmem:[#allocation83_spill] sm:$0xff] %v4536_v63 }
  0xd8   :  { %1371 = vmatprep.subr.bf16.mxu1 %v4502_v19  ;;  %1396 = vmatprep.subr.bf16.mxu0 %v4504_v6  ;;  %6569 = vst [vmem:[#allocation80_spill] sm:$0xff] %v4528_v3  ;;  %v641_v6 = vld [vmem:[#allocation8 + $0x308] sm:$0xff]  ;;  %v578_v19 = vld [vmem:[#allocation8 + $0x110] sm:$0xff]  ;;  %6571 = vst [vmem:[#allocation82_spill] sm:$0xff] %v4534_v26 }
  0xd9   :  { %1426 = vmatprep.mubr.bf16.mxu0 %v6562_v23  ;;  %v4540_v20 = vcombine.high %v641_v6, %v645_v17  ;;  %v4542_v31 = vcombine.high %v578_v19, %v582_v15  ;;  %v4546_v59 = vcombine.low %v641_v6, %v645_v17  ;;  %v4548_v51 = vcombine.low %v578_v19, %v582_v15 }
  0xdb   :  { %1372 = vmatpush1.bf16.msra.mxu1 %v4509_v35  ;;  %1397 = vmatpush1.bf16.msra.mxu0 %v4511_v36  ;;  %6573 = vst [vmem:[#allocation84_spill] sm:$0xff] %v4540_v20  ;;  %6574 = vst [vmem:[#allocation85_spill] sm:$0xff] %v4542_v31  ;;  %v653_v36 = vld [vmem:[#allocation8 + $0x368] sm:$0xff]  ;;  %v590_v35 = vld [vmem:[#allocation8 + $0x170] sm:$0xff] }
  0xdc   :  { %1373 = vmatprep.subr.bf16.mxu1 %v4515_v47  ;;  %1398 = vmatprep.subr.bf16.mxu0 %v4517_v48  ;;  %v649_v48 = vld [vmem:[#allocation8 + $0x348] sm:$0xff]  ;;  %v586_v47 = vld [vmem:[#allocation8 + $0x150] sm:$0xff]  ;;  %6575 = vst [vmem:[#allocation86_spill] sm:$0xff] %v4546_v59  ;;  %6576 = vst [vmem:[#allocation87_spill] sm:$0xff] %v4548_v51 }
  0xdd   :  { %v4552_v21 = vcombine.high %v649_v48, %v653_v36  ;;  %v4554_v60 = vcombine.high %v586_v47, %v590_v35  ;;  %v4558_v17 = vcombine.low %v649_v48, %v653_v36  ;;  %v4560_v15 = vcombine.low %v586_v47, %v590_v35 }
  0xdf   :  { %1374 = vmatpush1.bf16.msra.mxu1 %v4522_v0  ;;  %1399 = vmatpush1.bf16.msra.mxu0 %v4524_v62  ;;  %6577 = vst [vmem:[#allocation88_spill] sm:$0xff] %v4552_v21  ;;  %6578 = vst [vmem:[#allocation89_spill] sm:$0xff] %v4554_v60  ;;  %v661_v62 = vld [vmem:[#allocation8 + $0x3a8] sm:$0xff]  ;;  %v598_v0 = vld [vmem:[#allocation8 + $0x1b0] sm:$0xff] }
  0xe0   :  { %1375 = vmatprep.subr.bf16.mxu1 %v4528_v3  ;;  %1400 = vmatprep.subr.bf16.mxu0 %v4530_v22  ;;  %v657_v22 = vld [vmem:[#allocation8 + $0x388] sm:$0xff]  ;;  %v594_v3 = vld [vmem:[#allocation8 + $0x190] sm:$0xff]  ;;  %6579 = vst [vmem:[#allocation90_spill] sm:$0xff] %v4558_v17  ;;  %6580 = vst [vmem:[#allocation91_spill] sm:$0xff] %v4560_v15 }
  0xe1   :  { %v4564_v19 = vcombine.high %v657_v22, %v661_v62  ;;  %v4566_v6 = vcombine.high %v594_v3, %v598_v0  ;;  %v4570_v36 = vcombine.low %v657_v22, %v661_v62  ;;  %v4572_v35 = vcombine.low %v594_v3, %v598_v0 }
  0xe3   :  { %1376 = vmatpush1.bf16.msra.mxu1 %v4534_v26  ;;  %1401 = vmatpush1.bf16.msra.mxu0 %v4536_v63  ;;  %6581 = vst [vmem:[#allocation92_spill] sm:$0xff] %v4564_v19  ;;  %6582 = vst [vmem:[#allocation93_spill] sm:$0xff] %v4566_v6  ;;  %v669_v63 = vld [vmem:[#allocation8 + $0x3e8] sm:$0xff]  ;;  %v606_v26 = vld [vmem:[#allocation8 + $0x1f0] sm:$0xff] }
  0xe4   :  { %1377 = vmatprep.subr.bf16.mxu1 %v4540_v20  ;;  %1402 = vmatprep.subr.bf16.mxu0 %v4542_v31  ;;  %v665_v31 = vld [vmem:[#allocation8 + $0x3c8] sm:$0xff]  ;;  %v602_v20 = vld [vmem:[#allocation8 + $0x1d0] sm:$0xff]  ;;  %6583 = vst [vmem:[#allocation94_spill] sm:$0xff] %v4570_v36  ;;  %6584 = vst [vmem:[#allocation95_spill] sm:$0xff] %v4572_v35 }
  0xe5   :  { %v4576_v47 = vcombine.high %v665_v31, %v669_v63  ;;  %v4578_v48 = vcombine.high %v602_v20, %v606_v26  ;;  %v4582_v62 = vcombine.low %v665_v31, %v669_v63  ;;  %v4584_v0 = vcombine.low %v602_v20, %v606_v26 }
  0xe7   :  { %1378 = vmatpush1.bf16.msra.mxu1 %v4546_v59  ;;  %1403 = vmatpush1.bf16.msra.mxu0 %v4548_v51  ;;  %6585 = vst [vmem:[#allocation96_spill] sm:$0xff] %v4576_v47  ;;  %6586 = vst [vmem:[#allocation97_spill] sm:$0xff] %v4578_v48  ;;  %v614_v51 = vld [vmem:[#allocation8 + $0x230] sm:$0xff]  ;;  %v551_v59 = vld [vmem:[#allocation8 + $0x38] sm:$0xff] }
  0xe8   :  { %1379 = vmatprep.subr.bf16.mxu1 %v4552_v21  ;;  %1404 = vmatprep.subr.bf16.mxu0 %v4554_v60  ;;  %v610_v60 = vld [vmem:[#allocation8 + $0x210] sm:$0xff]  ;;  %v547_v21 = vld [vmem:[#allocation8 + $0x18] sm:$0xff]  ;;  %6587 = vst [vmem:[#allocation98_spill] sm:$0xff] %v4582_v62  ;;  %6588 = vst [vmem:[#allocation99_spill] sm:$0xff] %v4584_v0 }
  0xe9   :  { %v4588_v3 = vcombine.high %v610_v60, %v614_v51  ;;  %v4590_v22 = vcombine.high %v547_v21, %v551_v59  ;;  %v4594_v63 = vcombine.low %v610_v60, %v614_v51  ;;  %v4596_v26 = vcombine.low %v547_v21, %v551_v59 }
  0xeb   :  { %1380 = vmatpush1.bf16.msra.mxu1 %v4558_v17  ;;  %1405 = vmatpush1.bf16.msra.mxu0 %v4560_v15  ;;  %6589 = vst [vmem:[#allocation100_spill] sm:$0xff] %v4588_v3  ;;  %6590 = vst [vmem:[#allocation101_spill] sm:$0xff] %v4590_v22  ;;  %v622_v15 = vld [vmem:[#allocation8 + $0x270] sm:$0xff]  ;;  %v559_v17 = vld [vmem:[#allocation8 + $0x78] sm:$0xff] }
  0xec   :  { %1381 = vmatprep.subr.bf16.mxu1 %v4564_v19  ;;  %1406 = vmatprep.subr.bf16.mxu0 %v4566_v6  ;;  %v618_v6 = vld [vmem:[#allocation8 + $0x250] sm:$0xff]  ;;  %v555_v19 = vld [vmem:[#allocation8 + $0x58] sm:$0xff]  ;;  %6591 = vst [vmem:[#allocation102_spill] sm:$0xff] %v4594_v63  ;;  %6592 = vst [vmem:[#allocation103_spill] sm:$0xff] %v4596_v26 }
  0xed   :  { %v4600_v20 = vcombine.high %v618_v6, %v622_v15  ;;  %v4602_v31 = vcombine.high %v555_v19, %v559_v17  ;;  %v4607_v59 = vcombine.low %v618_v6, %v622_v15  ;;  %v4609_v51 = vcombine.low %v555_v19, %v559_v17 }
  0xef   :  { %1382 = vmatpush1.bf16.msra.mxu1 %v4570_v36  ;;  %1407 = vmatpush1.bf16.msra.mxu0 %v4572_v35  ;;  %6593 = vst [vmem:[#allocation104_spill] sm:$0xff] %v4600_v20  ;;  %6594 = vst [vmem:[#allocation105_spill] sm:$0xff] %v4602_v31  ;;  %v630_v35 = vld [vmem:[#allocation8 + $0x2b0] sm:$0xff]  ;;  %v567_v36 = vld [vmem:[#allocation8 + $0xb8] sm:$0xff] }
  0xf0   :  { %1383 = vmatprep.subr.bf16.mxu1 %v4576_v47  ;;  %1408 = vmatprep.subr.bf16.mxu0 %v4578_v48  ;;  %v626_v48 = vld [vmem:[#allocation8 + $0x290] sm:$0xff]  ;;  %v563_v47 = vld [vmem:[#allocation8 + $0x98] sm:$0xff]  ;;  %6595 = vst [vmem:[#allocation106_spill] sm:$0xff] %v4607_v59  ;;  %6596 = vst [vmem:[#allocation107_spill] sm:$0xff] %v4609_v51 }
  0xf1   :  { %v4613_v21 = vcombine.high %v626_v48, %v630_v35  ;;  %v4615_v60 = vcombine.high %v563_v47, %v567_v36  ;;  %v4620_v17 = vcombine.low %v626_v48, %v630_v35  ;;  %v4622_v15 = vcombine.low %v563_v47, %v567_v36 }
  0xf3   :  { %1384 = vmatpush1.bf16.msra.mxu1 %v4582_v62  ;;  %1409 = vmatpush1.bf16.msra.mxu0 %v4584_v0  ;;  %6597 = vst [vmem:[#allocation108_spill] sm:$0xff] %v4613_v21  ;;  %6598 = vst [vmem:[#allocation109_spill] sm:$0xff] %v4615_v60  ;;  %v638_v0 = vld [vmem:[#allocation8 + $0x2f0] sm:$0xff]  ;;  %v575_v62 = vld [vmem:[#allocation8 + $0xf8] sm:$0xff] }
  0xf4   :  { %1410 = vmatprep.subr.bf16.mxu0 %v4588_v3  ;;  %1435 = vmatprep.subr.bf16.mxu1 %v4590_v22  ;;  %v634_v3 = vld [vmem:[#allocation8 + $0x2d0] sm:$0xff]  ;;  %v571_v22 = vld [vmem:[#allocation8 + $0xd8] sm:$0xff]  ;;  %6599 = vst [vmem:[#allocation110_spill] sm:$0xff] %v4620_v17  ;;  %6600 = vst [vmem:[#allocation111_spill] sm:$0xff] %v4622_v15 }
  0xf5   :  { %v4626_v19 = vcombine.high %v634_v3, %v638_v0  ;;  %v4628_v6 = vcombine.high %v571_v22, %v575_v62  ;;  %v4632_v35 = vcombine.low %v634_v3, %v638_v0  ;;  %v4634_v36 = vcombine.low %v571_v22, %v575_v62 }
  0xf6   :  { %1386 = vmatmul.mubr.bf16.vlgmr.msra.gmra.mrb[40].mxu1 %v6562_v23 }
  0xf7   :  { %1411 = vmatpush1.bf16.msra.mxu0 %v4594_v63  ;;  %1436 = vmatpush1.bf16.msra.mxu1 %v4596_v26  ;;  %6601 = vst [vmem:[#allocation112_spill] sm:$0xff] %v4626_v19  ;;  %6602 = vst [vmem:[#allocation113_spill] sm:$0xff] %v4628_v6  ;;  %v646_v63 = vld [vmem:[#allocation8 + $0x330] sm:$0xff]  ;;  %v583_v26 = vld [vmem:[#allocation8 + $0x138] sm:$0xff] }
  0xf8   :  { %1412 = vmatprep.subr.bf16.mxu0 %v4600_v20  ;;  %1437 = vmatprep.subr.bf16.mxu1 %v4602_v31  ;;  %v642_v20 = vld [vmem:[#allocation8 + $0x310] sm:$0xff]  ;;  %v579_v31 = vld [vmem:[#allocation8 + $0x118] sm:$0xff]  ;;  %6603 = vst [vmem:[#allocation114_spill] sm:$0xff] %v4632_v35  ;;  %6604 = vst [vmem:[#allocation115_spill] sm:$0xff] %v4634_v36 }
  0xf9   :  { %1467 = vmatprep.mubr.bf16.mxu1 %v6562_v23  ;;  %v4638_v47 = vcombine.high %v642_v20, %v646_v63  ;;  %v4640_v48 = vcombine.high %v579_v31, %v583_v26  ;;  %v4644_v0 = vcombine.low %v642_v20, %v646_v63  ;;  %v4646_v62 = vcombine.low %v579_v31, %v583_v26 }
  0xfb   :  { %1413 = vmatpush1.bf16.msra.mxu0 %v4607_v59  ;;  %1438 = vmatpush1.bf16.msra.mxu1 %v4609_v51  ;;  %6605 = vst [vmem:[#allocation116_spill] sm:$0xff] %v4638_v47  ;;  %6606 = vst [vmem:[#allocation117_spill] sm:$0xff] %v4640_v48  ;;  %v654_v59 = vld [vmem:[#allocation8 + $0x370] sm:$0xff]  ;;  %v591_v51 = vld [vmem:[#allocation8 + $0x178] sm:$0xff] }
  0xfc   :  { %1414 = vmatprep.subr.bf16.mxu0 %v4613_v21  ;;  %1439 = vmatprep.subr.bf16.mxu1 %v4615_v60  ;;  %v650_v21 = vld [vmem:[#allocation8 + $0x350] sm:$0xff]  ;;  %v587_v60 = vld [vmem:[#allocation8 + $0x158] sm:$0xff]  ;;  %6607 = vst [vmem:[#allocation118_spill] sm:$0xff] %v4644_v0  ;;  %6608 = vst [vmem:[#allocation119_spill] sm:$0xff] %v4646_v62 }
  0xfd   :  { %v4650_v3 = vcombine.high %v650_v21, %v654_v59  ;;  %v4652_v22 = vcombine.high %v587_v60, %v591_v51  ;;  %v4656_v63 = vcombine.low %v650_v21, %v654_v59  ;;  %v4658_v26 = vcombine.low %v587_v60, %v591_v51 }
  0xff   :  { %1415 = vmatpush1.bf16.msra.mxu0 %v4620_v17  ;;  %1440 = vmatpush1.bf16.msra.mxu1 %v4622_v15  ;;  %6609 = vst [vmem:[#allocation120_spill] sm:$0xff] %v4650_v3  ;;  %6610 = vst [vmem:[#allocation121_spill] sm:$0xff] %v4652_v22  ;;  %v662_v17 = vld [vmem:[#allocation8 + $0x3b0] sm:$0xff]  ;;  %v599_v15 = vld [vmem:[#allocation8 + $0x1b8] sm:$0xff] }
 0x100   :  { %1416 = vmatprep.subr.bf16.mxu0 %v4626_v19  ;;  %1441 = vmatprep.subr.bf16.mxu1 %v4628_v6  ;;  %v658_v19 = vld [vmem:[#allocation8 + $0x390] sm:$0xff]  ;;  %v595_v6 = vld [vmem:[#allocation8 + $0x198] sm:$0xff]  ;;  %6611 = vst [vmem:[#allocation122_spill] sm:$0xff] %v4656_v63  ;;  %6612 = vst [vmem:[#allocation123_spill] sm:$0xff] %v4658_v26 }
 0x101   :  { %v4662_v20 = vcombine.high %v658_v19, %v662_v17  ;;  %v4664_v31 = vcombine.high %v595_v6, %v599_v15  ;;  %v4668_v59 = vcombine.low %v658_v19, %v662_v17  ;;  %v4670_v51 = vcombine.low %v595_v6, %v599_v15  ;;  %v619_v6 = vld [vmem:[#allocation8 + $0x258] sm:$0xff] }
 0x103   :  { %1417 = vmatpush1.bf16.msra.mxu0 %v4632_v35  ;;  %1442 = vmatpush1.bf16.msra.mxu1 %v4634_v36  ;;  %6613 = vst [vmem:[#allocation124_spill] sm:$0xff] %v4662_v20  ;;  %6614 = vst [vmem:[#allocation125_spill] sm:$0xff] %v4664_v31  ;;  %v670_v35 = vld [vmem:[#allocation8 + $0x3f0] sm:$0xff]  ;;  %v607_v36 = vld [vmem:[#allocation8 + $0x1f8] sm:$0xff] }
 0x104   :  { %1418 = vmatprep.subr.bf16.mxu0 %v4638_v47  ;;  %1443 = vmatprep.subr.bf16.mxu1 %v4640_v48  ;;  %v666_v47 = vld [vmem:[#allocation8 + $0x3d0] sm:$0xff]  ;;  %v603_v48 = vld [vmem:[#allocation8 + $0x1d8] sm:$0xff]  ;;  %6615 = vst [vmem:[#allocation126_spill] sm:$0xff] %v4668_v59  ;;  %6616 = vst [vmem:[#allocation127_spill] sm:$0xff] %v4670_v51 }
 0x105   :  { %v4674_v21 = vcombine.high %v666_v47, %v670_v35  ;;  %v4676_v60 = vcombine.high %v603_v48, %v607_v36  ;;  %v4682_v17 = vcombine.low %v666_v47, %v670_v35  ;;  %v4684_v15 = vcombine.low %v603_v48, %v607_v36  ;;  %v627_v36 = vld [vmem:[#allocation8 + $0x298] sm:$0xff] }
 0x106   :  { %v631_v47 = vld [vmem:[#allocation8 + $0x2b8] sm:$0xff] }
 0x107   :  { %1419 = vmatpush1.bf16.msra.mxu0 %v4644_v0  ;;  %1444 = vmatpush1.bf16.msra.mxu1 %v4646_v62  ;;  %6617 = vst [vmem:[#allocation128_spill] sm:$0xff] %v4674_v21  ;;  %6618 = vst [vmem:[#allocation129_spill] sm:$0xff] %v4676_v60  ;;  %v615_v0 = vld [vmem:[#allocation8 + $0x238] sm:$0xff] }
 0x108   :  { %1420 = vmatprep.subr.bf16.mxu0 %v4650_v3  ;;  %1445 = vmatprep.subr.bf16.mxu1 %v4652_v22  ;;  %v611_v3 = vld [vmem:[#allocation8 + $0x218] sm:$0xff]  ;;  %v6619_v22 = vmov 0   ;;  %6620 = vst [vmem:[#allocation130_spill] sm:$0xff] %v4682_v17  ;;  %6621 = vst [vmem:[#allocation131_spill] sm:$0xff] %v4684_v15 }
 0x109   :  { %v4689_v19 = vcombine.high %v611_v3, %v615_v0  ;;  %v4694_v35 = vcombine.low %v611_v3, %v615_v0  ;;  %v4706_v0 = vcombine.high %v627_v36, %v631_v47  ;;  %v635_v3 = vld [vmem:[#allocation8 + $0x2d8] sm:$0xff] }
 0x10b   :  { %1421 = vmatpush1.bf16.msra.mxu0 %v4656_v63  ;;  %1446 = vmatpush1.bf16.msra.mxu1 %v4658_v26  ;;  %v2015_v63 = vsel %vm1785_vm3, 1, %v6619_v22  ;;  %6622 = vst [vmem:[#allocation132_spill] sm:$0xff] %v4689_v19  ;;  %6623 = vst [vmem:[#allocation133_spill] sm:$0xff] %v4694_v35 }
 0x10c   :  { %1422 = vmatprep.subr.bf16.mxu0 %v4662_v20  ;;  %1447 = vmatprep.subr.bf16.mxu1 %v4664_v31  ;;  %v623_v20 = vld [vmem:[#allocation8 + $0x278] sm:$0xff]  ;;  %v2253_v31 = vsel %vm2023_vm4, 1, %v6619_v22  ;;  %6626 = vst [vmem:[#allocation136_spill] sm:$0xff] %v4706_v0 }
 0x10d   :  { %2017 = vperm.xlu0 %3654, %v2015_v63   ;;  %v4697_v11 = vcombine.high %v619_v6, %v623_v20  ;;  %v4702_v48 = vcombine.low %v619_v6, %v623_v20  ;;  %v639_v63 = vld [vmem:[#allocation8 + $0x2f8] sm:$0xff] }
 0x10e   :  { %v4714_v20 = vcombine.high %v635_v3, %v639_v63  ;;  %v647_v6 = vld [vmem:[#allocation8 + $0x338] sm:$0xff] }
 0x10f   :  { %1423 = vmatpush1.bf16.msra.mxu0 %v4668_v59  ;;  %1448 = vmatpush1.bf16.msra.mxu1 %v4670_v51  ;;  %6624 = vst [vmem:[#allocation134_spill] sm:$0xff] %v4697_v11  ;;  %6625 = vst [vmem:[#allocation135_spill] sm:$0xff] %v4702_v48 }
 0x110   :  { %1424 = vmatprep.subr.bf16.mxu0 %v4674_v21  ;;  %1449 = vmatprep.subr.bf16.mxu1 %v4676_v60  ;;  %6628 = vst [vmem:[#allocation138_spill] sm:$0xff] %v4714_v20 }
 0x111   :  { %2255 = vperm.xlu0 %3654, %v2253_v31   ;;  %v643_v31 = vld [vmem:[#allocation8 + $0x318] sm:$0xff] }
 0x113   :  { %1425 = vmatpush1.bf16.msra.mxu0 %v4682_v17  ;;  %1450 = vmatpush1.bf16.msra.mxu1 %v4684_v15 }
 0x114   :  { %1451 = vmatprep.subr.bf16.mxu1 %v4689_v19  ;;  %1550 = vmatprep.subr.bf16.mxu0 %v4286_v18  ;;  %v4710_v18 = vcombine.low %v627_v36, %v631_v47  ;;  %v4722_v36 = vcombine.high %v643_v31, %v647_v6  ;;  %v651_v47 = vld [vmem:[#allocation8 + $0x358] sm:$0xff] }
 0x116   :  { %1427 = vmatmul.mubr.bf16.vlgmr.msra.gmra.mrb[28].mxu0 %v6562_v23  ;;  %6627 = vst [vmem:[#allocation137_spill] sm:$0xff] %v4710_v18  ;;  %6630 = vst [vmem:[#allocation140_spill] sm:$0xff] %v4722_v36 }
 0x117   :  { %1452 = vmatpush1.bf16.msra.mxu1 %v4694_v35  ;;  %1551 = vmatpush1.bf16.msra.mxu0 %v4305_v28  ;;  %v4718_v28 = vcombine.low %v635_v3, %v639_v63  ;;  %v659_v63 = vld [vmem:[#allocation8 + $0x398] sm:$0xff] }
 0x118   :  { %1453 = vmatprep.subr.bf16.mxu1 %v4697_v11  ;;  %1552 = vmatprep.subr.bf16.mxu0 %v4307_v29  ;;  %v4726_v29 = vcombine.low %v643_v31, %v647_v6  ;;  %v667_v6 = vld [vmem:[#allocation8 + $0x3d8] sm:$0xff] }
 0x119   :  { %6629 = vst [vmem:[#allocation139_spill] sm:$0xff] %v4718_v28 }
 0x11a   :  { %6631 = vst [vmem:[#allocation141_spill] sm:$0xff] %v4726_v29 }
 0x11b   :  { %1454 = vmatpush1.bf16.msra.mxu1 %v4702_v48  ;;  %1553 = vmatpush1.bf16.msra.mxu0 %v4318_v33  ;;  %v655_v33 = vld [vmem:[#allocation8 + $0x378] sm:$0xff] }
 0x11c   :  { %1455 = vmatprep.subr.bf16.mxu1 %v4706_v0  ;;  %1554 = vmatprep.subr.bf16.mxu0 %v4322_v34  ;;  %v4730_v3 = vcombine.high %v651_v47, %v655_v33  ;;  %v4734_v34 = vcombine.low %v651_v47, %v655_v33 }
 0x11e   :  { %6632 = vst [vmem:[#allocation142_spill] sm:$0xff] %v4730_v3  ;;  %6633 = vst [vmem:[#allocation143_spill] sm:$0xff] %v4734_v34 }
 0x11f   :  { %1456 = vmatpush1.bf16.msra.mxu1 %v4710_v18  ;;  %1555 = vmatpush1.bf16.msra.mxu0 %v4327_v37  ;;  %v663_v37 = vld [vmem:[#allocation8 + $0x3b8] sm:$0xff] }
 0x120   :  { %1457 = vmatprep.subr.bf16.mxu1 %v4714_v20  ;;  %1556 = vmatprep.subr.bf16.mxu0 %v4330_v38  ;;  %v4738_v31 = vcombine.high %v659_v63, %v663_v37  ;;  %v4742_v38 = vcombine.low %v659_v63, %v663_v37  ;;  %v6380_v37 = vlaneseq  ;;  %v6639_v63 = vld [vmem:[#allocation62_spill] sm:$0xff] }
 0x122   :  { %6634 = vst [vmem:[#allocation144_spill] sm:$0xff] %v4738_v31  ;;  %6635 = vst [vmem:[#allocation145_spill] sm:$0xff] %v4742_v38 }
 0x123   :  { %1458 = vmatpush1.bf16.msra.mxu1 %v4718_v28  ;;  %1557 = vmatpush1.bf16.msra.mxu0 %v4337_v41  ;;  %v671_v41 = vld [vmem:[#allocation8 + $0x3f8] sm:$0xff] }
 0x124   :  { %1459 = vmatprep.subr.bf16.mxu1 %v4722_v36  ;;  %1558 = vmatprep.subr.bf16.mxu0 %v4341_v42  ;;  %v4746_v33 = vcombine.high %v667_v6, %v671_v41  ;;  %v4750_v47 = vcombine.low %v667_v6, %v671_v41  ;;  %v4785_v41 = vshrl.u32 %v6380_v37, 7  ;;  %v6640_v6 = vld [vmem:[#allocation65_spill] sm:$0xff]  ;;  %v6644_v37 = vld [vmem:[#allocation68_spill] sm:$0xff] }
 0x126   :  { %6636 = vst [vmem:[#allocation146_spill] sm:$0xff] %v4746_v33  ;;  %6637 = vst [vmem:[#allocation147_spill] sm:$0xff] %v4750_v47 }
 0x127   :  { %1460 = vmatpush1.bf16.msra.mxu1 %v4726_v29  ;;  %1559 = vmatpush1.bf16.msra.mxu0 %v4345_v45 }
 0x128   :  { %1461 = vmatprep.subr.bf16.mxu1 %v4730_v3  ;;  %1560 = vmatprep.subr.bf16.mxu0 %v4348_v46 }
 0x12b   :  { %1462 = vmatpush1.bf16.msra.mxu1 %v4734_v34  ;;  %1561 = vmatpush1.bf16.msra.mxu0 %v4355_v49 }
 0x12c   :  { %1463 = vmatprep.subr.bf16.mxu1 %v4738_v31  ;;  %1562 = vmatprep.subr.bf16.mxu0 %v4359_v50 }
 0x12f   :  { %1464 = vmatpush1.bf16.msra.mxu1 %v4742_v38  ;;  %1563 = vmatpush1.bf16.msra.mxu0 %v4363_v53  ;;  %v6672_v53 = vld [vmem:[#allocation90_spill] sm:$0xff] }
 0x130   :  { %1465 = vmatprep.subr.bf16.mxu1 %v4746_v33  ;;  %1564 = vmatprep.subr.bf16.mxu0 %v4366_v54  ;;  %v6662_v54 = vld [vmem:[#allocation82_spill] sm:$0xff] }
 0x133   :  { %1466 = vmatpush1.bf16.msra.mxu1 %v4750_v47  ;;  %1565 = vmatpush1.bf16.msra.mxu0 %v4373_v57 }
 0x134   :  { %1591 = vmatprep.subr.bf16.mxu1 %v4311_v32  ;;  %1566 = vmatprep.subr.bf16.mxu0 %v4377_v61 }
 0x136   :  { %1468 = vmatmul.mubr.bf16.vlgmr.msra.gmra.mrb[44].mxu1 %v6562_v23  ;;  %v6638_v23 = vld [vmem:[#allocation63_spill] sm:$0xff] }
 0x137   :  { %1592 = vmatpush1.bf16.msra.mxu1 %v4385_v2  ;;  %1567 = vmatpush1.bf16.msra.mxu0 %v4381_v1 }
 0x138   :  { %1593 = vmatprep.subr.bf16.mxu1 %v4390_v10  ;;  %1568 = vmatprep.subr.bf16.mxu0 %v4388_v9 }
 0x13b   :  { %1594 = vmatpush1.bf16.msra.mxu1 %v4400_v13  ;;  %1569 = vmatpush1.bf16.msra.mxu0 %v4398_v12 }
 0x13c   :  { %1595 = vmatprep.subr.bf16.mxu1 %v4408_v16  ;;  %1570 = vmatprep.subr.bf16.mxu0 %v4406_v5  ;;  %v6647_v5 = vld [vmem:[#allocation72_spill] sm:$0xff] }
 0x13f   :  { %1596 = vmatpush1.bf16.msra.mxu1 %v4417_v25  ;;  %1571 = vmatpush1.bf16.msra.mxu0 %v4415_v24 }
 0x140   :  { %1597 = vmatprep.subr.bf16.mxu1 %v4423_v30  ;;  %1572 = vmatprep.subr.bf16.mxu0 %v4421_v27  ;;  %v6645_v27 = vld [vmem:[#allocation69_spill] sm:$0xff] }
 0x143   :  { %1598 = vmatpush1.bf16.msra.mxu1 %v4431_v40  ;;  %1573 = vmatpush1.bf16.msra.mxu0 %v4429_v39  ;;  %v6642_v39 = vld [vmem:[#allocation67_spill] sm:$0xff] }
 0x144   :  { %1599 = vmatprep.subr.bf16.mxu1 %v4437_v44  ;;  %1574 = vmatprep.subr.bf16.mxu0 %v4435_v43  ;;  %v4792_v43 = vld [vmem:[#allocation10] sm:$0xff] }
 0x147   :  { %1600 = vmatpush1.bf16.msra.mxu1 %v4444_v55  ;;  %1575 = vmatpush1.bf16.msra.mxu0 %v4442_v52  ;;  %v6641_v52 = vld [vmem:[#allocation64_spill] sm:$0xff] }
 0x148   :  { %1601 = vmatprep.subr.bf16.mxu1 %v4450_v58  ;;  %1576 = vmatprep.subr.bf16.mxu0 %v4448_v56  ;;  %v137_v56 = vsub.s32 0, %v4785_v41 }
 0x14b   :  { %1602 = vmatpush1.bf16.msra.mxu1 %v4458_v7  ;;  %1577 = vmatpush1.bf16.msra.mxu0 %v4456_v4  ;;  %v141_v4 = vsub.s32 1, %v4785_v41 }
 0x14c   :  { %1603 = vmatprep.subr.bf16.mxu1 %v4464_v14  ;;  %1578 = vmatprep.subr.bf16.mxu0 %v4462_v8  ;;  %v6643_v8 = vld [vmem:[#allocation66_spill] sm:$0xff] }
 0x14d   :  { %v4803_v24 = vrot.slane %v4792_v43, %v141_v4  ;;  %v6650_v4 = vld [vmem:[#allocation74_spill] sm:$0xff] }
 0x14f   :  { %1604 = vmatpush1.bf16.msra.mxu1 %v6638_v23  ;;  %1579 = vmatpush1.bf16.msra.mxu0 %v6639_v63  ;;  %v4800_v63 = vrot.slane %v4792_v43, %v137_v56  ;;  %v6665_v23 = vld [vmem:[#allocation84_spill] sm:$0xff] }
 0x150   :  { %1605 = vmatprep.subr.bf16.mxu1 %v6640_v6  ;;  %1580 = vmatprep.subr.bf16.mxu0 %v6641_v52  ;;  %v6646_v52 = vld [vmem:[#allocation70_spill] sm:$0xff]  ;;  %v6657_v6 = vld [vmem:[#allocation80_spill] sm:$0xff] }
 0x153   :  { %1606 = vmatpush1.bf16.msra.mxu1 %v6642_v39  ;;  %1581 = vmatpush1.bf16.msra.mxu0 %v6643_v8 }
 0x154   :  { %1607 = vmatprep.subr.bf16.mxu1 %v6644_v37  ;;  %1632 = vmatprep.subr.bf16.mxu0 %v6645_v27 }
 0x157   :  { %1608 = vmatpush1.bf16.msra.mxu1 %v6646_v52 }
 0x158   :  { %1609 = vmatprep.subr.bf16.mxu1 %v6647_v5 }
 0x159   :  { %v302_v12 = vpop.f32.mrb[0].mxu1  ;;  %v4807_v9 = vpop.f32.mrb[0].mxu0 }
 0x15a   :  { %v4810_v1 = vadd.f32 %v302_v12, %v4800_v63  ;;  %v304_v8 = vpop.f32.mrb[1].mxu1  ;;  %v4812_v37 = vpop.f32.mrb[1].mxu0  ;;  %v6653_v12 = vld [vmem:[#allocation76_spill] sm:$0xff] }
 0x15b   :  { %v4815_v27 = vadd.f32 %v304_v8, %v4803_v24  ;;  %v306_v56 = vpop.f32.mrb[2].mxu1  ;;  %v286_v61 = vpop.f32.mrb[2].mxu0  ;;  %1610 = vmatpush1.bf16.msra.mxu1 %v6650_v4 }
 0x15c   :  { %6648 = vst [vmem:[#allocation148_spill] sm:$0xff] %v4810_v1  ;;  %v4819_v52 = vadd.f32 %v306_v56, %v4800_v63  ;;  %v308_v5 = vpop.f32.mrb[3].mxu1  ;;  %v4822_v39 = vadd.f32 %v286_v61, %v4800_v63  ;;  %v288_v57 = vpop.f32.mrb[3].mxu0  ;;  %1611 = vmatprep.subr.bf16.mxu1 %v6653_v12 }
 0x15d   :  { %6649 = vst [vmem:[#allocation149_spill] sm:$0xff] %v4815_v27  ;;  %v4826_v1 = vadd.f32 %v308_v5, %v4803_v24  ;;  %v4829_v8 = vadd.f32 %v288_v57, %v4803_v24  ;;  %v6656_v27 = vld [vmem:[#allocation78_spill] sm:$0xff]  ;;  %v153_v5 = vsub.s32 4, %v4785_v41 }
 0x15e   :  { %6651 = vst [vmem:[#allocation150_spill] sm:$0xff] %v4819_v52  ;;  %6652 = vst [vmem:[#allocation151_spill] sm:$0xff] %v4822_v39 }
 0x15f   :  { %6654 = vst [vmem:[#allocation152_spill] sm:$0xff] %v4826_v1  ;;  %6655 = vst [vmem:[#allocation153_spill] sm:$0xff] %v4829_v8  ;;  %1612 = vmatpush1.bf16.msra.mxu1 %v6656_v27  ;;  %v157_v27 = vsub.s32 5, %v4785_v41 }
 0x160   :  { %1613 = vmatprep.subr.bf16.mxu1 %v6657_v6 }
 0x161   :  { %v312_v4 = vpop.f32.mrb[4].mxu1  ;;  %v292_v56 = vpop.f32.mrb[4].mxu0 }
 0x162   :  { %v4834_v52 = vadd.f32 %v312_v4, %v4800_v63  ;;  %v314_v61 = vpop.f32.mrb[5].mxu1  ;;  %v4837_v39 = vadd.f32 %v292_v56, %v4800_v63  ;;  %v294_v12 = vpop.f32.mrb[5].mxu0 }
 0x163   :  { %v4841_v1 = vadd.f32 %v314_v61, %v4803_v24  ;;  %v316_v57 = vpop.f32.mrb[6].mxu1  ;;  %v4844_v8 = vadd.f32 %v294_v12, %v4803_v24  ;;  %v296_v6 = vpop.f32.mrb[6].mxu0  ;;  %1614 = vmatpush1.bf16.msra.mxu1 %v6662_v54 }
 0x164   :  { %6658 = vst [vmem:[#allocation154_spill] sm:$0xff] %v4834_v52  ;;  %6659 = vst [vmem:[#allocation155_spill] sm:$0xff] %v4837_v39  ;;  %v4849_v4 = vadd.f32 %v316_v57, %v4800_v63  ;;  %v318_v56 = vpop.f32.mrb[7].mxu1  ;;  %v4852_v52 = vadd.f32 %v296_v6, %v4800_v63  ;;  %v298_v39 = vpop.f32.mrb[7].mxu0  ;;  %1615 = vmatprep.subr.bf16.mxu1 %v6665_v23  ;;  %v149_v57 = vsub.s32 3, %v4785_v41  ;;  %v6668_v6 = vld [vmem:[#allocation86_spill] sm:$0xff] }
 0x165   :  { %6660 = vst [vmem:[#allocation156_spill] sm:$0xff] %v4841_v1  ;;  %6661 = vst [vmem:[#allocation157_spill] sm:$0xff] %v4844_v8  ;;  %v4856_v61 = vadd.f32 %v318_v56, %v4803_v24  ;;  %v4859_v12 = vadd.f32 %v298_v39, %v4803_v24  ;;  %v145_v1 = vsub.s32 2, %v4785_v41  ;;  %v4863_v8 = vrot.slane %v4792_v43, %v153_v5 }
 0x166   :  { %6663 = vst [vmem:[#allocation158_spill] sm:$0xff] %v4849_v4  ;;  %6664 = vst [vmem:[#allocation159_spill] sm:$0xff] %v4852_v52  ;;  %v4867_v4 = vrot.slane %v4792_v43, %v157_v27  ;;  %v6669_v52 = vld [vmem:[#allocation88_spill] sm:$0xff]  ;;  %v4882_v54 = vrot.slane %v4792_v43, %v149_v57 }
 0x167   :  { %6666 = vst [vmem:[#allocation160_spill] sm:$0xff] %v4856_v61  ;;  %6667 = vst [vmem:[#allocation161_spill] sm:$0xff] %v4859_v12  ;;  %1616 = vmatpush1.bf16.msra.mxu1 %v6668_v6  ;;  %v4874_v39 = vrot.slane %v4792_v43, %v145_v1 }
 0x168   :  { %1617 = vmatprep.subr.bf16.mxu1 %v6669_v52 }
 0x169   :  { %v4871_v23 = vpop.f32.mrb[8].mxu1  ;;  %v428_v56 = vpop.f32.mrb[8].mxu0 }
 0x16a   :  { %v4876_v61 = vpop.f32.mrb[9].mxu1  ;;  %v4879_v5 = vadd.f32 %v428_v56, %v4863_v8  ;;  %v430_v12 = vpop.f32.mrb[9].mxu0 }
 0x16b   :  { %v359_v27 = vpop.f32.mrb[10].mxu1  ;;  %v4885_v6 = vadd.f32 %v430_v12, %v4867_v4  ;;  %v432_v52 = vpop.f32.mrb[10].mxu0  ;;  %1618 = vmatpush1.bf16.msra.mxu1 %v6672_v53  ;;  %v6678_v12 = vld [vmem:[#allocation94_spill] sm:$0xff] }
 0x16c   :  { %6670 = vst [vmem:[#allocation162_spill] sm:$0xff] %v4879_v5  ;;  %v4889_v14 = vadd.f32 %v359_v27, %v4874_v39  ;;  %v361_v1 = vpop.f32.mrb[11].mxu1  ;;  %v4892_v50 = vadd.f32 %v432_v52, %v4863_v8  ;;  %v434_v56 = vpop.f32.mrb[11].mxu0  ;;  %v6675_v5 = vld [vmem:[#allocation92_spill] sm:$0xff] }
 0x16d   :  { %6671 = vst [vmem:[#allocation163_spill] sm:$0xff] %v4885_v6  ;;  %1619 = vmatprep.subr.bf16.mxu1 %v6675_v5  ;;  %v4896_v57 = vadd.f32 %v361_v1, %v4882_v54  ;;  %v4899_v7 = vadd.f32 %v434_v56, %v4867_v4  ;;  %v6679_v6 = vld [vmem:[#allocation96_spill] sm:$0xff] }
 0x16e   :  { %6673 = vst [vmem:[#allocation164_spill] sm:$0xff] %v4889_v14  ;;  %6674 = vst [vmem:[#allocation165_spill] sm:$0xff] %v4892_v50 }
 0x16f   :  { %6676 = vst [vmem:[#allocation166_spill] sm:$0xff] %v4896_v57  ;;  %6677 = vst [vmem:[#allocation167_spill] sm:$0xff] %v4899_v7  ;;  %1620 = vmatpush1.bf16.msra.mxu1 %v6678_v12  ;;  %v6684_v12 = vld [vmem:[#allocation98_spill] sm:$0xff] }
 0x170   :  { %1621 = vmatprep.subr.bf16.mxu1 %v6679_v6 }
 0x171   :  { %v365_v53 = vpop.f32.mrb[12].mxu1  ;;  %v438_v27 = vpop.f32.mrb[12].mxu0 }
 0x172   :  { %v4904_v14 = vadd.f32 %v365_v53, %v4874_v39  ;;  %v367_v52 = vpop.f32.mrb[13].mxu1  ;;  %v4907_v50 = vadd.f32 %v438_v27, %v4863_v8  ;;  %v440_v5 = vpop.f32.mrb[13].mxu0 }
 0x173   :  { %v4910_v1 = vadd.f32 %v367_v52, %v4882_v54  ;;  %v369_v57 = vpop.f32.mrb[14].mxu1  ;;  %v4913_v56 = vadd.f32 %v440_v5, %v4867_v4  ;;  %v442_v7 = vpop.f32.mrb[14].mxu0  ;;  %1622 = vmatpush1.bf16.msra.mxu1 %v6684_v12 }
 0x174   :  { %6680 = vst [vmem:[#allocation168_spill] sm:$0xff] %v4904_v14  ;;  %6681 = vst [vmem:[#allocation169_spill] sm:$0xff] %v4907_v50  ;;  %v4917_v6 = vadd.f32 %v369_v57, %v4874_v39  ;;  %v371_v53 = vpop.f32.mrb[15].mxu1  ;;  %v4920_v14 = vadd.f32 %v442_v7, %v4863_v8  ;;  %v444_v27 = vpop.f32.mrb[15].mxu0  ;;  %v6687_v50 = vld [vmem:[#allocation101_spill] sm:$0xff] }
 0x175   :  { %6682 = vst [vmem:[#allocation170_spill] sm:$0xff] %v4910_v1  ;;  %6683 = vst [vmem:[#allocation171_spill] sm:$0xff] %v4913_v56  ;;  %1673 = vmatprep.subr.bf16.mxu1 %v6687_v50  ;;  %v4924_v52 = vadd.f32 %v371_v53, %v4882_v54  ;;  %v4927_v1 = vadd.f32 %v444_v27, %v4867_v4 }
 0x176   :  { %6685 = vst [vmem:[#allocation172_spill] sm:$0xff] %v4917_v6  ;;  %6686 = vst [vmem:[#allocation173_spill] sm:$0xff] %v4920_v14 }
 0x177   :  { %6688 = vst [vmem:[#allocation174_spill] sm:$0xff] %v4924_v52  ;;  %6689 = vst [vmem:[#allocation175_spill] sm:$0xff] %v4927_v1 }
 0x179   :  { %v375_v5 = vpop.f32.mrb[16].mxu1  ;;  %v448_v56 = vpop.f32.mrb[16].mxu0 }
 0x17a   :  { %v4930_v12 = vadd.f32 %v375_v5, %v4874_v39  ;;  %v377_v57 = vpop.f32.mrb[17].mxu1  ;;  %v4933_v6 = vadd.f32 %v448_v56, %v4863_v8  ;;  %v450_v7 = vpop.f32.mrb[17].mxu0 }
 0x17b   :  { %v4936_v14 = vadd.f32 %v377_v57, %v4882_v54  ;;  %v379_v50 = vpop.f32.mrb[18].mxu1  ;;  %v4939_v53 = vadd.f32 %v450_v7, %v4867_v4  ;;  %v452_v52 = vpop.f32.mrb[18].mxu0 }
 0x17c   :  { %6690 = vst [vmem:[#allocation176_spill] sm:$0xff] %v4930_v12  ;;  %6691 = vst [vmem:[#allocation177_spill] sm:$0xff] %v4933_v6  ;;  %v4942_v27 = vadd.f32 %v379_v50, %v4874_v39  ;;  %v381_v1 = vpop.f32.mrb[19].mxu1  ;;  %v4945_v5 = vadd.f32 %v452_v52, %v4863_v8  ;;  %v454_v12 = vpop.f32.mrb[19].mxu0  ;;  %v161_v50 = vsub.s32 6, %v4785_v41 }
 0x17d   :  { %6692 = vst [vmem:[#allocation178_spill] sm:$0xff] %v4936_v14  ;;  %6693 = vst [vmem:[#allocation179_spill] sm:$0xff] %v4939_v53  ;;  %v4948_v56 = vadd.f32 %v381_v1, %v4882_v54  ;;  %v4951_v6 = vadd.f32 %v454_v12, %v4867_v4 }
 0x17e   :  { %6694 = vst [vmem:[#allocation180_spill] sm:$0xff] %v4942_v27  ;;  %6695 = vst [vmem:[#allocation181_spill] sm:$0xff] %v4945_v5 }
 0x17f   :  { %6696 = vst [vmem:[#allocation182_spill] sm:$0xff] %v4948_v56  ;;  %6697 = vst [vmem:[#allocation183_spill] sm:$0xff] %v4951_v6  ;;  %v165_v56 = vsub.s32 7, %v4785_v41 }
 0x181   :  { %v385_v57 = vpop.f32.mrb[20].mxu1  ;;  %v458_v14 = vpop.f32.mrb[20].mxu0 }
 0x182   :  { %v4954_v7 = vadd.f32 %v385_v57, %v4874_v39  ;;  %v387_v53 = vpop.f32.mrb[21].mxu1  ;;  %v4958_v27 = vadd.f32 %v458_v14, %v4863_v8  ;;  %v460_v52 = vpop.f32.mrb[21].mxu0 }
 0x183   :  { %v4961_v5 = vadd.f32 %v387_v53, %v4882_v54  ;;  %v389_v1 = vpop.f32.mrb[22].mxu1  ;;  %v4965_v12 = vadd.f32 %v460_v52, %v4867_v4  ;;  %v4967_v6 = vpop.f32.mrb[22].mxu0  ;;  %v4978_v53 = vrot.slane %v4792_v43, %v161_v50 }
 0x184   :  { %6698 = vst [vmem:[#allocation184_spill] sm:$0xff] %v4954_v7  ;;  %6699 = vst [vmem:[#allocation185_spill] sm:$0xff] %v4958_v27  ;;  %v4970_v57 = vadd.f32 %v389_v1, %v4874_v39  ;;  %v391_v7 = vpop.f32.mrb[23].mxu1  ;;  %v4972_v49 = vpop.f32.mrb[23].mxu0 }
 0x185   :  { %6700 = vst [vmem:[#allocation186_spill] sm:$0xff] %v4961_v5  ;;  %6701 = vst [vmem:[#allocation187_spill] sm:$0xff] %v4965_v12  ;;  %v4975_v14 = vadd.f32 %v391_v7, %v4882_v54  ;;  %v4981_v5 = vrot.slane %v4792_v43, %v165_v56 }
 0x186   :  { %6702 = vst [vmem:[#allocation188_spill] sm:$0xff] %v4970_v57 }
 0x187   :  { %6703 = vst [vmem:[#allocation189_spill] sm:$0xff] %v4975_v14 }
 0x189   :  { %v501_v41 = vpop.f32.mrb[24].mxu1 }
 0x18a   :  { %v4984_v52 = vadd.f32 %v501_v41, %v4978_v53  ;;  %v503_v12 = vpop.f32.mrb[25].mxu1 }
 0x18b   :  { %v4987_v1 = vadd.f32 %v503_v12, %v4981_v5  ;;  %v505_v57 = vpop.f32.mrb[26].mxu1 }
 0x18c   :  { %6704 = vst [vmem:[#allocation190_spill] sm:$0xff] %v4984_v52  ;;  %v4990_v27 = vadd.f32 %v505_v57, %v4978_v53  ;;  %v507_v7 = vpop.f32.mrb[27].mxu1 }
 0x18d   :  { %6705 = vst [vmem:[#allocation191_spill] sm:$0xff] %v4987_v1  ;;  %v4993_v14 = vadd.f32 %v507_v7, %v4981_v5 }
 0x18e   :  { %6706 = vst [vmem:[#allocation192_spill] sm:$0xff] %v4990_v27 }
 0x18f   :  { %6707 = vst [vmem:[#allocation193_spill] sm:$0xff] %v4993_v14 }
 0x191   :  { %v511_v50 = vpop.f32.mrb[28].mxu1 }
 0x192   :  { %v4996_v43 = vadd.f32 %v511_v50, %v4978_v53  ;;  %v513_v56 = vpop.f32.mrb[29].mxu1 }
 0x193   :  { %v4999_v41 = vadd.f32 %v513_v56, %v4981_v5  ;;  %v515_v52 = vpop.f32.mrb[30].mxu1 }
 0x194   :  { %6708 = vst [vmem:[#allocation194_spill] sm:$0xff] %v4996_v43  ;;  %v5002_v12 = vadd.f32 %v515_v52, %v4978_v53  ;;  %v517_v1 = vpop.f32.mrb[31].mxu1 }
 0x195   :  { %6709 = vst [vmem:[#allocation195_spill] sm:$0xff] %v4999_v41  ;;  %v5005_v57 = vadd.f32 %v517_v1, %v4981_v5 }
 0x196   :  { %6710 = vst [vmem:[#allocation196_spill] sm:$0xff] %v5002_v12 }
 0x197   :  { %6711 = vst [vmem:[#allocation197_spill] sm:$0xff] %v5005_v57 }
 0x199   :  { %v521_v27 = vpop.f32.mrb[32].mxu1 }
 0x19a   :  { %v5008_v7 = vadd.f32 %v521_v27, %v4978_v53  ;;  %v523_v14 = vpop.f32.mrb[33].mxu1 }
 0x19b   :  { %v5011_v50 = vadd.f32 %v523_v14, %v4981_v5  ;;  %v525_v43 = vpop.f32.mrb[34].mxu1 }
 0x19c   :  { %6712 = vst [vmem:[#allocation198_spill] sm:$0xff] %v5008_v7  ;;  %v5014_v56 = vadd.f32 %v525_v43, %v4978_v53  ;;  %v527_v41 = vpop.f32.mrb[35].mxu1  ;;  %v283_v43 = vadd.f32 %v4807_v9, %v4800_v63  ;;  %v356_v9 = vadd.f32 %v4871_v23, %v4874_v39 }
 0x19d   :  { %6713 = vst [vmem:[#allocation199_spill] sm:$0xff] %v5011_v50  ;;  %v5017_v52 = vadd.f32 %v527_v41, %v4981_v5  ;;  %v285_v50 = vadd.f32 %v4812_v37, %v4803_v24  ;;  %v358_v24 = vadd.f32 %v4876_v61, %v4882_v54 }
 0x19e   :  { %6714 = vst [vmem:[#allocation200_spill] sm:$0xff] %v5014_v56 }
 0x19f   :  { %6715 = vst [vmem:[#allocation201_spill] sm:$0xff] %v5017_v52 }
 0x1a1   :  { %v531_v12 = vpop.f32.mrb[36].mxu1 }
 0x1a2   :  { %v5020_v1 = vadd.f32 %v531_v12, %v4978_v53  ;;  %v533_v57 = vpop.f32.mrb[37].mxu1 }
 0x1a3   :  { %v5023_v27 = vadd.f32 %v533_v57, %v4981_v5  ;;  %v5025_v7 = vpop.f32.mrb[38].mxu1 }
 0x1a4   :  { %6716 = vst [vmem:[#allocation202_spill] sm:$0xff] %v5020_v1  ;;  %v5027_v14 = vpop.f32.mrb[39].mxu1 }
 0x1a5   :  { %6717 = vst [vmem:[#allocation203_spill] sm:$0xff] %v5023_v27 }
 0x1a9   :  { %v1346_v41 = vpop.f32.mrb[24].mxu0 }
 0x1aa   :  { %v1476_v52 = vadd.f32 %v1346_v41, %v283_v43  ;;  %v1348_v56 = vpop.f32.mrb[25].mxu0 }
 0x1ab   :  { %v1477_v58 = vadd.f32 %v1348_v56, %v285_v50  ;;  %v1350_v12 = vpop.f32.mrb[26].mxu0 }
 0x1ac   :  { %v1351_v1 = vpop.f32.mrb[27].mxu0  ;;  %v3527_v55 = vmul.f32 -1.442695, %v1476_v52  ;;  %v463_v12 = vadd.f32 %v4967_v6, %v4863_v8 }
 0x1ad   :  { %v3528_v46 = vmul.f32 -1.442695, %v1477_v58 }
 0x1af   :  { %3676 = vpow2.f32 %v3528_v46 }
 0x1b0   :  { %3678 = vpow2.f32 %v3527_v55 }
 0x1b9   :  { %v3677_v57 = vpop.eup %3676 }
 0x1ba   :  { %v3679_v27 = vpop.eup %3678  ;;  %v1493_v45 = vadd.f32 1.0, %v3677_v57  ;;  %v465_v57 = vadd.f32 %v4972_v49, %v4867_v4 }
 0x1bb   :  { %v1487_v44 = vadd.f32 1.0, %v3679_v27 }
 0x1bc   :  { %3680 = vrcp.f32 %v1493_v45 }
 0x1bd   :  { %3682 = vrcp.f32 %v1487_v44 }
 0x1c6   :  { %v3681_v52 = vpop.eup %3680 }
 0x1c7   :  { %v3683_v1 = vpop.eup %3682  ;;  %v1503_v43 = vmul.f32 0.0, %v3681_v52 }
 0x1c9   :  { %v1387_v37 = vpop.f32.mrb[40].mxu1 }
 0x1ca   :  { %v1478_v63 = vadd.f32 %v1387_v37, %v356_v9  ;;  %v1389_v50 = vpop.f32.mrb[41].mxu1 }
 0x1cb   :  { %v1479_v56 = vadd.f32 %v1389_v50, %v358_v24  ;;  %v1391_v58 = vpop.f32.mrb[42].mxu1 }
 0x1cc   :  { %3684 = vtanh.f32 %v1478_v63  ;;  %v1392_v46 = vpop.f32.mrb[43].mxu1  ;;  %v3936_v58 = vld [vmem:[#allocation5] sm:$0xff] }
 0x1cd   :  { %v3529_v55 = vmul.f32 -1.442695, %v1479_v56  ;;  %vm1547_vm5 = vcmp.gt.s32.totalorder %v3936_v58, 6  ;;  %vm1546_vm6 = vcmp.gt.s32.totalorder %v3936_v58, 1  ;;  %vm1784_vm7 = vcmp.gt.s32.totalorder %v3936_v58, 2 }
 0x1ce   :  { %v1777_v46 = vsel %vm1547_vm5, 1, %v6619_v22  ;;  %v1984_v8 = vsel %vm1784_vm7, 1, %v6619_v22  ;;  %vm2022_vm8 = vcmp.gt.s32.totalorder %v3936_v58, 3 }
 0x1cf   :  { %3686 = vpow2.f32 %v3529_v55  ;;  %1779 = vperm.xlu1 %3655, %v1777_v46   ;;  %v1746_v55 = vsel %vm1546_vm6, 1, %v6619_v22  ;;  %v2222_v6 = vsel %vm2022_vm8, 1, %v6619_v22 }
 0x1d3   :  { %1748 = vperm.xlu1 %3655, %v1746_v55  }
 0x1d6   :  { %v3685_v27 = vpop.eup %3684 }
 0x1d7   :  { %v1504_v41 = vmul.f32 %v3685_v27, %v3683_v1  ;;  %1986 = vperm.xlu1 %3655, %v1984_v8  }
 0x1d9   :  { %v3687_v23 = vpop.eup %3686  ;;  %v5037_v39 = vadd.f32 %v1504_v41, %v1503_v43  ;;  %v536_v41 = vadd.f32 %v5025_v7, %v4978_v53 }
 0x1da   :  { %v1500_v54 = vadd.f32 1.0, %v3687_v23  ;;  %v538_v23 = vadd.f32 %v5027_v14, %v4981_v5  ;;  %v5057_v14 = vpop.permute.xlu0 %1541 }
 0x1db   :  { %3688 = vtanh.f32 %v5037_v39  ;;  %2224 = vperm.xlu1 %3655, %v2222_v6   ;;  %6718 = vst [vmem:[#allocation204_spill] sm:$0xff] %v5057_v14  ;;  %vm1543_vm9 = vcmp.eq.s32.totalorder %v5057_v14, 1  ;;  %v6767_v6 = vld [vmem:[#allocation28_spill] sm:$0xff]  ;;  %v6847_v14 = vld [vmem:[#allocation145_spill] sm:$0xff] }
 0x1dc   :  { %3690 = vrcp.f32 %v1500_v54  ;;  %vm3533_vm11 = vmpackc.low %vm1543_vm9, %vm1543_vm9 }
 0x1de   :  { %v5059_v55 = vpop.permute.xlu0 %1510 }
 0x1df   :  { %6719 = vst [vmem:[#allocation205_spill] sm:$0xff] %v5059_v55  ;;  %vm1512_vm10 = vcmp.eq.s32.totalorder %v5059_v55, 1 }
 0x1e0   :  { %vm5077_vm12 = vmpackc.low %vm1512_vm10, %vm1512_vm10 }
 0x1e5   :  { %v3689_v45 = vpop.eup %3688 }
 0x1e6   :  { %v3691_v44 = vpop.eup %3690 }
 0x1e7   :  { %v5040_v61 = vmul.f32 %v3691_v44, %v3689_v45 }
 0x1e9   :  { %v1428_v9 = vpop.f32.mrb[28].mxu0 }
 0x1ea   :  { %v1480_v24 = vadd.f32 %v1428_v9, %v463_v12  ;;  %v1430_v37 = vpop.f32.mrb[29].mxu0 }
 0x1eb   :  { %v1481_v63 = vadd.f32 %v1430_v37, %v465_v57  ;;  %v1432_v50 = vpop.f32.mrb[30].mxu0 }
 0x1ec   :  { %v1433_v56 = vpop.f32.mrb[31].mxu0  ;;  %v3530_v4 = vmul.f32 -1.442695, %v1480_v24 }
 0x1ed   :  { %v3531_v49 = vmul.f32 -1.442695, %v1481_v63 }
 0x1ef   :  { %3692 = vpow2.f32 %v3531_v49 }
 0x1f0   :  { %3694 = vpow2.f32 %v3530_v4  ;;  %v5069_v4 = vpack.c.bf16 %v5040_v61, %v5040_v61 }
 0x1f9   :  { %v3693_v52 = vpop.eup %3692 }
 0x1fa   :  { %v3695_v1 = vpop.eup %3694  ;;  %v1524_v27 = vadd.f32 1.0, %v3693_v52  ;;  %v6722_v52 = vld [vmem:[#allocation71_spill] sm:$0xff] }
 0x1fb   :  { %v1518_v43 = vadd.f32 1.0, %v3695_v1  ;;  %v6723_v1 = vld [vmem:[#allocation103_spill] sm:$0xff] }
 0x1fc   :  { %3696 = vrcp.f32 %v1524_v27  ;;  %v6724_v27 = vld [vmem:[#allocation73_spill] sm:$0xff] }
 0x1fd   :  { %3698 = vrcp.f32 %v1518_v43  ;;  %v6725_v43 = vld [vmem:[#allocation105_spill] sm:$0xff] }
 0x206   :  { %v3697_v24 = vpop.eup %3696 }
 0x207   :  { %v3699_v37 = vpop.eup %3698  ;;  %v1534_v50 = vmul.f32 0.0, %v3697_v24  ;;  %v6735_v24 = vld [vmem:[#allocation115_spill] sm:$0xff] }
 0x209   :  { %v1469_v54 = vpop.f32.mrb[44].mxu1 }
 0x20a   :  { %v1482_v45 = vadd.f32 %v1469_v54, %v536_v41  ;;  %v1471_v44 = vpop.f32.mrb[45].mxu1  ;;  %v6726_v41 = vld [vmem:[#allocation75_spill] sm:$0xff]  ;;  %v6728_v54 = vld [vmem:[#allocation77_spill] sm:$0xff] }
 0x20b   :  { %v1483_v12 = vadd.f32 %v1471_v44, %v538_v23  ;;  %v1473_v22 = vpop.f32.mrb[46].mxu1  ;;  %v6727_v23 = vld [vmem:[#allocation107_spill] sm:$0xff] }
 0x20c   :  { %3700 = vtanh.f32 %v1482_v45  ;;  %v1474_v57 = vpop.f32.mrb[47].mxu1  ;;  %v6729_v45 = vld [vmem:[#allocation109_spill] sm:$0xff]  ;;  %v6730_v44 = vld [vmem:[#allocation79_spill] sm:$0xff] }
 0x20d   :  { %v3532_v9 = vmul.f32 -1.442695, %v1483_v12  ;;  %v6731_v12 = vld [vmem:[#allocation111_spill] sm:$0xff]  ;;  %v6732_v22 = vld [vmem:[#allocation81_spill] sm:$0xff] }
 0x20e   :  { %v6733_v57 = vld [vmem:[#allocation113_spill] sm:$0xff] }
 0x20f   :  { %3702 = vpow2.f32 %v3532_v9  ;;  %v6734_v9 = vld [vmem:[#allocation83_spill] sm:$0xff] }
 0x216   :  { %v3701_v63 = vpop.eup %3700 }
 0x217   :  { %v1535_v56 = vmul.f32 %v3701_v63, %v3699_v37  ;;  %v6736_v37 = vld [vmem:[#allocation85_spill] sm:$0xff] }
 0x218   :  { %v6737_v63 = vld [vmem:[#allocation117_spill] sm:$0xff] }
 0x219   :  { %v3703_v53 = vpop.eup %3702  ;;  %v5054_v7 = vadd.f32 %v1535_v56, %v1534_v50  ;;  %v6738_v50 = vld [vmem:[#allocation87_spill] sm:$0xff]  ;;  %v6739_v56 = vld [vmem:[#allocation89_spill] sm:$0xff] }
 0x21a   :  { %v1531_v5 = vadd.f32 1.0, %v3703_v53  ;;  %v6740_v53 = vld [vmem:[#allocation121_spill] sm:$0xff] }
 0x21b   :  { %3704 = vtanh.f32 %v5054_v7 }
 0x21c   :  { %3706 = vrcp.f32 %v1531_v5  ;;  %v6741_v5 = vld [vmem:[#allocation91_spill] sm:$0xff] }
 0x225   :  { %v3705_v58 = vpop.eup %3704 }
 0x226   :  { %v3707_v46 = vpop.eup %3706 }
 0x227   :  { %v5061_v8 = vmul.f32 %v3707_v46, %v3705_v58  ;;  %v6742_v58 = vld [vmem:[#allocation93_spill] sm:$0xff] }
 0x228   :  { %v6743_v46 = vld [vmem:[#allocation125_spill] sm:$0xff] }
 0x229   :  { %v3534_v49 = vpack.c.bf16 %v5061_v8, %v5061_v8 }
 0x22b   :  { %3535 = vmatprep.mubr.msk.bf16.mxu0 %vm3533_vm11, %v3534_v49  ;;  %3541 = vmatprep.mubr.msk.bf16.mxu1 %vm3533_vm11, %v3534_v49 }
 0x22c   :  { %3538 = vmatmul.mubr.msk.bf16.vlgmr.msra.gmra.mrb[32].mxu0 %vm5077_vm12, %v5069_v4  ;;  %3544 = vmatmul.mubr.msk.bf16.vlgmr.msra.gmra.mrb[48].mxu1 %vm5077_vm12, %v5069_v4 }
 0x22d   :  { %1633 = vmatpush1.bf16.msra.mxu0 %v6722_v52  ;;  %1674 = vmatpush1.bf16.msra.mxu1 %v6723_v1 }
 0x22e   :  { %3547 = vmatprep.mubr.msk.bf16.mxu0 %vm3533_vm11, %v3534_v49  ;;  %3553 = vmatprep.mubr.msk.bf16.mxu1 %vm3533_vm11, %v3534_v49  ;;  %v6744_v49 = vld [vmem:[#allocation95_spill] sm:$0xff] }
 0x22f   :  { %1634 = vmatprep.subr.bf16.mxu0 %v6724_v27  ;;  %1675 = vmatprep.subr.bf16.mxu1 %v6725_v43 }
 0x231   :  { %1635 = vmatpush1.bf16.msra.mxu0 %v6726_v41  ;;  %1676 = vmatpush1.bf16.msra.mxu1 %v6727_v23 }
 0x232   :  { %1636 = vmatprep.subr.bf16.mxu0 %v6728_v54  ;;  %1677 = vmatprep.subr.bf16.mxu1 %v6729_v45 }
 0x235   :  { %1637 = vmatpush1.bf16.msra.mxu0 %v6730_v44  ;;  %1678 = vmatpush1.bf16.msra.mxu1 %v6731_v12 }
 0x236   :  { %1638 = vmatprep.subr.bf16.mxu0 %v6732_v22  ;;  %1679 = vmatprep.subr.bf16.mxu1 %v6733_v57 }
 0x239   :  { %1639 = vmatpush1.bf16.msra.mxu0 %v6734_v9  ;;  %1680 = vmatpush1.bf16.msra.mxu1 %v6735_v24 }
 0x23a   :  { %1640 = vmatprep.subr.bf16.mxu0 %v6736_v37  ;;  %1681 = vmatprep.subr.bf16.mxu1 %v6737_v63  ;;  %v6745_v63 = vld [vmem:[#allocation97_spill] sm:$0xff] }
 0x23d   :  { %1641 = vmatpush1.bf16.msra.mxu0 %v6738_v50  ;;  %1682 = vmatpush1.bf16.msra.mxu1 %v4646_v62  ;;  %v6746_v62 = vld [vmem:[#allocation99_spill] sm:$0xff] }
 0x23e   :  { %1642 = vmatprep.subr.bf16.mxu0 %v6739_v56  ;;  %1683 = vmatprep.subr.bf16.mxu1 %v6740_v53  ;;  %v6747_v53 = vld [vmem:[#allocation100_spill] sm:$0xff] }
 0x241   :  { %1643 = vmatpush1.bf16.msra.mxu0 %v6741_v5  ;;  %1684 = vmatpush1.bf16.msra.mxu1 %v4658_v26  ;;  %v6748_v26 = vld [vmem:[#allocation102_spill] sm:$0xff] }
 0x242   :  { %1644 = vmatprep.subr.bf16.mxu0 %v6742_v58  ;;  %1685 = vmatprep.subr.bf16.mxu1 %v6743_v46  ;;  %v6749_v46 = vld [vmem:[#allocation104_spill] sm:$0xff] }
 0x245   :  { %1645 = vmatpush1.bf16.msra.mxu0 %v6744_v49  ;;  %1686 = vmatpush1.bf16.msra.mxu1 %v4670_v51  ;;  %v6750_v51 = vld [vmem:[#allocation106_spill] sm:$0xff] }
 0x246   :  { %1646 = vmatprep.subr.bf16.mxu0 %v6745_v63  ;;  %1687 = vmatprep.subr.bf16.mxu1 %v4676_v60  ;;  %v6751_v60 = vld [vmem:[#allocation108_spill] sm:$0xff] }
 0x249   :  { %1647 = vmatpush1.bf16.msra.mxu0 %v6746_v62  ;;  %1688 = vmatpush1.bf16.msra.mxu1 %v4684_v15  ;;  %v6752_v15 = vld [vmem:[#allocation110_spill] sm:$0xff] }
 0x24a   :  { %1648 = vmatprep.subr.bf16.mxu0 %v6747_v53  ;;  %1689 = vmatprep.subr.bf16.mxu1 %v4689_v19  ;;  %v6753_v19 = vld [vmem:[#allocation112_spill] sm:$0xff] }
 0x24d   :  { %1649 = vmatpush1.bf16.msra.mxu0 %v6748_v26  ;;  %1690 = vmatpush1.bf16.msra.mxu1 %v4694_v35  ;;  %v6754_v35 = vld [vmem:[#allocation114_spill] sm:$0xff] }
 0x24e   :  { %1650 = vmatprep.subr.bf16.mxu0 %v6749_v46  ;;  %1691 = vmatprep.subr.bf16.mxu1 %v4697_v11  ;;  %v6755_v11 = vld [vmem:[#allocation116_spill] sm:$0xff] }
 0x251   :  { %1651 = vmatpush1.bf16.msra.mxu0 %v6750_v51  ;;  %1692 = vmatpush1.bf16.msra.mxu1 %v4702_v48  ;;  %v6756_v48 = vld [vmem:[#allocation118_spill] sm:$0xff] }
 0x252   :  { %1652 = vmatprep.subr.bf16.mxu0 %v6751_v60  ;;  %1693 = vmatprep.subr.bf16.mxu1 %v4706_v0  ;;  %v6757_v0 = vld [vmem:[#allocation120_spill] sm:$0xff] }
 0x255   :  { %1653 = vmatpush1.bf16.msra.mxu0 %v6752_v15  ;;  %1694 = vmatpush1.bf16.msra.mxu1 %v4710_v18  ;;  %v6758_v18 = vld [vmem:[#allocation122_spill] sm:$0xff] }
 0x256   :  { %1654 = vmatprep.subr.bf16.mxu0 %v6753_v19  ;;  %1695 = vmatprep.subr.bf16.mxu1 %v4714_v20  ;;  %v6759_v20 = vld [vmem:[#allocation124_spill] sm:$0xff] }
 0x259   :  { %1655 = vmatpush1.bf16.msra.mxu0 %v6754_v35  ;;  %1696 = vmatpush1.bf16.msra.mxu1 %v4718_v28 }
 0x25a   :  { %1656 = vmatprep.subr.bf16.mxu0 %v6755_v11  ;;  %1697 = vmatprep.subr.bf16.mxu1 %v4722_v36 }
 0x25d   :  { %1657 = vmatpush1.bf16.msra.mxu0 %v6756_v48  ;;  %1698 = vmatpush1.bf16.msra.mxu1 %v4726_v29 }
 0x25e   :  { %1658 = vmatprep.subr.bf16.mxu0 %v6757_v0  ;;  %1699 = vmatprep.subr.bf16.mxu1 %v4730_v3  ;;  %v6760_v3 = vld [vmem:[#allocation20_spill] sm:$0xff] }
 0x261   :  { %1659 = vmatpush1.bf16.msra.mxu0 %v6758_v18  ;;  %1700 = vmatpush1.bf16.msra.mxu1 %v4734_v34 }
 0x262   :  { %1660 = vmatprep.subr.bf16.mxu0 %v6759_v20  ;;  %1701 = vmatprep.subr.bf16.mxu1 %v4738_v31 }
 0x265   :  { %1661 = vmatpush1.bf16.msra.mxu0 %v4668_v59  ;;  %1702 = vmatpush1.bf16.msra.mxu1 %v4742_v38  ;;  %v6761_v38 = vld [vmem:[#allocation21_spill] sm:$0xff] }
 0x266   :  { %1662 = vmatprep.subr.bf16.mxu0 %v4674_v21  ;;  %1703 = vmatprep.subr.bf16.mxu1 %v4746_v33  ;;  %v6762_v33 = vld [vmem:[#allocation22_spill] sm:$0xff] }
 0x269   :  { %1663 = vmatpush1.bf16.msra.mxu0 %v4682_v17  ;;  %1704 = vmatpush1.bf16.msra.mxu1 %v4750_v47  ;;  %v6763_v47 = vld [vmem:[#allocation24_spill] sm:$0xff]  ;;  %v6820_v17 = vld [vmem:[#allocation166_spill] sm:$0xff] }
 0x26a   :  { %1788 = vmatprep.subr.bf16.mxu0 %v6760_v3  ;;  %1829 = vmatprep.subr.bf16.mxu1 %v4311_v32  ;;  %v6764_v32 = vld [vmem:[#allocation25_spill] sm:$0xff]  ;;  %v6765_v3 = vld [vmem:[#allocation26_spill] sm:$0xff] }
 0x26c   :  { %3550 = vmatmul.mubr.msk.bf16.vlgmr.msra.gmra.mrb[36].mxu0 %vm5077_vm12, %v5069_v4  ;;  %3556 = vmatmul.mubr.msk.bf16.vlgmr.msra.gmra.mrb[52].mxu1 %vm5077_vm12, %v5069_v4  ;;  %v6766_v4 = vld [vmem:[#allocation27_spill] sm:$0xff] }
 0x26d   :  { %1789 = vmatpush1.bf16.msra.mxu0 %v6761_v38  ;;  %1830 = vmatpush1.bf16.msra.mxu1 %v4385_v2  ;;  %v6819_v38 = vld [vmem:[#allocation153_spill] sm:$0xff] }
 0x26e   :  { %1790 = vmatprep.subr.bf16.mxu0 %v6762_v33  ;;  %1831 = vmatprep.subr.bf16.mxu1 %v4390_v10  ;;  %v6817_v10 = vld [vmem:[#allocation151_spill] sm:$0xff]  ;;  %v6818_v33 = vld [vmem:[#allocation164_spill] sm:$0xff] }
 0x271   :  { %1791 = vmatpush1.bf16.msra.mxu0 %v6763_v47  ;;  %1832 = vmatpush1.bf16.msra.mxu1 %v4400_v13  ;;  %v6768_v47 = vld [vmem:[#allocation53_spill] sm:$0xff]  ;;  %v6769_v13 = vld [vmem:[#allocation30_spill] sm:$0xff] }
 0x272   :  { %1792 = vmatprep.subr.bf16.mxu0 %v6764_v32  ;;  %1833 = vmatprep.subr.bf16.mxu1 %v4408_v16  ;;  %v6770_v32 = vld [vmem:[#allocation55_spill] sm:$0xff] }
 0x273   :  { %v6771_v16 = vld [vmem:[#allocation31_spill] sm:$0xff] }
 0x275   :  { %1793 = vmatpush1.bf16.msra.mxu0 %v6765_v3  ;;  %1834 = vmatpush1.bf16.msra.mxu1 %v4417_v25  ;;  %v6772_v3 = vld [vmem:[#allocation57_spill] sm:$0xff]  ;;  %v6773_v25 = vld [vmem:[#allocation32_spill] sm:$0xff] }
 0x276   :  { %1794 = vmatprep.subr.bf16.mxu0 %v6766_v4  ;;  %1835 = vmatprep.subr.bf16.mxu1 %v4423_v30  ;;  %v6774_v4 = vld [vmem:[#allocation59_spill] sm:$0xff]  ;;  %v6775_v30 = vld [vmem:[#allocation33_spill] sm:$0xff] }
 0x279   :  { %1795 = vmatpush1.bf16.msra.mxu0 %v6767_v6  ;;  %1836 = vmatpush1.bf16.msra.mxu1 %v4431_v40  ;;  %v6776_v6 = vld [vmem:[#allocation61_spill] sm:$0xff]  ;;  %v6777_v40 = vld [vmem:[#allocation34_spill] sm:$0xff] }
 0x27a   :  { %1796 = vmatprep.subr.bf16.mxu0 %v4341_v42  ;;  %1837 = vmatprep.subr.bf16.mxu1 %v6768_v47  ;;  %v6778_v42 = vld [vmem:[#allocation63_spill] sm:$0xff] }
 0x27b   :  { %v6779_v47 = vld [vmem:[#allocation35_spill] sm:$0xff] }
 0x27d   :  { %1797 = vmatpush1.bf16.msra.mxu0 %v6769_v13  ;;  %1838 = vmatpush1.bf16.msra.mxu1 %v6770_v32  ;;  %v6780_v13 = vld [vmem:[#allocation65_spill] sm:$0xff]  ;;  %v6781_v32 = vld [vmem:[#allocation36_spill] sm:$0xff] }
 0x27e   :  { %1798 = vmatprep.subr.bf16.mxu0 %v6771_v16  ;;  %1839 = vmatprep.subr.bf16.mxu1 %v6772_v3  ;;  %v6782_v16 = vld [vmem:[#allocation67_spill] sm:$0xff]  ;;  %v6783_v3 = vld [vmem:[#allocation37_spill] sm:$0xff] }
 0x281   :  { %1799 = vmatpush1.bf16.msra.mxu0 %v6773_v25  ;;  %1840 = vmatpush1.bf16.msra.mxu1 %v6774_v4  ;;  %v6784_v25 = vld [vmem:[#allocation68_spill] sm:$0xff]  ;;  %v6785_v4 = vld [vmem:[#allocation38_spill] sm:$0xff] }
 0x282   :  { %1800 = vmatprep.subr.bf16.mxu0 %v6775_v30  ;;  %1841 = vmatprep.subr.bf16.mxu1 %v6776_v6  ;;  %v6786_v30 = vld [vmem:[#allocation70_spill] sm:$0xff]  ;;  %v6787_v6 = vld [vmem:[#allocation40_spill] sm:$0xff] }
 0x285   :  { %1801 = vmatpush1.bf16.msra.mxu0 %v6777_v40  ;;  %1842 = vmatpush1.bf16.msra.mxu1 %v6778_v42  ;;  %v6788_v40 = vld [vmem:[#allocation72_spill] sm:$0xff]  ;;  %v6789_v42 = vld [vmem:[#allocation42_spill] sm:$0xff] }
 0x286   :  { %1802 = vmatprep.subr.bf16.mxu0 %v6779_v47  ;;  %1843 = vmatprep.subr.bf16.mxu1 %v6780_v13  ;;  %v6790_v47 = vld [vmem:[#allocation74_spill] sm:$0xff]  ;;  %v6791_v13 = vld [vmem:[#allocation44_spill] sm:$0xff] }
 0x289   :  { %1803 = vmatpush1.bf16.msra.mxu0 %v6781_v32  ;;  %1844 = vmatpush1.bf16.msra.mxu1 %v6782_v16  ;;  %v6792_v32 = vld [vmem:[#allocation76_spill] sm:$0xff]  ;;  %v6793_v16 = vld [vmem:[#allocation46_spill] sm:$0xff] }
 0x28a   :  { %1804 = vmatprep.subr.bf16.mxu0 %v6783_v3  ;;  %1845 = vmatprep.subr.bf16.mxu1 %v6784_v25  ;;  %v6794_v3 = vld [vmem:[#allocation78_spill] sm:$0xff]  ;;  %v6795_v25 = vld [vmem:[#allocation48_spill] sm:$0xff] }
 0x28d   :  { %1805 = vmatpush1.bf16.msra.mxu0 %v6785_v4  ;;  %1846 = vmatpush1.bf16.msra.mxu1 %v6786_v30  ;;  %v6796_v4 = vld [vmem:[#allocation80_spill] sm:$0xff]  ;;  %v6797_v30 = vld [vmem:[#allocation50_spill] sm:$0xff] }
 0x28e   :  { %1806 = vmatprep.subr.bf16.mxu0 %v6787_v6  ;;  %1847 = vmatprep.subr.bf16.mxu1 %v6788_v40  ;;  %v6798_v6 = vld [vmem:[#allocation82_spill] sm:$0xff]  ;;  %v6799_v40 = vld [vmem:[#allocation52_spill] sm:$0xff] }
 0x291   :  { %1807 = vmatpush1.bf16.msra.mxu0 %v6789_v42  ;;  %1848 = vmatpush1.bf16.msra.mxu1 %v6790_v47  ;;  %v6800_v42 = vld [vmem:[#allocation84_spill] sm:$0xff]  ;;  %v6801_v47 = vld [vmem:[#allocation54_spill] sm:$0xff] }
 0x292   :  { %1808 = vmatprep.subr.bf16.mxu0 %v6791_v13  ;;  %1849 = vmatprep.subr.bf16.mxu1 %v6792_v32  ;;  %v6802_v13 = vld [vmem:[#allocation86_spill] sm:$0xff]  ;;  %v6803_v32 = vld [vmem:[#allocation56_spill] sm:$0xff] }
 0x295   :  { %1809 = vmatpush1.bf16.msra.mxu0 %v6793_v16  ;;  %1850 = vmatpush1.bf16.msra.mxu1 %v6794_v3  ;;  %v6804_v16 = vld [vmem:[#allocation88_spill] sm:$0xff]  ;;  %v6805_v3 = vld [vmem:[#allocation58_spill] sm:$0xff] }
 0x296   :  { %1810 = vmatprep.subr.bf16.mxu0 %v6795_v25  ;;  %1851 = vmatprep.subr.bf16.mxu1 %v6796_v4  ;;  %v6806_v25 = vld [vmem:[#allocation90_spill] sm:$0xff]  ;;  %v6807_v4 = vld [vmem:[#allocation60_spill] sm:$0xff] }
 0x299   :  { %1811 = vmatpush1.bf16.msra.mxu0 %v6797_v30  ;;  %1852 = vmatpush1.bf16.msra.mxu1 %v6798_v6  ;;  %v6808_v30 = vld [vmem:[#allocation92_spill] sm:$0xff]  ;;  %v6809_v6 = vld [vmem:[#allocation62_spill] sm:$0xff] }
 0x29a   :  { %1812 = vmatprep.subr.bf16.mxu0 %v6799_v40  ;;  %1853 = vmatprep.subr.bf16.mxu1 %v6800_v42  ;;  %v6810_v40 = vld [vmem:[#allocation94_spill] sm:$0xff]  ;;  %v6811_v42 = vld [vmem:[#allocation64_spill] sm:$0xff] }
 0x29d   :  { %1813 = vmatpush1.bf16.msra.mxu0 %v6801_v47  ;;  %1854 = vmatpush1.bf16.msra.mxu1 %v6802_v13  ;;  %v6812_v47 = vld [vmem:[#allocation96_spill] sm:$0xff]  ;;  %v6813_v13 = vld [vmem:[#allocation66_spill] sm:$0xff] }
 0x29e   :  { %1814 = vmatprep.subr.bf16.mxu0 %v6803_v32  ;;  %1855 = vmatprep.subr.bf16.mxu1 %v6804_v16  ;;  %v6814_v32 = vld [vmem:[#allocation98_spill] sm:$0xff]  ;;  %v6815_v16 = vld [vmem:[#allocation69_spill] sm:$0xff] }
 0x2a1   :  { %1815 = vmatpush1.bf16.msra.mxu0 %v6805_v3  ;;  %1856 = vmatpush1.bf16.msra.mxu1 %v6806_v25  ;;  %v6816_v3 = vld [vmem:[#allocation101_spill] sm:$0xff] }
 0x2a2   :  { %1816 = vmatprep.subr.bf16.mxu0 %v6807_v4  ;;  %1857 = vmatprep.subr.bf16.mxu1 %v6808_v30 }
 0x2a5   :  { %1817 = vmatpush1.bf16.msra.mxu0 %v6809_v6  ;;  %1858 = vmatpush1.bf16.msra.mxu1 %v6810_v40 }
 0x2a6   :  { %1818 = vmatprep.subr.bf16.mxu0 %v6811_v42  ;;  %1859 = vmatprep.subr.bf16.mxu1 %v6812_v47 }
 0x2a9   :  { %1819 = vmatpush1.bf16.msra.mxu0 %v6813_v13  ;;  %1860 = vmatpush1.bf16.msra.mxu1 %v6814_v32 }
 0x2aa   :  { %1870 = vmatprep.subr.bf16.mxu0 %v6815_v16  ;;  %1911 = vmatprep.subr.bf16.mxu1 %v6816_v3 }
 0x2ff   :  { %v1584_v25 = vpop.f32.mrb[32].mxu0  ;;  %v1625_v4 = vpop.f32.mrb[48].mxu1 }
 0x300   :  { %v1714_v30 = vadd.f32 %v1584_v25, %v6817_v10  ;;  %v1716_v6 = vadd.f32 %v1625_v4, %v6818_v33  ;;  %v1586_v2 = vpop.f32.mrb[33].mxu0  ;;  %v1627_v40 = vpop.f32.mrb[49].mxu1  ;;  %v1513_v33 = vsel %vm1512_vm10, %v5040_v61, 0.0 }
 0x301   :  { %v1715_v42 = vadd.f32 %v1586_v2, %v6819_v38  ;;  %v1717_v47 = vadd.f32 %v1627_v40, %v6820_v17  ;;  %v1588_v21 = vpop.f32.mrb[34].mxu0  ;;  %v1629_v13 = vpop.f32.mrb[50].mxu1 }
 0x302   :  { %v3557_v59 = vmul.f32 -1.442695, %v1714_v30  ;;  %v1589_v32 = vpop.f32.mrb[35].mxu0  ;;  %v1630_v31 = vpop.f32.mrb[51].mxu1 }
 0x303   :  { %v3558_v16 = vmul.f32 -1.442695, %v1715_v42  ;;  %v3559_v3 = vmul.f32 -1.442695, %v1717_v47  ;;  %v5225_v38 = vpop.permute.xlu1 %1779  ;;  %v1514_v42 = vsel %vm1512_vm10, %v5037_v39, 0.0 }
 0x304   :  { %3708 = vpow2.f32 %v3557_v59  ;;  %6821 = vst [vmem:[#allocation71_spill] sm:$0xff] %v5225_v38  ;;  %vm1781_vm14 = vcmp.eq.s32.totalorder %v5225_v38, 1  ;;  %v6848_v38 = vld [vmem:[#allocation128_spill] sm:$0xff] }
 0x305   :  { %3710 = vpow2.f32 %v3558_v16 }
 0x306   :  { %3712 = vpow2.f32 %v3559_v3 }
 0x307   :  { %3714 = vtanh.f32 %v1716_v6  ;;  %v5227_v30 = vpop.permute.xlu1 %1748  ;;  %v6823_v6 = vld [vmem:[#allocation185_spill] sm:$0xff] }
 0x308   :  { %6822 = vst [vmem:[#allocation103_spill] sm:$0xff] %v5227_v30  ;;  %vm1750_vm13 = vcmp.eq.s32.totalorder %v5227_v30, 1 }
 0x30e   :  { %v3709_v20 = vpop.eup %3708 }
 0x30f   :  { %v3711_v34 = vpop.eup %3710  ;;  %v1725_v10 = vadd.f32 1.0, %v3709_v20 }
 0x310   :  { %v1731_v25 = vadd.f32 1.0, %v3711_v34  ;;  %v3713_v2 = vpop.eup %3712 }
 0x311   :  { %3716 = vrcp.f32 %v1725_v10  ;;  %v3715_v40 = vpop.eup %3714  ;;  %v1738_v16 = vadd.f32 1.0, %v3713_v2 }
 0x312   :  { %3718 = vrcp.f32 %v1731_v25  ;;  %v6824_v25 = vld [vmem:[#allocation202_spill] sm:$0xff] }
 0x313   :  { %3720 = vrcp.f32 %v1738_v16  ;;  %v6826_v16 = vld [vmem:[#allocation203_spill] sm:$0xff] }
 0x31b   :  { %v3717_v13 = vpop.eup %3716 }
 0x31c   :  { %v3719_v32 = vpop.eup %3718  ;;  %v1742_v59 = vmul.f32 %v3717_v13, %v3715_v40 }
 0x31d   :  { %v1741_v21 = vmul.f32 %v3719_v32, %v1514_v42  ;;  %v3721_v20 = vpop.eup %3720  ;;  %v6825_v32 = vld [vmem:[#allocation187_spill] sm:$0xff] }
 0x31f   :  { %v1743_v34 = vadd.f32 %v1742_v59, %v1741_v21 }
 0x321   :  { %3722 = vtanh.f32 %v1743_v34  ;;  %v5235_v17 = vsel %vm1750_vm13, %v1743_v34, %v1514_v42 }
 0x32b   :  { %v3723_v3 = vpop.eup %3722 }
 0x32c   :  { %v1745_v31 = vmul.f32 %v3723_v3, %v3721_v20 }
 0x32e   :  { %v5242_v47 = vsel %vm1750_vm13, %v1745_v31, %v1513_v33 }
 0x33f   :  { %v1666_v39 = vpop.f32.mrb[36].mxu0  ;;  %v1707_v4 = vpop.f32.mrb[52].mxu1 }
 0x340   :  { %v1718_v10 = vadd.f32 %v1666_v39, %v6823_v6  ;;  %v1720_v2 = vadd.f32 %v1707_v4, %v6824_v25  ;;  %v1668_v40 = vpop.f32.mrb[37].mxu0  ;;  %v1709_v13 = vpop.f32.mrb[53].mxu1 }
 0x341   :  { %v1719_v42 = vadd.f32 %v1668_v40, %v6825_v32  ;;  %v1721_v59 = vadd.f32 %v1709_v13, %v6826_v16  ;;  %v1670_v21 = vpop.f32.mrb[38].mxu0  ;;  %v1711_v34 = vpop.f32.mrb[54].mxu1 }
 0x342   :  { %v3560_v20 = vmul.f32 -1.442695, %v1718_v10  ;;  %v1671_v61 = vpop.f32.mrb[39].mxu0  ;;  %v1712_v3 = vpop.f32.mrb[55].mxu1  ;;  %v1545_v10 = vsel %vm1543_vm9, %v5054_v7, 0.0  ;;  %v1544_v34 = vsel %vm1543_vm9, %v5061_v8, 0.0 }
 0x343   :  { %v3561_v55 = vmul.f32 -1.442695, %v1719_v42  ;;  %v3562_v31 = vmul.f32 -1.442695, %v1721_v59  ;;  %v5267_v61 = vpack.c.bf16 %v5242_v47, %v5242_v47  ;;  %v6827_v8 = vld [vmem:[#allocation117_spill] sm:$0xff]  ;;  %v6828_v3 = vld [vmem:[#allocation119_spill] sm:$0xff] }
 0x344   :  { %3724 = vpow2.f32 %v3560_v20 }
 0x345   :  { %3726 = vpow2.f32 %v3561_v55 }
 0x346   :  { %3728 = vpow2.f32 %v3562_v31  ;;  %v6829_v31 = vld [vmem:[#allocation121_spill] sm:$0xff] }
 0x347   :  { %3730 = vtanh.f32 %v1720_v2 }
 0x34e   :  { %v3725_v33 = vpop.eup %3724 }
 0x34f   :  { %v3727_v30 = vpop.eup %3726  ;;  %v1756_v39 = vadd.f32 1.0, %v3725_v33  ;;  %v6830_v33 = vld [vmem:[#allocation123_spill] sm:$0xff] }
 0x350   :  { %v1762_v4 = vadd.f32 1.0, %v3727_v30  ;;  %v3729_v6 = vpop.eup %3728 }
 0x351   :  { %3732 = vrcp.f32 %v1756_v39  ;;  %v3731_v25 = vpop.eup %3730  ;;  %v1769_v42 = vadd.f32 1.0, %v3729_v6  ;;  %v6831_v39 = vld [vmem:[#allocation125_spill] sm:$0xff] }
 0x352   :  { %3734 = vrcp.f32 %v1762_v4  ;;  %v6832_v4 = vld [vmem:[#allocation127_spill] sm:$0xff]  ;;  %v6833_v6 = vld [vmem:[#allocation129_spill] sm:$0xff] }
 0x353   :  { %3736 = vrcp.f32 %v1769_v42  ;;  %v6839_v42 = vld [vmem:[#allocation136_spill] sm:$0xff] }
 0x35b   :  { %v3733_v40 = vpop.eup %3732 }
 0x35c   :  { %v3735_v13 = vpop.eup %3734  ;;  %v1773_v32 = vmul.f32 %v3733_v40, %v3731_v25  ;;  %v6834_v25 = vld [vmem:[#allocation131_spill] sm:$0xff]  ;;  %v6835_v40 = vld [vmem:[#allocation132_spill] sm:$0xff] }
 0x35d   :  { %v1772_v55 = vmul.f32 %v3735_v13, %v1545_v10  ;;  %v3737_v2 = vpop.eup %3736  ;;  %v6836_v13 = vld [vmem:[#allocation133_spill] sm:$0xff] }
 0x35f   :  { %v1774_v16 = vadd.f32 %v1773_v32, %v1772_v55  ;;  %v6838_v32 = vld [vmem:[#allocation135_spill] sm:$0xff]  ;;  %v6840_v55 = vld [vmem:[#allocation137_spill] sm:$0xff] }
 0x361   :  { %3738 = vtanh.f32 %v1774_v16  ;;  %v5254_v30 = vsel %vm1781_vm14, %v1774_v16, %v1545_v10  ;;  %v6837_v10 = vld [vmem:[#allocation134_spill] sm:$0xff] }
 0x362   :  { %v6841_v16 = vld [vmem:[#allocation138_spill] sm:$0xff] }
 0x36b   :  { %v3739_v59 = vpop.eup %3738 }
 0x36c   :  { %v1776_v21 = vmul.f32 %v3739_v59, %v3737_v2  ;;  %v6842_v2 = vld [vmem:[#allocation142_spill] sm:$0xff]  ;;  %v6843_v59 = vld [vmem:[#allocation143_spill] sm:$0xff] }
 0x36e   :  { %v5261_v7 = vsel %vm1781_vm14, %v1776_v21, %v1544_v34  ;;  %v6844_v21 = vld [vmem:[#allocation124_spill] sm:$0xff] }
 0x36f   :  { %v1787_v20 = vpack.c.bf16 %v5261_v7, %v5261_v7  ;;  %v6845_v34 = vld [vmem:[#allocation144_spill] sm:$0xff] }
 0x371   :  { %1820 = vmatprep.mubr.bf16.mxu0 %v1787_v20  ;;  %1861 = vmatprep.mubr.bf16.mxu1 %v1787_v20 }
 0x372   :  { %1821 = vmatmul.mubr.bf16.vlgmr.msra.gmra.mrb[40].mxu0 %v5267_v61  ;;  %1862 = vmatmul.mubr.bf16.vlgmr.msra.gmra.mrb[56].mxu1 %v5267_v61 }
 0x373   :  { %1871 = vmatpush1.bf16.msra.mxu0 %v6722_v52  ;;  %1912 = vmatpush1.bf16.msra.mxu1 %v6723_v1 }
 0x374   :  { %1902 = vmatprep.mubr.bf16.mxu0 %v1787_v20  ;;  %1943 = vmatprep.mubr.bf16.mxu1 %v1787_v20  ;;  %v6846_v20 = vld [vmem:[#allocation126_spill] sm:$0xff] }
 0x375   :  { %1872 = vmatprep.subr.bf16.mxu0 %v6724_v27  ;;  %1913 = vmatprep.subr.bf16.mxu1 %v6725_v43 }
 0x377   :  { %1873 = vmatpush1.bf16.msra.mxu0 %v6726_v41  ;;  %1914 = vmatpush1.bf16.msra.mxu1 %v6727_v23 }
 0x378   :  { %1874 = vmatprep.subr.bf16.mxu0 %v6728_v54  ;;  %1915 = vmatprep.subr.bf16.mxu1 %v6729_v45 }
 0x37b   :  { %1875 = vmatpush1.bf16.msra.mxu0 %v6730_v44  ;;  %1916 = vmatpush1.bf16.msra.mxu1 %v6731_v12 }
 0x37c   :  { %1876 = vmatprep.subr.bf16.mxu0 %v6732_v22  ;;  %1917 = vmatprep.subr.bf16.mxu1 %v6733_v57 }
 0x37f   :  { %1877 = vmatpush1.bf16.msra.mxu0 %v6734_v9  ;;  %1918 = vmatpush1.bf16.msra.mxu1 %v6735_v24 }
 0x380   :  { %1878 = vmatprep.subr.bf16.mxu0 %v6736_v37  ;;  %1919 = vmatprep.subr.bf16.mxu1 %v6827_v8 }
 0x383   :  { %1879 = vmatpush1.bf16.msra.mxu0 %v6738_v50  ;;  %1920 = vmatpush1.bf16.msra.mxu1 %v6828_v3 }
 0x384   :  { %1880 = vmatprep.subr.bf16.mxu0 %v6739_v56  ;;  %1921 = vmatprep.subr.bf16.mxu1 %v6829_v31 }
 0x387   :  { %1881 = vmatpush1.bf16.msra.mxu0 %v6741_v5  ;;  %1922 = vmatpush1.bf16.msra.mxu1 %v6830_v33 }
 0x388   :  { %1882 = vmatprep.subr.bf16.mxu0 %v6742_v58  ;;  %1923 = vmatprep.subr.bf16.mxu1 %v6831_v39 }
 0x38b   :  { %1883 = vmatpush1.bf16.msra.mxu0 %v6744_v49  ;;  %1924 = vmatpush1.bf16.msra.mxu1 %v6832_v4 }
 0x38c   :  { %1884 = vmatprep.subr.bf16.mxu0 %v6745_v63  ;;  %1925 = vmatprep.subr.bf16.mxu1 %v6833_v6 }
 0x38f   :  { %1885 = vmatpush1.bf16.msra.mxu0 %v6746_v62  ;;  %1926 = vmatpush1.bf16.msra.mxu1 %v6834_v25 }
 0x390   :  { %1886 = vmatprep.subr.bf16.mxu0 %v6747_v53  ;;  %1927 = vmatprep.subr.bf16.mxu1 %v6835_v40 }
 0x393   :  { %1887 = vmatpush1.bf16.msra.mxu0 %v6748_v26  ;;  %1928 = vmatpush1.bf16.msra.mxu1 %v6836_v13 }
 0x394   :  { %1888 = vmatprep.subr.bf16.mxu0 %v6749_v46  ;;  %1929 = vmatprep.subr.bf16.mxu1 %v6837_v10 }
 0x397   :  { %1889 = vmatpush1.bf16.msra.mxu0 %v6750_v51  ;;  %1930 = vmatpush1.bf16.msra.mxu1 %v6838_v32 }
 0x398   :  { %1890 = vmatprep.subr.bf16.mxu0 %v6751_v60  ;;  %1931 = vmatprep.subr.bf16.mxu1 %v6839_v42 }
 0x39b   :  { %1891 = vmatpush1.bf16.msra.mxu0 %v6752_v15  ;;  %1932 = vmatpush1.bf16.msra.mxu1 %v6840_v55 }
 0x39c   :  { %1892 = vmatprep.subr.bf16.mxu0 %v6753_v19  ;;  %1933 = vmatprep.subr.bf16.mxu1 %v6841_v16 }
 0x39f   :  { %1893 = vmatpush1.bf16.msra.mxu0 %v6754_v35  ;;  %1934 = vmatpush1.bf16.msra.mxu1 %v4718_v28  ;;  %v6920_v28 = vld [vmem:[#allocation157_spill] sm:$0xff]  ;;  %v6921_v35 = vld [vmem:[#allocation170_spill] sm:$0xff] }
 0x3a0   :  { %1894 = vmatprep.subr.bf16.mxu0 %v6755_v11  ;;  %1935 = vmatprep.subr.bf16.mxu1 %v4722_v36  ;;  %v6919_v36 = vld [vmem:[#allocation168_spill] sm:$0xff] }
 0x3a3   :  { %1895 = vmatpush1.bf16.msra.mxu0 %v6756_v48  ;;  %1936 = vmatpush1.bf16.msra.mxu1 %v4726_v29  ;;  %v6849_v48 = vld [vmem:[#allocation146_spill] sm:$0xff] }
 0x3a4   :  { %1896 = vmatprep.subr.bf16.mxu0 %v6757_v0  ;;  %1937 = vmatprep.subr.bf16.mxu1 %v6842_v2  ;;  %v6850_v29 = vld [vmem:[#allocation130_spill] sm:$0xff]  ;;  %v6851_v0 = vld [vmem:[#allocation147_spill] sm:$0xff]  ;;  %v6852_v2 = vld [vmem:[#allocation20_spill] sm:$0xff] }
 0x3a7   :  { %1897 = vmatpush1.bf16.msra.mxu0 %v6758_v18  ;;  %1938 = vmatpush1.bf16.msra.mxu1 %v6843_v59  ;;  %v6853_v18 = vld [vmem:[#allocation23_spill] sm:$0xff] }
 0x3a8   :  { %1898 = vmatprep.subr.bf16.mxu0 %v6844_v21  ;;  %1939 = vmatprep.subr.bf16.mxu1 %v6845_v34  ;;  %v6854_v34 = vld [vmem:[#allocation21_spill] sm:$0xff]  ;;  %v6863_v21 = vld [vmem:[#allocation47_spill] sm:$0xff] }
 0x3a9   :  { %v6918_v59 = vld [vmem:[#allocation155_spill] sm:$0xff] }
 0x3ab   :  { %1899 = vmatpush1.bf16.msra.mxu0 %v6846_v20  ;;  %1940 = vmatpush1.bf16.msra.mxu1 %v6847_v14  ;;  %v6855_v20 = vld [vmem:[#allocation39_spill] sm:$0xff]  ;;  %v6856_v14 = vld [vmem:[#allocation22_spill] sm:$0xff] }
 0x3ac   :  { %1900 = vmatprep.subr.bf16.mxu0 %v6848_v38  ;;  %1941 = vmatprep.subr.bf16.mxu1 %v6849_v48  ;;  %v6857_v38 = vld [vmem:[#allocation41_spill] sm:$0xff]  ;;  %v6858_v48 = vld [vmem:[#allocation24_spill] sm:$0xff] }
 0x3af   :  { %1901 = vmatpush1.bf16.msra.mxu0 %v6850_v29  ;;  %1942 = vmatpush1.bf16.msra.mxu1 %v6851_v0  ;;  %v6859_v29 = vld [vmem:[#allocation43_spill] sm:$0xff]  ;;  %v6860_v0 = vld [vmem:[#allocation25_spill] sm:$0xff] }
 0x3b0   :  { %2026 = vmatprep.subr.bf16.mxu0 %v6852_v2  ;;  %2067 = vmatprep.subr.bf16.mxu1 %v6853_v18  ;;  %v6861_v2 = vld [vmem:[#allocation45_spill] sm:$0xff]  ;;  %v6862_v18 = vld [vmem:[#allocation26_spill] sm:$0xff] }
 0x3b2   :  { %1903 = vmatmul.mubr.bf16.vlgmr.msra.gmra.mrb[44].mxu0 %v5267_v61  ;;  %1944 = vmatmul.mubr.bf16.vlgmr.msra.gmra.mrb[60].mxu1 %v5267_v61  ;;  %v6864_v61 = vld [vmem:[#allocation27_spill] sm:$0xff] }
 0x3b3   :  { %2027 = vmatpush1.bf16.msra.mxu0 %v6854_v34  ;;  %2068 = vmatpush1.bf16.msra.mxu1 %v6855_v20  ;;  %v6865_v34 = vld [vmem:[#allocation49_spill] sm:$0xff]  ;;  %v6866_v20 = vld [vmem:[#allocation28_spill] sm:$0xff] }
 0x3b4   :  { %2028 = vmatprep.subr.bf16.mxu0 %v6856_v14  ;;  %2069 = vmatprep.subr.bf16.mxu1 %v6857_v38  ;;  %v6867_v14 = vld [vmem:[#allocation51_spill] sm:$0xff]  ;;  %v6868_v38 = vld [vmem:[#allocation29_spill] sm:$0xff] }
 0x3b7   :  { %2029 = vmatpush1.bf16.msra.mxu0 %v6858_v48  ;;  %2070 = vmatpush1.bf16.msra.mxu1 %v6859_v29  ;;  %v6869_v48 = vld [vmem:[#allocation53_spill] sm:$0xff]  ;;  %v6870_v29 = vld [vmem:[#allocation30_spill] sm:$0xff] }
 0x3b8   :  { %2030 = vmatprep.subr.bf16.mxu0 %v6860_v0  ;;  %2071 = vmatprep.subr.bf16.mxu1 %v6861_v2  ;;  %v6871_v0 = vld [vmem:[#allocation55_spill] sm:$0xff] }
 0x3b9   :  { %v6872_v2 = vld [vmem:[#allocation31_spill] sm:$0xff] }
 0x3bb   :  { %2031 = vmatpush1.bf16.msra.mxu0 %v6862_v18  ;;  %2072 = vmatpush1.bf16.msra.mxu1 %v6863_v21  ;;  %v6873_v18 = vld [vmem:[#allocation57_spill] sm:$0xff]  ;;  %v6874_v21 = vld [vmem:[#allocation32_spill] sm:$0xff] }
 0x3bc   :  { %2032 = vmatprep.subr.bf16.mxu0 %v6864_v61  ;;  %2073 = vmatprep.subr.bf16.mxu1 %v6865_v34  ;;  %v6875_v61 = vld [vmem:[#allocation59_spill] sm:$0xff]  ;;  %v6876_v34 = vld [vmem:[#allocation33_spill] sm:$0xff] }
 0x3bf   :  { %2033 = vmatpush1.bf16.msra.mxu0 %v6866_v20  ;;  %2074 = vmatpush1.bf16.msra.mxu1 %v6867_v14  ;;  %v6877_v20 = vld [vmem:[#allocation61_spill] sm:$0xff]  ;;  %v6878_v14 = vld [vmem:[#allocation34_spill] sm:$0xff] }
 0x3c0   :  { %2034 = vmatprep.subr.bf16.mxu0 %v6868_v38  ;;  %2075 = vmatprep.subr.bf16.mxu1 %v6869_v48  ;;  %v6879_v38 = vld [vmem:[#allocation63_spill] sm:$0xff] }
 0x3c1   :  { %v6880_v48 = vld [vmem:[#allocation35_spill] sm:$0xff] }
 0x3c3   :  { %2035 = vmatpush1.bf16.msra.mxu0 %v6870_v29  ;;  %2076 = vmatpush1.bf16.msra.mxu1 %v6871_v0  ;;  %v6881_v29 = vld [vmem:[#allocation65_spill] sm:$0xff]  ;;  %v6882_v0 = vld [vmem:[#allocation36_spill] sm:$0xff] }
 0x3c4   :  { %2036 = vmatprep.subr.bf16.mxu0 %v6872_v2  ;;  %2077 = vmatprep.subr.bf16.mxu1 %v6873_v18  ;;  %v6883_v2 = vld [vmem:[#allocation67_spill] sm:$0xff]  ;;  %v6884_v18 = vld [vmem:[#allocation37_spill] sm:$0xff] }
 0x3c7   :  { %2037 = vmatpush1.bf16.msra.mxu0 %v6874_v21  ;;  %2078 = vmatpush1.bf16.msra.mxu1 %v6875_v61  ;;  %v6885_v21 = vld [vmem:[#allocation68_spill] sm:$0xff]  ;;  %v6886_v61 = vld [vmem:[#allocation38_spill] sm:$0xff] }
 0x3c8   :  { %2038 = vmatprep.subr.bf16.mxu0 %v6876_v34  ;;  %2079 = vmatprep.subr.bf16.mxu1 %v6877_v20  ;;  %v6887_v34 = vld [vmem:[#allocation70_spill] sm:$0xff]  ;;  %v6888_v20 = vld [vmem:[#allocation40_spill] sm:$0xff] }
 0x3cb   :  { %2039 = vmatpush1.bf16.msra.mxu0 %v6878_v14  ;;  %2080 = vmatpush1.bf16.msra.mxu1 %v6879_v38  ;;  %v6889_v14 = vld [vmem:[#allocation72_spill] sm:$0xff]  ;;  %v6890_v38 = vld [vmem:[#allocation42_spill] sm:$0xff] }
 0x3cc   :  { %2040 = vmatprep.subr.bf16.mxu0 %v6880_v48  ;;  %2081 = vmatprep.subr.bf16.mxu1 %v6881_v29  ;;  %v6891_v48 = vld [vmem:[#allocation74_spill] sm:$0xff]  ;;  %v6892_v29 = vld [vmem:[#allocation44_spill] sm:$0xff] }
 0x3cf   :  { %2041 = vmatpush1.bf16.msra.mxu0 %v6882_v0  ;;  %2082 = vmatpush1.bf16.msra.mxu1 %v6883_v2  ;;  %v6893_v0 = vld [vmem:[#allocation76_spill] sm:$0xff]  ;;  %v6894_v2 = vld [vmem:[#allocation46_spill] sm:$0xff] }
 0x3d0   :  { %2042 = vmatprep.subr.bf16.mxu0 %v6884_v18  ;;  %2083 = vmatprep.subr.bf16.mxu1 %v6885_v21  ;;  %v6895_v18 = vld [vmem:[#allocation78_spill] sm:$0xff]  ;;  %v6896_v21 = vld [vmem:[#allocation48_spill] sm:$0xff] }
 0x3d3   :  { %2043 = vmatpush1.bf16.msra.mxu0 %v6886_v61  ;;  %2084 = vmatpush1.bf16.msra.mxu1 %v6887_v34  ;;  %v6897_v61 = vld [vmem:[#allocation80_spill] sm:$0xff]  ;;  %v6898_v34 = vld [vmem:[#allocation50_spill] sm:$0xff] }
 0x3d4   :  { %2044 = vmatprep.subr.bf16.mxu0 %v6888_v20  ;;  %2085 = vmatprep.subr.bf16.mxu1 %v6889_v14  ;;  %v6899_v20 = vld [vmem:[#allocation82_spill] sm:$0xff]  ;;  %v6900_v14 = vld [vmem:[#allocation52_spill] sm:$0xff] }
 0x3d7   :  { %2045 = vmatpush1.bf16.msra.mxu0 %v6890_v38  ;;  %2086 = vmatpush1.bf16.msra.mxu1 %v6891_v48  ;;  %v6901_v38 = vld [vmem:[#allocation84_spill] sm:$0xff]  ;;  %v6902_v48 = vld [vmem:[#allocation54_spill] sm:$0xff] }
 0x3d8   :  { %2046 = vmatprep.subr.bf16.mxu0 %v6892_v29  ;;  %2087 = vmatprep.subr.bf16.mxu1 %v6893_v0  ;;  %v6903_v29 = vld [vmem:[#allocation86_spill] sm:$0xff]  ;;  %v6904_v0 = vld [vmem:[#allocation56_spill] sm:$0xff] }
 0x3db   :  { %2047 = vmatpush1.bf16.msra.mxu0 %v6894_v2  ;;  %2088 = vmatpush1.bf16.msra.mxu1 %v6895_v18  ;;  %v6905_v2 = vld [vmem:[#allocation88_spill] sm:$0xff]  ;;  %v6906_v18 = vld [vmem:[#allocation58_spill] sm:$0xff] }
 0x3dc   :  { %2048 = vmatprep.subr.bf16.mxu0 %v6896_v21  ;;  %2089 = vmatprep.subr.bf16.mxu1 %v6897_v61  ;;  %v6907_v21 = vld [vmem:[#allocation90_spill] sm:$0xff]  ;;  %v6908_v61 = vld [vmem:[#allocation60_spill] sm:$0xff] }
 0x3df   :  { %2049 = vmatpush1.bf16.msra.mxu0 %v6898_v34  ;;  %2090 = vmatpush1.bf16.msra.mxu1 %v6899_v20  ;;  %v6909_v34 = vld [vmem:[#allocation92_spill] sm:$0xff]  ;;  %v6910_v20 = vld [vmem:[#allocation62_spill] sm:$0xff] }
 0x3e0   :  { %2050 = vmatprep.subr.bf16.mxu0 %v6900_v14  ;;  %2091 = vmatprep.subr.bf16.mxu1 %v6901_v38  ;;  %v6911_v14 = vld [vmem:[#allocation94_spill] sm:$0xff]  ;;  %v6912_v38 = vld [vmem:[#allocation64_spill] sm:$0xff] }
 0x3e3   :  { %2051 = vmatpush1.bf16.msra.mxu0 %v6902_v48  ;;  %2092 = vmatpush1.bf16.msra.mxu1 %v6903_v29  ;;  %v6913_v48 = vld [vmem:[#allocation96_spill] sm:$0xff]  ;;  %v6914_v29 = vld [vmem:[#allocation66_spill] sm:$0xff] }
 0x3e4   :  { %2052 = vmatprep.subr.bf16.mxu0 %v6904_v0  ;;  %2093 = vmatprep.subr.bf16.mxu1 %v6905_v2  ;;  %v6915_v0 = vld [vmem:[#allocation98_spill] sm:$0xff]  ;;  %v6916_v2 = vld [vmem:[#allocation69_spill] sm:$0xff] }
 0x3e7   :  { %2053 = vmatpush1.bf16.msra.mxu0 %v6906_v18  ;;  %2094 = vmatpush1.bf16.msra.mxu1 %v6907_v21  ;;  %v6917_v18 = vld [vmem:[#allocation101_spill] sm:$0xff] }
 0x3e8   :  { %2054 = vmatprep.subr.bf16.mxu0 %v6908_v61  ;;  %2095 = vmatprep.subr.bf16.mxu1 %v6909_v34 }
 0x3eb   :  { %2055 = vmatpush1.bf16.msra.mxu0 %v6910_v20  ;;  %2096 = vmatpush1.bf16.msra.mxu1 %v6911_v14 }
 0x3ec   :  { %2056 = vmatprep.subr.bf16.mxu0 %v6912_v38  ;;  %2097 = vmatprep.subr.bf16.mxu1 %v6913_v48 }
 0x3ef   :  { %2057 = vmatpush1.bf16.msra.mxu0 %v6914_v29  ;;  %2098 = vmatpush1.bf16.msra.mxu1 %v6915_v0 }
 0x3f0   :  { %2108 = vmatprep.subr.bf16.mxu0 %v6916_v2  ;;  %2149 = vmatprep.subr.bf16.mxu1 %v6917_v18 }
 0x445   :  { %v1822_v21 = vpop.f32.mrb[40].mxu0  ;;  %v1863_v61 = vpop.f32.mrb[56].mxu1 }
 0x446   :  { %v1952_v34 = vadd.f32 %v1822_v21, %v6918_v59  ;;  %v1954_v20 = vadd.f32 %v1863_v61, %v6919_v36  ;;  %v1824_v11 = vpop.f32.mrb[41].mxu0  ;;  %v1865_v14 = vpop.f32.mrb[57].mxu1  ;;  %v6924_v21 = vld [vmem:[#allocation181_spill] sm:$0xff] }
 0x447   :  { %v1953_v38 = vadd.f32 %v1824_v11, %v6920_v28  ;;  %v1955_v48 = vadd.f32 %v1865_v14, %v6921_v35  ;;  %v1826_v16 = vpop.f32.mrb[42].mxu0  ;;  %v1867_v29 = vpop.f32.mrb[58].mxu1 }
 0x448   :  { %v3563_v19 = vmul.f32 -1.442695, %v1952_v34  ;;  %v1827_v0 = vpop.f32.mrb[43].mxu0  ;;  %v1868_v55 = vpop.f32.mrb[59].mxu1 }
 0x449   :  { %v3564_v2 = vmul.f32 -1.442695, %v1953_v38  ;;  %v3565_v18 = vmul.f32 -1.442695, %v1955_v48  ;;  %v5406_v38 = vpop.permute.xlu1 %1986 }
 0x44a   :  { %3740 = vpow2.f32 %v3563_v19  ;;  %6922 = vst [vmem:[#allocation73_spill] sm:$0xff] %v5406_v38  ;;  %vm1988_vm15 = vcmp.eq.s32.totalorder %v5406_v38, 1  ;;  %v6949_v38 = vld [vmem:[#allocation128_spill] sm:$0xff] }
 0x44b   :  { %3742 = vpow2.f32 %v3564_v2 }
 0x44c   :  { %3744 = vpow2.f32 %v3565_v18 }
 0x44d   :  { %3746 = vtanh.f32 %v1954_v20  ;;  %v6925_v20 = vld [vmem:[#allocation200_spill] sm:$0xff] }
 0x454   :  { %v3741_v15 = vpop.eup %3740 }
 0x455   :  { %v3743_v42 = vpop.eup %3742  ;;  %v1963_v59 = vadd.f32 1.0, %v3741_v15 }
 0x456   :  { %v1969_v36 = vadd.f32 1.0, %v3743_v42  ;;  %v3745_v28 = vpop.eup %3744 }
 0x457   :  { %3748 = vrcp.f32 %v1963_v59  ;;  %v3747_v11 = vpop.eup %3746  ;;  %v1976_v16 = vadd.f32 1.0, %v3745_v28  ;;  %v6926_v28 = vld [vmem:[#allocation183_spill] sm:$0xff] }
 0x458   :  { %3750 = vrcp.f32 %v1969_v36 }
 0x459   :  { %3752 = vrcp.f32 %v1976_v16 }
 0x461   :  { %v3749_v35 = vpop.eup %3748 }
 0x462   :  { %v3751_v14 = vpop.eup %3750  ;;  %v1980_v29 = vmul.f32 %v3749_v35, %v3747_v11  ;;  %v6927_v35 = vld [vmem:[#allocation201_spill] sm:$0xff] }
 0x463   :  { %v1979_v0 = vmul.f32 %v3751_v14, %v5235_v17  ;;  %v3753_v15 = vpop.eup %3752 }
 0x465   :  { %v1981_v19 = vadd.f32 %v1980_v29, %v1979_v0 }
 0x467   :  { %3754 = vtanh.f32 %v1981_v19  ;;  %v5412_v18 = vsel %vm1988_vm15, %v1981_v19, %v5235_v17 }
 0x468   :  { %6923 = vst [vmem:[#allocation105_spill] sm:$0xff] %v5412_v18 }
 0x471   :  { %v3755_v48 = vpop.eup %3754 }
 0x472   :  { %v1983_v42 = vmul.f32 %v3755_v48, %v3753_v15 }
 0x485   :  { %v1904_v55 = vpop.f32.mrb[44].mxu0  ;;  %v1945_v2 = vpop.f32.mrb[60].mxu1 }
 0x486   :  { %v1956_v34 = vadd.f32 %v1904_v55, %v6924_v21  ;;  %v1958_v61 = vadd.f32 %v1945_v2, %v6925_v20  ;;  %v1906_v59 = vpop.f32.mrb[45].mxu0  ;;  %v1947_v36 = vpop.f32.mrb[61].mxu1 }
 0x487   :  { %v1957_v11 = vadd.f32 %v1906_v59, %v6926_v28  ;;  %v1959_v14 = vadd.f32 %v1947_v36, %v6927_v35  ;;  %v1908_v29 = vpop.f32.mrb[46].mxu0  ;;  %v1949_v16 = vpop.f32.mrb[62].mxu1 }
 0x488   :  { %v3566_v0 = vmul.f32 -1.442695, %v1956_v34  ;;  %v1909_v17 = vpop.f32.mrb[47].mxu0  ;;  %v1950_v19 = vpop.f32.mrb[63].mxu1  ;;  %v5430_v16 = vsel %vm1988_vm15, %v1983_v42, %v5242_v47  ;;  %v6929_v47 = vld [vmem:[#allocation108_spill] sm:$0xff]  ;;  %v6931_v42 = vld [vmem:[#allocation110_spill] sm:$0xff] }
 0x489   :  { %v3567_v18 = vmul.f32 -1.442695, %v1957_v11  ;;  %v3568_v15 = vmul.f32 -1.442695, %v1959_v14  ;;  %v5419_v11 = vpop.permute.xlu0 %2017  ;;  %v6932_v19 = vld [vmem:[#allocation137_spill] sm:$0xff] }
 0x48a   :  { %3756 = vpow2.f32 %v3566_v0  ;;  %6928 = vst [vmem:[#allocation75_spill] sm:$0xff] %v5419_v11  ;;  %vm2019_vm0 = vcmp.eq.s32.totalorder %v5419_v11, 1  ;;  %v6950_v11 = vld [vmem:[#allocation146_spill] sm:$0xff] }
 0x48b   :  { %3758 = vpow2.f32 %v3567_v18 }
 0x48c   :  { %3760 = vpow2.f32 %v3568_v15  ;;  %v6933_v15 = vld [vmem:[#allocation112_spill] sm:$0xff] }
 0x48d   :  { %3762 = vtanh.f32 %v1958_v61 }
 0x494   :  { %v3757_v48 = vpop.eup %3756 }
 0x495   :  { %v3759_v60 = vpop.eup %3758  ;;  %v1994_v55 = vadd.f32 1.0, %v3757_v48  ;;  %v6934_v48 = vld [vmem:[#allocation138_spill] sm:$0xff] }
 0x496   :  { %v2000_v2 = vadd.f32 1.0, %v3759_v60  ;;  %v3761_v21 = vpop.eup %3760 }
 0x497   :  { %3764 = vrcp.f32 %v1994_v55  ;;  %v3763_v20 = vpop.eup %3762  ;;  %v2007_v34 = vadd.f32 1.0, %v3761_v21  ;;  %v6935_v55 = vld [vmem:[#allocation114_spill] sm:$0xff]  ;;  %v6937_v21 = vld [vmem:[#allocation116_spill] sm:$0xff] }
 0x498   :  { %3766 = vrcp.f32 %v2000_v2  ;;  %v6936_v2 = vld [vmem:[#allocation139_spill] sm:$0xff] }
 0x499   :  { %3768 = vrcp.f32 %v2007_v34  ;;  %v6942_v34 = vld [vmem:[#allocation142_spill] sm:$0xff] }
 0x4a1   :  { %v3765_v59 = vpop.eup %3764 }
 0x4a2   :  { %v3767_v36 = vpop.eup %3766  ;;  %v2011_v28 = vmul.f32 %v3765_v59, %v3763_v20  ;;  %v6938_v20 = vld [vmem:[#allocation140_spill] sm:$0xff]  ;;  %v6939_v59 = vld [vmem:[#allocation118_spill] sm:$0xff] }
 0x4a3   :  { %v2010_v35 = vmul.f32 %v3767_v36, %v5254_v30  ;;  %v3769_v61 = vpop.eup %3768  ;;  %v6940_v36 = vld [vmem:[#allocation141_spill] sm:$0xff] }
 0x4a5   :  { %v2012_v18 = vadd.f32 %v2011_v28, %v2010_v35  ;;  %v6941_v28 = vld [vmem:[#allocation120_spill] sm:$0xff]  ;;  %v6943_v35 = vld [vmem:[#allocation122_spill] sm:$0xff] }
 0x4a7   :  { %3770 = vtanh.f32 %v2012_v18  ;;  %v5425_v60 = vsel %vm2019_vm0, %v2012_v18, %v5254_v30  ;;  %v5441_v30 = vpack.c.bf16 %v5430_v16, %v5430_v16  ;;  %v6944_v18 = vld [vmem:[#allocation143_spill] sm:$0xff] }
 0x4b1   :  { %v3771_v14 = vpop.eup %3770 }
 0x4b2   :  { %v2014_v29 = vmul.f32 %v3771_v14, %v3769_v61  ;;  %v6945_v61 = vld [vmem:[#allocation124_spill] sm:$0xff] }
 0x4b3   :  { %v6946_v14 = vld [vmem:[#allocation144_spill] sm:$0xff] }
 0x4b4   :  { %v5435_v0 = vsel %vm2019_vm0, %v2014_v29, %v5261_v7  ;;  %v6930_v7 = vld [vmem:[#allocation136_spill] sm:$0xff]  ;;  %v6947_v29 = vld [vmem:[#allocation126_spill] sm:$0xff] }
 0x4b5   :  { %v2025_v17 = vpack.c.bf16 %v5435_v0, %v5435_v0 }
 0x4b7   :  { %2058 = vmatprep.mubr.bf16.mxu0 %v2025_v17  ;;  %2099 = vmatprep.mubr.bf16.mxu1 %v2025_v17 }
 0x4b8   :  { %2059 = vmatmul.mubr.bf16.vlgmr.msra.gmra.mrb[48].mxu0 %v5441_v30  ;;  %2100 = vmatmul.mubr.bf16.vlgmr.msra.gmra.mrb[64].mxu1 %v5441_v30 }
 0x4b9   :  { %2109 = vmatpush1.bf16.msra.mxu0 %v6722_v52  ;;  %2150 = vmatpush1.bf16.msra.mxu1 %v6723_v1 }
 0x4ba   :  { %2140 = vmatprep.mubr.bf16.mxu0 %v2025_v17  ;;  %2181 = vmatprep.mubr.bf16.mxu1 %v2025_v17  ;;  %v6948_v17 = vld [vmem:[#allocation145_spill] sm:$0xff] }
 0x4bb   :  { %2110 = vmatprep.subr.bf16.mxu0 %v6724_v27  ;;  %2151 = vmatprep.subr.bf16.mxu1 %v6725_v43 }
 0x4bd   :  { %2111 = vmatpush1.bf16.msra.mxu0 %v6726_v41  ;;  %2152 = vmatpush1.bf16.msra.mxu1 %v6727_v23 }
 0x4be   :  { %2112 = vmatprep.subr.bf16.mxu0 %v6728_v54  ;;  %2153 = vmatprep.subr.bf16.mxu1 %v6729_v45 }
 0x4c1   :  { %2113 = vmatpush1.bf16.msra.mxu0 %v6730_v44  ;;  %2154 = vmatpush1.bf16.msra.mxu1 %v6731_v12 }
 0x4c2   :  { %2114 = vmatprep.subr.bf16.mxu0 %v6732_v22  ;;  %2155 = vmatprep.subr.bf16.mxu1 %v6733_v57 }
 0x4c5   :  { %2115 = vmatpush1.bf16.msra.mxu0 %v6734_v9  ;;  %2156 = vmatpush1.bf16.msra.mxu1 %v6735_v24 }
 0x4c6   :  { %2116 = vmatprep.subr.bf16.mxu0 %v6736_v37  ;;  %2157 = vmatprep.subr.bf16.mxu1 %v6827_v8 }
 0x4c9   :  { %2117 = vmatpush1.bf16.msra.mxu0 %v6738_v50  ;;  %2158 = vmatpush1.bf16.msra.mxu1 %v6828_v3 }
 0x4ca   :  { %2118 = vmatprep.subr.bf16.mxu0 %v6739_v56  ;;  %2159 = vmatprep.subr.bf16.mxu1 %v6829_v31 }
 0x4cd   :  { %2119 = vmatpush1.bf16.msra.mxu0 %v6741_v5  ;;  %2160 = vmatpush1.bf16.msra.mxu1 %v6830_v33 }
 0x4ce   :  { %2120 = vmatprep.subr.bf16.mxu0 %v6742_v58  ;;  %2161 = vmatprep.subr.bf16.mxu1 %v6831_v39 }
 0x4d1   :  { %2121 = vmatpush1.bf16.msra.mxu0 %v6744_v49  ;;  %2162 = vmatpush1.bf16.msra.mxu1 %v6832_v4 }
 0x4d2   :  { %2122 = vmatprep.subr.bf16.mxu0 %v6745_v63  ;;  %2163 = vmatprep.subr.bf16.mxu1 %v6833_v6 }
 0x4d5   :  { %2123 = vmatpush1.bf16.msra.mxu0 %v6746_v62  ;;  %2164 = vmatpush1.bf16.msra.mxu1 %v6834_v25 }
 0x4d6   :  { %2124 = vmatprep.subr.bf16.mxu0 %v6747_v53  ;;  %2165 = vmatprep.subr.bf16.mxu1 %v6835_v40 }
 0x4d9   :  { %2125 = vmatpush1.bf16.msra.mxu0 %v6748_v26  ;;  %2166 = vmatpush1.bf16.msra.mxu1 %v6836_v13 }
 0x4da   :  { %2126 = vmatprep.subr.bf16.mxu0 %v6749_v46  ;;  %2167 = vmatprep.subr.bf16.mxu1 %v6837_v10 }
 0x4dd   :  { %2127 = vmatpush1.bf16.msra.mxu0 %v6750_v51  ;;  %2168 = vmatpush1.bf16.msra.mxu1 %v6838_v32 }
 0x4de   :  { %2128 = vmatprep.subr.bf16.mxu0 %v6929_v47  ;;  %2169 = vmatprep.subr.bf16.mxu1 %v6930_v7 }
 0x4e1   :  { %2129 = vmatpush1.bf16.msra.mxu0 %v6931_v42  ;;  %2170 = vmatpush1.bf16.msra.mxu1 %v6932_v19 }
 0x4e2   :  { %2130 = vmatprep.subr.bf16.mxu0 %v6933_v15  ;;  %2171 = vmatprep.subr.bf16.mxu1 %v6934_v48 }
 0x4e5   :  { %2131 = vmatpush1.bf16.msra.mxu0 %v6935_v55  ;;  %2172 = vmatpush1.bf16.msra.mxu1 %v6936_v2  ;;  %v7022_v2 = vld [vmem:[#allocation174_spill] sm:$0xff] }
 0x4e6   :  { %2132 = vmatprep.subr.bf16.mxu0 %v6937_v21  ;;  %2173 = vmatprep.subr.bf16.mxu1 %v6938_v20  ;;  %v7021_v21 = vld [vmem:[#allocation161_spill] sm:$0xff] }
 0x4e9   :  { %2133 = vmatpush1.bf16.msra.mxu0 %v6939_v59  ;;  %2174 = vmatpush1.bf16.msra.mxu1 %v6940_v36  ;;  %v6951_v36 = vld [vmem:[#allocation130_spill] sm:$0xff]  ;;  %v7020_v59 = vld [vmem:[#allocation172_spill] sm:$0xff] }
 0x4ea   :  { %2134 = vmatprep.subr.bf16.mxu0 %v6941_v28  ;;  %2175 = vmatprep.subr.bf16.mxu1 %v6942_v34  ;;  %v6952_v28 = vld [vmem:[#allocation147_spill] sm:$0xff]  ;;  %v6953_v34 = vld [vmem:[#allocation20_spill] sm:$0xff] }
 0x4ed   :  { %2135 = vmatpush1.bf16.msra.mxu0 %v6943_v35  ;;  %2176 = vmatpush1.bf16.msra.mxu1 %v6944_v18  ;;  %v6954_v35 = vld [vmem:[#allocation23_spill] sm:$0xff] }
 0x4ee   :  { %2136 = vmatprep.subr.bf16.mxu0 %v6945_v61  ;;  %2177 = vmatprep.subr.bf16.mxu1 %v6946_v14  ;;  %v6955_v14 = vld [vmem:[#allocation21_spill] sm:$0xff]  ;;  %v6964_v61 = vld [vmem:[#allocation47_spill] sm:$0xff] }
 0x4ef   :  { %v7019_v18 = vld [vmem:[#allocation159_spill] sm:$0xff] }
 0x4f1   :  { %2137 = vmatpush1.bf16.msra.mxu0 %v6947_v29  ;;  %2178 = vmatpush1.bf16.msra.mxu1 %v6948_v17  ;;  %v6956_v29 = vld [vmem:[#allocation39_spill] sm:$0xff]  ;;  %v6957_v17 = vld [vmem:[#allocation22_spill] sm:$0xff] }
 0x4f2   :  { %2138 = vmatprep.subr.bf16.mxu0 %v6949_v38  ;;  %2179 = vmatprep.subr.bf16.mxu1 %v6950_v11  ;;  %v6958_v38 = vld [vmem:[#allocation41_spill] sm:$0xff]  ;;  %v6959_v11 = vld [vmem:[#allocation24_spill] sm:$0xff] }
 0x4f5   :  { %2139 = vmatpush1.bf16.msra.mxu0 %v6951_v36  ;;  %2180 = vmatpush1.bf16.msra.mxu1 %v6952_v28  ;;  %v6960_v36 = vld [vmem:[#allocation43_spill] sm:$0xff]  ;;  %v6961_v28 = vld [vmem:[#allocation25_spill] sm:$0xff] }
 0x4f6   :  { %2262 = vmatprep.subr.bf16.mxu0 %v6953_v34  ;;  %2303 = vmatprep.subr.bf16.mxu1 %v6954_v35  ;;  %v6962_v34 = vld [vmem:[#allocation45_spill] sm:$0xff]  ;;  %v6963_v35 = vld [vmem:[#allocation26_spill] sm:$0xff] }
 0x4f8   :  { %2141 = vmatmul.mubr.bf16.vlgmr.msra.gmra.mrb[52].mxu0 %v5441_v30  ;;  %2182 = vmatmul.mubr.bf16.vlgmr.msra.gmra.mrb[68].mxu1 %v5441_v30  ;;  %v6965_v30 = vld [vmem:[#allocation27_spill] sm:$0xff] }
 0x4f9   :  { %2263 = vmatpush1.bf16.msra.mxu0 %v6955_v14  ;;  %2304 = vmatpush1.bf16.msra.mxu1 %v6956_v29  ;;  %v6966_v14 = vld [vmem:[#allocation49_spill] sm:$0xff]  ;;  %v6967_v29 = vld [vmem:[#allocation28_spill] sm:$0xff] }
 0x4fa   :  { %2264 = vmatprep.subr.bf16.mxu0 %v6957_v17  ;;  %2305 = vmatprep.subr.bf16.mxu1 %v6958_v38  ;;  %v6968_v17 = vld [vmem:[#allocation51_spill] sm:$0xff]  ;;  %v6969_v38 = vld [vmem:[#allocation29_spill] sm:$0xff] }
 0x4fd   :  { %2265 = vmatpush1.bf16.msra.mxu0 %v6959_v11  ;;  %2306 = vmatpush1.bf16.msra.mxu1 %v6960_v36  ;;  %v6970_v11 = vld [vmem:[#allocation53_spill] sm:$0xff]  ;;  %v6971_v36 = vld [vmem:[#allocation30_spill] sm:$0xff] }
 0x4fe   :  { %2266 = vmatprep.subr.bf16.mxu0 %v6961_v28  ;;  %2307 = vmatprep.subr.bf16.mxu1 %v6962_v34  ;;  %v6972_v28 = vld [vmem:[#allocation55_spill] sm:$0xff] }
 0x4ff   :  { %v6973_v34 = vld [vmem:[#allocation31_spill] sm:$0xff] }
 0x501   :  { %2267 = vmatpush1.bf16.msra.mxu0 %v6963_v35  ;;  %2308 = vmatpush1.bf16.msra.mxu1 %v6964_v61  ;;  %v6974_v35 = vld [vmem:[#allocation57_spill] sm:$0xff]  ;;  %v6975_v61 = vld [vmem:[#allocation32_spill] sm:$0xff] }
 0x502   :  { %2268 = vmatprep.subr.bf16.mxu0 %v6965_v30  ;;  %2309 = vmatprep.subr.bf16.mxu1 %v6966_v14  ;;  %v6976_v30 = vld [vmem:[#allocation59_spill] sm:$0xff]  ;;  %v6977_v14 = vld [vmem:[#allocation33_spill] sm:$0xff] }
 0x505   :  { %2269 = vmatpush1.bf16.msra.mxu0 %v6967_v29  ;;  %2310 = vmatpush1.bf16.msra.mxu1 %v6968_v17  ;;  %v6978_v29 = vld [vmem:[#allocation61_spill] sm:$0xff]  ;;  %v6979_v17 = vld [vmem:[#allocation34_spill] sm:$0xff] }
 0x506   :  { %2270 = vmatprep.subr.bf16.mxu0 %v6969_v38  ;;  %2311 = vmatprep.subr.bf16.mxu1 %v6970_v11  ;;  %v6980_v38 = vld [vmem:[#allocation63_spill] sm:$0xff] }
 0x507   :  { %v6981_v11 = vld [vmem:[#allocation35_spill] sm:$0xff] }
 0x509   :  { %2271 = vmatpush1.bf16.msra.mxu0 %v6971_v36  ;;  %2312 = vmatpush1.bf16.msra.mxu1 %v6972_v28  ;;  %v6982_v36 = vld [vmem:[#allocation65_spill] sm:$0xff]  ;;  %v6983_v28 = vld [vmem:[#allocation36_spill] sm:$0xff] }
 0x50a   :  { %2272 = vmatprep.subr.bf16.mxu0 %v6973_v34  ;;  %2313 = vmatprep.subr.bf16.mxu1 %v6974_v35  ;;  %v6984_v34 = vld [vmem:[#allocation67_spill] sm:$0xff]  ;;  %v6985_v35 = vld [vmem:[#allocation37_spill] sm:$0xff] }
 0x50d   :  { %2273 = vmatpush1.bf16.msra.mxu0 %v6975_v61  ;;  %2314 = vmatpush1.bf16.msra.mxu1 %v6976_v30  ;;  %v6986_v61 = vld [vmem:[#allocation68_spill] sm:$0xff]  ;;  %v6987_v30 = vld [vmem:[#allocation38_spill] sm:$0xff] }
 0x50e   :  { %2274 = vmatprep.subr.bf16.mxu0 %v6977_v14  ;;  %2315 = vmatprep.subr.bf16.mxu1 %v6978_v29  ;;  %v6988_v14 = vld [vmem:[#allocation70_spill] sm:$0xff]  ;;  %v6989_v29 = vld [vmem:[#allocation40_spill] sm:$0xff] }
 0x511   :  { %2275 = vmatpush1.bf16.msra.mxu0 %v6979_v17  ;;  %2316 = vmatpush1.bf16.msra.mxu1 %v6980_v38  ;;  %v6990_v17 = vld [vmem:[#allocation72_spill] sm:$0xff]  ;;  %v6991_v38 = vld [vmem:[#allocation42_spill] sm:$0xff] }
 0x512   :  { %2276 = vmatprep.subr.bf16.mxu0 %v6981_v11  ;;  %2317 = vmatprep.subr.bf16.mxu1 %v6982_v36  ;;  %v6992_v11 = vld [vmem:[#allocation74_spill] sm:$0xff]  ;;  %v6993_v36 = vld [vmem:[#allocation44_spill] sm:$0xff] }
 0x515   :  { %2277 = vmatpush1.bf16.msra.mxu0 %v6983_v28  ;;  %2318 = vmatpush1.bf16.msra.mxu1 %v6984_v34  ;;  %v6994_v28 = vld [vmem:[#allocation76_spill] sm:$0xff]  ;;  %v6995_v34 = vld [vmem:[#allocation46_spill] sm:$0xff] }
 0x516   :  { %2278 = vmatprep.subr.bf16.mxu0 %v6985_v35  ;;  %2319 = vmatprep.subr.bf16.mxu1 %v6986_v61  ;;  %v6996_v35 = vld [vmem:[#allocation78_spill] sm:$0xff]  ;;  %v6997_v61 = vld [vmem:[#allocation48_spill] sm:$0xff] }
 0x519   :  { %2279 = vmatpush1.bf16.msra.mxu0 %v6987_v30  ;;  %2320 = vmatpush1.bf16.msra.mxu1 %v6988_v14  ;;  %v6998_v30 = vld [vmem:[#allocation80_spill] sm:$0xff]  ;;  %v6999_v14 = vld [vmem:[#allocation50_spill] sm:$0xff] }
 0x51a   :  { %2280 = vmatprep.subr.bf16.mxu0 %v6989_v29  ;;  %2321 = vmatprep.subr.bf16.mxu1 %v6990_v17  ;;  %v7000_v29 = vld [vmem:[#allocation82_spill] sm:$0xff]  ;;  %v7001_v17 = vld [vmem:[#allocation52_spill] sm:$0xff] }
 0x51d   :  { %2281 = vmatpush1.bf16.msra.mxu0 %v6991_v38  ;;  %2322 = vmatpush1.bf16.msra.mxu1 %v6992_v11  ;;  %v7002_v38 = vld [vmem:[#allocation84_spill] sm:$0xff]  ;;  %v7003_v11 = vld [vmem:[#allocation54_spill] sm:$0xff] }
 0x51e   :  { %2282 = vmatprep.subr.bf16.mxu0 %v6993_v36  ;;  %2323 = vmatprep.subr.bf16.mxu1 %v6994_v28  ;;  %v7004_v36 = vld [vmem:[#allocation86_spill] sm:$0xff]  ;;  %v7005_v28 = vld [vmem:[#allocation56_spill] sm:$0xff] }
 0x521   :  { %2283 = vmatpush1.bf16.msra.mxu0 %v6995_v34  ;;  %2324 = vmatpush1.bf16.msra.mxu1 %v6996_v35  ;;  %v7006_v34 = vld [vmem:[#allocation88_spill] sm:$0xff]  ;;  %v7007_v35 = vld [vmem:[#allocation58_spill] sm:$0xff] }
 0x522   :  { %2284 = vmatprep.subr.bf16.mxu0 %v6997_v61  ;;  %2325 = vmatprep.subr.bf16.mxu1 %v6998_v30  ;;  %v7008_v61 = vld [vmem:[#allocation90_spill] sm:$0xff]  ;;  %v7009_v30 = vld [vmem:[#allocation60_spill] sm:$0xff] }
 0x525   :  { %2285 = vmatpush1.bf16.msra.mxu0 %v6999_v14  ;;  %2326 = vmatpush1.bf16.msra.mxu1 %v7000_v29  ;;  %v7010_v14 = vld [vmem:[#allocation92_spill] sm:$0xff]  ;;  %v7011_v29 = vld [vmem:[#allocation62_spill] sm:$0xff] }
 0x526   :  { %2286 = vmatprep.subr.bf16.mxu0 %v7001_v17  ;;  %2327 = vmatprep.subr.bf16.mxu1 %v7002_v38  ;;  %v7012_v17 = vld [vmem:[#allocation94_spill] sm:$0xff]  ;;  %v7013_v38 = vld [vmem:[#allocation64_spill] sm:$0xff] }
 0x529   :  { %2287 = vmatpush1.bf16.msra.mxu0 %v7003_v11  ;;  %2328 = vmatpush1.bf16.msra.mxu1 %v7004_v36  ;;  %v7014_v11 = vld [vmem:[#allocation96_spill] sm:$0xff]  ;;  %v7015_v36 = vld [vmem:[#allocation66_spill] sm:$0xff] }
 0x52a   :  { %2288 = vmatprep.subr.bf16.mxu0 %v7005_v28  ;;  %2329 = vmatprep.subr.bf16.mxu1 %v7006_v34  ;;  %v7016_v28 = vld [vmem:[#allocation98_spill] sm:$0xff]  ;;  %v7017_v34 = vld [vmem:[#allocation69_spill] sm:$0xff] }
 0x52d   :  { %2289 = vmatpush1.bf16.msra.mxu0 %v7007_v35  ;;  %2330 = vmatpush1.bf16.msra.mxu1 %v7008_v61  ;;  %v7018_v35 = vld [vmem:[#allocation101_spill] sm:$0xff] }
 0x52e   :  { %2290 = vmatprep.subr.bf16.mxu0 %v7009_v30  ;;  %2331 = vmatprep.subr.bf16.mxu1 %v7010_v14 }
 0x531   :  { %2291 = vmatpush1.bf16.msra.mxu0 %v7011_v29  ;;  %2332 = vmatpush1.bf16.msra.mxu1 %v7012_v17 }
 0x532   :  { %2292 = vmatprep.subr.bf16.mxu0 %v7013_v38  ;;  %2333 = vmatprep.subr.bf16.mxu1 %v7014_v11 }
 0x535   :  { %2293 = vmatpush1.bf16.msra.mxu0 %v7015_v36  ;;  %2334 = vmatpush1.bf16.msra.mxu1 %v7016_v28 }
 0x536   :  { %2344 = vmatprep.subr.bf16.mxu0 %v7017_v34  ;;  %2385 = vmatprep.subr.bf16.mxu1 %v7018_v35 }
 0x58b   :  { %v2060_v61 = vpop.f32.mrb[48].mxu0  ;;  %v2101_v30 = vpop.f32.mrb[64].mxu1 }
 0x58c   :  { %v2190_v14 = vadd.f32 %v2060_v61, %v7019_v18  ;;  %v2192_v29 = vadd.f32 %v2101_v30, %v7020_v59  ;;  %v2062_v20 = vpop.f32.mrb[49].mxu0  ;;  %v2103_v17 = vpop.f32.mrb[65].mxu1  ;;  %v7026_v30 = vld [vmem:[#allocation198_spill] sm:$0xff] }
 0x58d   :  { %v2191_v38 = vadd.f32 %v2062_v20, %v7021_v21  ;;  %v2193_v11 = vadd.f32 %v2103_v17, %v7022_v2  ;;  %v2064_v55 = vpop.f32.mrb[50].mxu0  ;;  %v2105_v36 = vpop.f32.mrb[66].mxu1 }
 0x58e   :  { %v3569_v48 = vmul.f32 -1.442695, %v2190_v14  ;;  %v2065_v28 = vpop.f32.mrb[51].mxu0  ;;  %v2106_v15 = vpop.f32.mrb[67].mxu1 }
 0x58f   :  { %v3570_v34 = vmul.f32 -1.442695, %v2191_v38  ;;  %v3571_v35 = vmul.f32 -1.442695, %v2193_v11  ;;  %v5579_v28 = vpop.permute.xlu1 %2224  ;;  %v7023_v38 = vld [vmem:[#allocation105_spill] sm:$0xff] }
 0x590   :  { %3772 = vpow2.f32 %v3569_v48  ;;  %vm2226_vm1 = vcmp.eq.s32.totalorder %v5579_v28, 1  ;;  %v7129_v28 = vld [vmem:[#allocation135_spill] sm:$0xff] }
 0x591   :  { %3774 = vpow2.f32 %v3570_v34 }
 0x592   :  { %3776 = vpow2.f32 %v3571_v35 }
 0x593   :  { %3778 = vtanh.f32 %v2192_v29  ;;  %v7025_v29 = vld [vmem:[#allocation177_spill] sm:$0xff] }
 0x59a   :  { %v3773_v19 = vpop.eup %3772 }
 0x59b   :  { %v3775_v42 = vpop.eup %3774  ;;  %v2201_v18 = vadd.f32 1.0, %v3773_v19 }
 0x59c   :  { %v2207_v59 = vadd.f32 1.0, %v3775_v42  ;;  %v3777_v21 = vpop.eup %3776 }
 0x59d   :  { %3780 = vrcp.f32 %v2201_v18  ;;  %v3779_v20 = vpop.eup %3778  ;;  %v2214_v61 = vadd.f32 1.0, %v3777_v21 }
 0x59e   :  { %3782 = vrcp.f32 %v2207_v59 }
 0x59f   :  { %3784 = vrcp.f32 %v2214_v61 }
 0x5a7   :  { %v3781_v2 = vpop.eup %3780 }
 0x5a8   :  { %v3783_v55 = vpop.eup %3782  ;;  %v2218_v36 = vmul.f32 %v3781_v2, %v3779_v20  ;;  %v7027_v20 = vld [vmem:[#allocation179_spill] sm:$0xff] }
 0x5a9   :  { %v2217_v15 = vmul.f32 %v3783_v55, %v7023_v38  ;;  %v3785_v42 = vpop.eup %3784  ;;  %v7028_v55 = vld [vmem:[#allocation199_spill] sm:$0xff] }
 0x5ab   :  { %v2219_v48 = vadd.f32 %v2218_v36, %v2217_v15 }
 0x5ad   :  { %3786 = vtanh.f32 %v2219_v48  ;;  %v5586_v11 = vsel %vm2226_vm1, %v2219_v48, %v7023_v38 }
 0x5ae   :  { %7024 = vst [vmem:[#allocation107_spill] sm:$0xff] %v5586_v11 }
 0x5b7   :  { %v3787_v19 = vpop.eup %3786 }
 0x5b8   :  { %v2221_v34 = vmul.f32 %v3787_v19, %v3785_v42 }
 0x5cb   :  { %v2142_v35 = vpop.f32.mrb[52].mxu0  ;;  %v2183_v14 = vpop.f32.mrb[68].mxu1 }
 0x5cc   :  { %v2194_v17 = vadd.f32 %v2142_v35, %v7025_v29  ;;  %v2196_v18 = vadd.f32 %v2183_v14, %v7026_v30  ;;  %v2144_v59 = vpop.f32.mrb[53].mxu0  ;;  %v2185_v21 = vpop.f32.mrb[69].mxu1 }
 0x5cd   :  { %v2195_v2 = vadd.f32 %v2144_v59, %v7027_v20  ;;  %v2197_v36 = vadd.f32 %v2185_v21, %v7028_v55  ;;  %v2146_v61 = vpop.f32.mrb[54].mxu0  ;;  %v2187_v15 = vpop.f32.mrb[70].mxu1 }
 0x5ce   :  { %v3572_v7 = vmul.f32 -1.442695, %v2194_v17  ;;  %v2147_v38 = vpop.f32.mrb[55].mxu0  ;;  %v2188_v48 = vpop.f32.mrb[71].mxu1  ;;  %v5604_v61 = vsel %vm2226_vm1, %v2221_v34, %v5430_v16  ;;  %v7029_v16 = vld [vmem:[#allocation108_spill] sm:$0xff]  ;;  %v7031_v34 = vld [vmem:[#allocation110_spill] sm:$0xff] }
 0x5cf   :  { %v3573_v11 = vmul.f32 -1.442695, %v2195_v2  ;;  %v3574_v42 = vmul.f32 -1.442695, %v2197_v36  ;;  %v5592_v55 = vpop.permute.xlu0 %2255  ;;  %v7032_v48 = vld [vmem:[#allocation137_spill] sm:$0xff] }
 0x5d0   :  { %3788 = vpow2.f32 %v3572_v7  ;;  %vm2257_vm2 = vcmp.eq.s32.totalorder %v5592_v55, 1  ;;  %v7130_v55 = vld [vmem:[#allocation108_spill] sm:$0xff] }
 0x5d1   :  { %3790 = vpow2.f32 %v3573_v11 }
 0x5d2   :  { %3792 = vpow2.f32 %v3574_v42  ;;  %v7033_v42 = vld [vmem:[#allocation112_spill] sm:$0xff] }
 0x5d3   :  { %3794 = vtanh.f32 %v2196_v18 }
 0x5da   :  { %v3789_v19 = vpop.eup %3788 }
 0x5db   :  { %v3791_v47 = vpop.eup %3790  ;;  %v2232_v35 = vadd.f32 1.0, %v3789_v19  ;;  %v7034_v19 = vld [vmem:[#allocation138_spill] sm:$0xff] }
 0x5dc   :  { %v2238_v14 = vadd.f32 1.0, %v3791_v47  ;;  %v3793_v29 = vpop.eup %3792 }
 0x5dd   :  { %3796 = vrcp.f32 %v2232_v35  ;;  %v3795_v30 = vpop.eup %3794  ;;  %v2245_v17 = vadd.f32 1.0, %v3793_v29  ;;  %v7035_v35 = vld [vmem:[#allocation114_spill] sm:$0xff]  ;;  %v7037_v29 = vld [vmem:[#allocation116_spill] sm:$0xff] }
 0x5de   :  { %3798 = vrcp.f32 %v2238_v14  ;;  %v7036_v14 = vld [vmem:[#allocation139_spill] sm:$0xff] }
 0x5df   :  { %3800 = vrcp.f32 %v2245_v17  ;;  %v7042_v17 = vld [vmem:[#allocation142_spill] sm:$0xff] }
 0x5e7   :  { %v3797_v59 = vpop.eup %3796 }
 0x5e8   :  { %v3799_v21 = vpop.eup %3798  ;;  %v2249_v20 = vmul.f32 %v3797_v59, %v3795_v30  ;;  %v7038_v30 = vld [vmem:[#allocation140_spill] sm:$0xff]  ;;  %v7039_v59 = vld [vmem:[#allocation118_spill] sm:$0xff] }
 0x5e9   :  { %v2248_v7 = vmul.f32 %v3799_v21, %v5425_v60  ;;  %v3801_v18 = vpop.eup %3800  ;;  %v7040_v21 = vld [vmem:[#allocation141_spill] sm:$0xff] }
 0x5eb   :  { %v2250_v11 = vadd.f32 %v2249_v20, %v2248_v7  ;;  %v7041_v20 = vld [vmem:[#allocation120_spill] sm:$0xff]  ;;  %v7043_v7 = vld [vmem:[#allocation122_spill] sm:$0xff] }
 0x5ed   :  { %3802 = vtanh.f32 %v2250_v11  ;;  %v5599_v47 = vsel %vm2257_vm2, %v2250_v11, %v5425_v60  ;;  %v5615_v60 = vpack.c.bf16 %v5604_v61, %v5604_v61  ;;  %v7044_v11 = vld [vmem:[#allocation143_spill] sm:$0xff] }
 0x5f7   :  { %v3803_v2 = vpop.eup %3802 }
 0x5f8   :  { %v2252_v36 = vmul.f32 %v3803_v2, %v3801_v18  ;;  %v7045_v18 = vld [vmem:[#allocation124_spill] sm:$0xff] }
 0x5f9   :  { %v7046_v2 = vld [vmem:[#allocation144_spill] sm:$0xff] }
 0x5fa   :  { %v5609_v15 = vsel %vm2257_vm2, %v2252_v36, %v5435_v0  ;;  %v7030_v0 = vld [vmem:[#allocation136_spill] sm:$0xff]  ;;  %v7047_v36 = vld [vmem:[#allocation126_spill] sm:$0xff] }
 0x5fb   :  { %v2261_v38 = vpack.c.bf16 %v5609_v15, %v5609_v15 }
 0x5fd   :  { %2294 = vmatprep.mubr.bf16.mxu0 %v2261_v38  ;;  %2335 = vmatprep.mubr.bf16.mxu1 %v2261_v38 }
 0x5fe   :  { %2295 = vmatmul.mubr.bf16.vlgmr.msra.gmra.mrb[56].mxu0 %v5615_v60  ;;  %2336 = vmatmul.mubr.bf16.vlgmr.msra.gmra.mrb[72].mxu1 %v5615_v60 }
 0x5ff   :  { %2345 = vmatpush1.bf16.msra.mxu0 %v6722_v52  ;;  %2386 = vmatpush1.bf16.msra.mxu1 %v6723_v1 }
 0x600   :  { %2376 = vmatprep.mubr.bf16.mxu0 %v2261_v38  ;;  %2417 = vmatprep.mubr.bf16.mxu1 %v2261_v38  ;;  %v7048_v38 = vld [vmem:[#allocation145_spill] sm:$0xff] }
 0x601   :  { %2346 = vmatprep.subr.bf16.mxu0 %v6724_v27  ;;  %2387 = vmatprep.subr.bf16.mxu1 %v6725_v43 }
 0x603   :  { %2347 = vmatpush1.bf16.msra.mxu0 %v6726_v41  ;;  %2388 = vmatpush1.bf16.msra.mxu1 %v6727_v23 }
 0x604   :  { %2348 = vmatprep.subr.bf16.mxu0 %v6728_v54  ;;  %2389 = vmatprep.subr.bf16.mxu1 %v6729_v45 }
 0x607   :  { %2349 = vmatpush1.bf16.msra.mxu0 %v6730_v44  ;;  %2390 = vmatpush1.bf16.msra.mxu1 %v6731_v12 }
 0x608   :  { %2350 = vmatprep.subr.bf16.mxu0 %v6732_v22  ;;  %2391 = vmatprep.subr.bf16.mxu1 %v6733_v57 }
 0x60b   :  { %2351 = vmatpush1.bf16.msra.mxu0 %v6734_v9  ;;  %2392 = vmatpush1.bf16.msra.mxu1 %v6735_v24 }
 0x60c   :  { %2352 = vmatprep.subr.bf16.mxu0 %v6736_v37  ;;  %2393 = vmatprep.subr.bf16.mxu1 %v6827_v8 }
 0x60f   :  { %2353 = vmatpush1.bf16.msra.mxu0 %v6738_v50  ;;  %2394 = vmatpush1.bf16.msra.mxu1 %v6828_v3 }
 0x610   :  { %2354 = vmatprep.subr.bf16.mxu0 %v6739_v56  ;;  %2395 = vmatprep.subr.bf16.mxu1 %v6829_v31 }
 0x613   :  { %2355 = vmatpush1.bf16.msra.mxu0 %v6741_v5  ;;  %2396 = vmatpush1.bf16.msra.mxu1 %v6830_v33 }
 0x614   :  { %2356 = vmatprep.subr.bf16.mxu0 %v6742_v58  ;;  %2397 = vmatprep.subr.bf16.mxu1 %v6831_v39 }
 0x617   :  { %2357 = vmatpush1.bf16.msra.mxu0 %v6744_v49  ;;  %2398 = vmatpush1.bf16.msra.mxu1 %v6832_v4 }
 0x618   :  { %2358 = vmatprep.subr.bf16.mxu0 %v6745_v63  ;;  %2399 = vmatprep.subr.bf16.mxu1 %v6833_v6 }
 0x61b   :  { %2359 = vmatpush1.bf16.msra.mxu0 %v6746_v62  ;;  %2400 = vmatpush1.bf16.msra.mxu1 %v6834_v25 }
 0x61c   :  { %2360 = vmatprep.subr.bf16.mxu0 %v6747_v53  ;;  %2401 = vmatprep.subr.bf16.mxu1 %v6835_v40 }
 0x61f   :  { %2361 = vmatpush1.bf16.msra.mxu0 %v6748_v26  ;;  %2402 = vmatpush1.bf16.msra.mxu1 %v6836_v13 }
 0x620   :  { %2362 = vmatprep.subr.bf16.mxu0 %v6749_v46  ;;  %2403 = vmatprep.subr.bf16.mxu1 %v6837_v10 }
 0x623   :  { %2363 = vmatpush1.bf16.msra.mxu0 %v6750_v51  ;;  %2404 = vmatpush1.bf16.msra.mxu1 %v6838_v32 }
 0x624   :  { %2364 = vmatprep.subr.bf16.mxu0 %v7029_v16  ;;  %2405 = vmatprep.subr.bf16.mxu1 %v7030_v0 }
 0x627   :  { %2365 = vmatpush1.bf16.msra.mxu0 %v7031_v34  ;;  %2406 = vmatpush1.bf16.msra.mxu1 %v7032_v48 }
 0x628   :  { %2366 = vmatprep.subr.bf16.mxu0 %v7033_v42  ;;  %2407 = vmatprep.subr.bf16.mxu1 %v7034_v19  ;;  %v7122_v19 = vld [vmem:[#allocation178_spill] sm:$0xff] }
 0x62b   :  { %2367 = vmatpush1.bf16.msra.mxu0 %v7035_v35  ;;  %2408 = vmatpush1.bf16.msra.mxu1 %v7036_v14  ;;  %v7121_v35 = vld [vmem:[#allocation149_spill] sm:$0xff] }
 0x62c   :  { %2368 = vmatprep.subr.bf16.mxu0 %v7037_v29  ;;  %2409 = vmatprep.subr.bf16.mxu1 %v7038_v30  ;;  %v7049_v30 = vld [vmem:[#allocation128_spill] sm:$0xff] }
 0x62d   :  { %v7120_v29 = vld [vmem:[#allocation176_spill] sm:$0xff] }
 0x62f   :  { %2369 = vmatpush1.bf16.msra.mxu0 %v7039_v59  ;;  %2410 = vmatpush1.bf16.msra.mxu1 %v7040_v21  ;;  %v7050_v59 = vld [vmem:[#allocation146_spill] sm:$0xff] }
 0x630   :  { %2370 = vmatprep.subr.bf16.mxu0 %v7041_v20  ;;  %2411 = vmatprep.subr.bf16.mxu1 %v7042_v17  ;;  %v7051_v21 = vld [vmem:[#allocation130_spill] sm:$0xff]  ;;  %v7052_v20 = vld [vmem:[#allocation147_spill] sm:$0xff]  ;;  %v7053_v17 = vld [vmem:[#allocation20_spill] sm:$0xff] }
 0x633   :  { %2371 = vmatpush1.bf16.msra.mxu0 %v7043_v7  ;;  %2412 = vmatpush1.bf16.msra.mxu1 %v7044_v11  ;;  %v7054_v7 = vld [vmem:[#allocation23_spill] sm:$0xff]  ;;  %v7119_v11 = vld [vmem:[#allocation148_spill] sm:$0xff] }
 0x634   :  { %2372 = vmatprep.subr.bf16.mxu0 %v7045_v18  ;;  %2413 = vmatprep.subr.bf16.mxu1 %v7046_v2  ;;  %v7055_v2 = vld [vmem:[#allocation21_spill] sm:$0xff]  ;;  %v7064_v18 = vld [vmem:[#allocation47_spill] sm:$0xff] }
 0x637   :  { %2373 = vmatpush1.bf16.msra.mxu0 %v7047_v36  ;;  %2414 = vmatpush1.bf16.msra.mxu1 %v7048_v38  ;;  %v7056_v36 = vld [vmem:[#allocation39_spill] sm:$0xff]  ;;  %v7057_v38 = vld [vmem:[#allocation22_spill] sm:$0xff] }
 0x638   :  { %2374 = vmatprep.subr.bf16.mxu0 %v7049_v30  ;;  %2415 = vmatprep.subr.bf16.mxu1 %v7050_v59  ;;  %v7058_v30 = vld [vmem:[#allocation41_spill] sm:$0xff]  ;;  %v7059_v59 = vld [vmem:[#allocation24_spill] sm:$0xff] }
 0x63b   :  { %2375 = vmatpush1.bf16.msra.mxu0 %v7051_v21  ;;  %2416 = vmatpush1.bf16.msra.mxu1 %v7052_v20  ;;  %v7060_v21 = vld [vmem:[#allocation43_spill] sm:$0xff]  ;;  %v7061_v20 = vld [vmem:[#allocation25_spill] sm:$0xff] }
 0x63c   :  { %2488 = vmatprep.subr.bf16.mxu0 %v7053_v17  ;;  %2529 = vmatprep.subr.bf16.mxu1 %v7054_v7  ;;  %v7062_v17 = vld [vmem:[#allocation45_spill] sm:$0xff]  ;;  %v7063_v7 = vld [vmem:[#allocation26_spill] sm:$0xff] }
 0x63e   :  { %2377 = vmatmul.mubr.bf16.vlgmr.msra.gmra.mrb[60].mxu0 %v5615_v60  ;;  %2418 = vmatmul.mubr.bf16.vlgmr.msra.gmra.mrb[76].mxu1 %v5615_v60  ;;  %v7065_v60 = vld [vmem:[#allocation27_spill] sm:$0xff] }
 0x63f   :  { %2489 = vmatpush1.bf16.msra.mxu0 %v7055_v2  ;;  %2530 = vmatpush1.bf16.msra.mxu1 %v7056_v36  ;;  %v7066_v2 = vld [vmem:[#allocation49_spill] sm:$0xff]  ;;  %v7067_v36 = vld [vmem:[#allocation28_spill] sm:$0xff] }
 0x640   :  { %2490 = vmatprep.subr.bf16.mxu0 %v7057_v38  ;;  %2531 = vmatprep.subr.bf16.mxu1 %v7058_v30  ;;  %v7068_v38 = vld [vmem:[#allocation51_spill] sm:$0xff]  ;;  %v7069_v30 = vld [vmem:[#allocation29_spill] sm:$0xff] }
 0x643   :  { %2491 = vmatpush1.bf16.msra.mxu0 %v7059_v59  ;;  %2532 = vmatpush1.bf16.msra.mxu1 %v7060_v21  ;;  %v7070_v59 = vld [vmem:[#allocation53_spill] sm:$0xff]  ;;  %v7071_v21 = vld [vmem:[#allocation30_spill] sm:$0xff] }
 0x644   :  { %2492 = vmatprep.subr.bf16.mxu0 %v7061_v20  ;;  %2533 = vmatprep.subr.bf16.mxu1 %v7062_v17  ;;  %v7072_v20 = vld [vmem:[#allocation55_spill] sm:$0xff] }
 0x645   :  { %v7073_v17 = vld [vmem:[#allocation31_spill] sm:$0xff] }
 0x647   :  { %2493 = vmatpush1.bf16.msra.mxu0 %v7063_v7  ;;  %2534 = vmatpush1.bf16.msra.mxu1 %v7064_v18  ;;  %v7074_v7 = vld [vmem:[#allocation57_spill] sm:$0xff]  ;;  %v7075_v18 = vld [vmem:[#allocation32_spill] sm:$0xff] }
 0x648   :  { %2494 = vmatprep.subr.bf16.mxu0 %v7065_v60  ;;  %2535 = vmatprep.subr.bf16.mxu1 %v7066_v2  ;;  %v7076_v60 = vld [vmem:[#allocation59_spill] sm:$0xff]  ;;  %v7077_v2 = vld [vmem:[#allocation33_spill] sm:$0xff] }
 0x64b   :  { %2495 = vmatpush1.bf16.msra.mxu0 %v7067_v36  ;;  %2536 = vmatpush1.bf16.msra.mxu1 %v7068_v38  ;;  %v7078_v36 = vld [vmem:[#allocation61_spill] sm:$0xff]  ;;  %v7079_v38 = vld [vmem:[#allocation34_spill] sm:$0xff] }
 0x64c   :  { %2496 = vmatprep.subr.bf16.mxu0 %v7069_v30  ;;  %2537 = vmatprep.subr.bf16.mxu1 %v7070_v59  ;;  %v7080_v30 = vld [vmem:[#allocation63_spill] sm:$0xff] }
 0x64d   :  { %v7081_v59 = vld [vmem:[#allocation35_spill] sm:$0xff] }
 0x64f   :  { %2497 = vmatpush1.bf16.msra.mxu0 %v7071_v21  ;;  %2538 = vmatpush1.bf16.msra.mxu1 %v7072_v20  ;;  %v7082_v21 = vld [vmem:[#allocation65_spill] sm:$0xff]  ;;  %v7083_v20 = vld [vmem:[#allocation36_spill] sm:$0xff] }
 0x650   :  { %2498 = vmatprep.subr.bf16.mxu0 %v7073_v17  ;;  %2539 = vmatprep.subr.bf16.mxu1 %v7074_v7  ;;  %v7084_v17 = vld [vmem:[#allocation67_spill] sm:$0xff]  ;;  %v7085_v7 = vld [vmem:[#allocation37_spill] sm:$0xff] }
 0x653   :  { %2499 = vmatpush1.bf16.msra.mxu0 %v7075_v18  ;;  %2540 = vmatpush1.bf16.msra.mxu1 %v7076_v60  ;;  %v7086_v18 = vld [vmem:[#allocation68_spill] sm:$0xff]  ;;  %v7087_v60 = vld [vmem:[#allocation38_spill] sm:$0xff] }
 0x654   :  { %2500 = vmatprep.subr.bf16.mxu0 %v7077_v2  ;;  %2541 = vmatprep.subr.bf16.mxu1 %v7078_v36  ;;  %v7088_v2 = vld [vmem:[#allocation70_spill] sm:$0xff]  ;;  %v7089_v36 = vld [vmem:[#allocation40_spill] sm:$0xff] }
 0x657   :  { %2501 = vmatpush1.bf16.msra.mxu0 %v7079_v38  ;;  %2542 = vmatpush1.bf16.msra.mxu1 %v7080_v30  ;;  %v7090_v38 = vld [vmem:[#allocation72_spill] sm:$0xff]  ;;  %v7091_v30 = vld [vmem:[#allocation42_spill] sm:$0xff] }
 0x658   :  { %2502 = vmatprep.subr.bf16.mxu0 %v7081_v59  ;;  %2543 = vmatprep.subr.bf16.mxu1 %v7082_v21  ;;  %v7092_v59 = vld [vmem:[#allocation74_spill] sm:$0xff]  ;;  %v7093_v21 = vld [vmem:[#allocation44_spill] sm:$0xff] }
 0x65b   :  { %2503 = vmatpush1.bf16.msra.mxu0 %v7083_v20  ;;  %2544 = vmatpush1.bf16.msra.mxu1 %v7084_v17  ;;  %v7094_v20 = vld [vmem:[#allocation76_spill] sm:$0xff]  ;;  %v7095_v17 = vld [vmem:[#allocation46_spill] sm:$0xff] }
 0x65c   :  { %2504 = vmatprep.subr.bf16.mxu0 %v7085_v7  ;;  %2545 = vmatprep.subr.bf16.mxu1 %v7086_v18  ;;  %v7096_v7 = vld [vmem:[#allocation78_spill] sm:$0xff]  ;;  %v7097_v18 = vld [vmem:[#allocation48_spill] sm:$0xff] }
 0x65f   :  { %2505 = vmatpush1.bf16.msra.mxu0 %v7087_v60  ;;  %2546 = vmatpush1.bf16.msra.mxu1 %v7088_v2  ;;  %v7098_v60 = vld [vmem:[#allocation80_spill] sm:$0xff]  ;;  %v7099_v2 = vld [vmem:[#allocation50_spill] sm:$0xff] }
 0x660   :  { %2506 = vmatprep.subr.bf16.mxu0 %v7089_v36  ;;  %2547 = vmatprep.subr.bf16.mxu1 %v7090_v38  ;;  %v7100_v36 = vld [vmem:[#allocation82_spill] sm:$0xff]  ;;  %v7101_v38 = vld [vmem:[#allocation52_spill] sm:$0xff] }
 0x663   :  { %2507 = vmatpush1.bf16.msra.mxu0 %v7091_v30  ;;  %2548 = vmatpush1.bf16.msra.mxu1 %v7092_v59  ;;  %v7102_v30 = vld [vmem:[#allocation84_spill] sm:$0xff]  ;;  %v7103_v59 = vld [vmem:[#allocation54_spill] sm:$0xff] }
 0x664   :  { %2508 = vmatprep.subr.bf16.mxu0 %v7093_v21  ;;  %2549 = vmatprep.subr.bf16.mxu1 %v7094_v20  ;;  %v7104_v21 = vld [vmem:[#allocation86_spill] sm:$0xff]  ;;  %v7105_v20 = vld [vmem:[#allocation56_spill] sm:$0xff] }
 0x667   :  { %2509 = vmatpush1.bf16.msra.mxu0 %v7095_v17  ;;  %2550 = vmatpush1.bf16.msra.mxu1 %v7096_v7  ;;  %v7106_v17 = vld [vmem:[#allocation88_spill] sm:$0xff]  ;;  %v7107_v7 = vld [vmem:[#allocation58_spill] sm:$0xff] }
 0x668   :  { %2510 = vmatprep.subr.bf16.mxu0 %v7097_v18  ;;  %2551 = vmatprep.subr.bf16.mxu1 %v7098_v60  ;;  %v7108_v18 = vld [vmem:[#allocation90_spill] sm:$0xff]  ;;  %v7109_v60 = vld [vmem:[#allocation60_spill] sm:$0xff] }
 0x66b   :  { %2511 = vmatpush1.bf16.msra.mxu0 %v7099_v2  ;;  %2552 = vmatpush1.bf16.msra.mxu1 %v7100_v36  ;;  %v7110_v2 = vld [vmem:[#allocation92_spill] sm:$0xff]  ;;  %v7111_v36 = vld [vmem:[#allocation62_spill] sm:$0xff] }
 0x66c   :  { %2512 = vmatprep.subr.bf16.mxu0 %v7101_v38  ;;  %2553 = vmatprep.subr.bf16.mxu1 %v7102_v30  ;;  %v7112_v38 = vld [vmem:[#allocation94_spill] sm:$0xff]  ;;  %v7113_v30 = vld [vmem:[#allocation64_spill] sm:$0xff] }
 0x66f   :  { %2513 = vmatpush1.bf16.msra.mxu0 %v7103_v59  ;;  %2554 = vmatpush1.bf16.msra.mxu1 %v7104_v21  ;;  %v7114_v59 = vld [vmem:[#allocation96_spill] sm:$0xff]  ;;  %v7115_v21 = vld [vmem:[#allocation66_spill] sm:$0xff] }
 0x670   :  { %2514 = vmatprep.subr.bf16.mxu0 %v7105_v20  ;;  %2555 = vmatprep.subr.bf16.mxu1 %v7106_v17  ;;  %v7116_v20 = vld [vmem:[#allocation98_spill] sm:$0xff]  ;;  %v7117_v17 = vld [vmem:[#allocation69_spill] sm:$0xff] }
 0x673   :  { %2515 = vmatpush1.bf16.msra.mxu0 %v7107_v7  ;;  %2556 = vmatpush1.bf16.msra.mxu1 %v7108_v18  ;;  %v7118_v7 = vld [vmem:[#allocation101_spill] sm:$0xff] }
 0x674   :  { %2516 = vmatprep.subr.bf16.mxu0 %v7109_v60  ;;  %2557 = vmatprep.subr.bf16.mxu1 %v7110_v2 }
 0x677   :  { %2517 = vmatpush1.bf16.msra.mxu0 %v7111_v36  ;;  %2558 = vmatpush1.bf16.msra.mxu1 %v7112_v38 }
 0x678   :  { %2518 = vmatprep.subr.bf16.mxu0 %v7113_v30  ;;  %2559 = vmatprep.subr.bf16.mxu1 %v7114_v59 }
 0x67b   :  { %2519 = vmatpush1.bf16.msra.mxu0 %v7115_v21  ;;  %2560 = vmatpush1.bf16.msra.mxu1 %v7116_v20 }
 0x67c   :  { %2570 = vmatprep.subr.bf16.mxu0 %v7117_v17  ;;  %2611 = vmatprep.subr.bf16.mxu1 %v7118_v7 }
 0x6d1   :  { %v2296_v18 = vpop.f32.mrb[56].mxu0  ;;  %v2337_v60 = vpop.f32.mrb[72].mxu1 }
 0x6d2   :  { %v2426_v2 = vadd.f32 %v2296_v18, %v7119_v11  ;;  %v2428_v36 = vadd.f32 %v2337_v60, %v7120_v29  ;;  %v2298_v14 = vpop.f32.mrb[57].mxu0  ;;  %v2339_v38 = vpop.f32.mrb[73].mxu1 }
 0x6d3   :  { %v2427_v30 = vadd.f32 %v2298_v14, %v7121_v35  ;;  %v2429_v59 = vadd.f32 %v2339_v38, %v7122_v19  ;;  %v2300_v42 = vpop.f32.mrb[58].mxu0  ;;  %v2341_v21 = vpop.f32.mrb[74].mxu1  ;;  %v7126_v38 = vld [vmem:[#allocation196_spill] sm:$0xff] }
 0x6d4   :  { %v3575_v48 = vmul.f32 -1.442695, %v2426_v2  ;;  %v2301_v20 = vpop.f32.mrb[59].mxu0  ;;  %v2342_v34 = vpop.f32.mrb[75].mxu1  ;;  %v7125_v2 = vld [vmem:[#allocation173_spill] sm:$0xff] }
 0x6d5   :  { %v3576_v17 = vmul.f32 -1.442695, %v2427_v30  ;;  %v3577_v7 = vmul.f32 -1.442695, %v2429_v59  ;;  %v7123_v20 = vld [vmem:[#allocation107_spill] sm:$0xff] }
 0x6d6   :  { %3804 = vpow2.f32 %v3575_v48 }
 0x6d7   :  { %3806 = vpow2.f32 %v3576_v17 }
 0x6d8   :  { %3808 = vpow2.f32 %v3577_v7 }
 0x6d9   :  { %3810 = vtanh.f32 %v2428_v36 }
 0x6e0   :  { %v3805_v0 = vpop.eup %3804 }
 0x6e1   :  { %v3807_v16 = vpop.eup %3806  ;;  %v2437_v11 = vadd.f32 1.0, %v3805_v0 }
 0x6e2   :  { %v2443_v29 = vadd.f32 1.0, %v3807_v16  ;;  %v3809_v35 = vpop.eup %3808 }
 0x6e3   :  { %3812 = vrcp.f32 %v2437_v11  ;;  %v3811_v14 = vpop.eup %3810  ;;  %v2450_v18 = vadd.f32 1.0, %v3809_v35  ;;  %v7127_v35 = vld [vmem:[#allocation175_spill] sm:$0xff] }
 0x6e4   :  { %3814 = vrcp.f32 %v2443_v29 }
 0x6e5   :  { %3816 = vrcp.f32 %v2450_v18 }
 0x6ed   :  { %v3813_v19 = vpop.eup %3812 }
 0x6ee   :  { %v3815_v42 = vpop.eup %3814  ;;  %v2454_v21 = vmul.f32 %v3813_v19, %v3811_v14  ;;  %v7128_v19 = vld [vmem:[#allocation197_spill] sm:$0xff] }
 0x6ef   :  { %v2453_v34 = vmul.f32 %v3815_v42, %v7123_v20  ;;  %v3817_v48 = vpop.eup %3816 }
 0x6f1   :  { %v2455_v30 = vadd.f32 %v2454_v21, %v2453_v34 }
 0x6f3   :  { %3818 = vtanh.f32 %v2455_v30  ;;  %v5757_v0 = vsel %vm2257_vm2, %v2455_v30, %v7123_v20 }
 0x6f4   :  { %7124 = vst [vmem:[#allocation77_spill] sm:$0xff] %v5757_v0 }
 0x6fd   :  { %v3819_v16 = vpop.eup %3818 }
 0x6fe   :  { %v2457_v59 = vmul.f32 %v3819_v16, %v3817_v48 }
 0x711   :  { %v2378_v17 = vpop.f32.mrb[60].mxu0  ;;  %v2419_v7 = vpop.f32.mrb[76].mxu1 }
 0x712   :  { %v2430_v36 = vadd.f32 %v2378_v17, %v7125_v2  ;;  %v2432_v60 = vadd.f32 %v2419_v7, %v7126_v38  ;;  %v2380_v11 = vpop.f32.mrb[61].mxu0  ;;  %v2421_v29 = vpop.f32.mrb[77].mxu1 }
 0x713   :  { %v2431_v14 = vadd.f32 %v2380_v11, %v7127_v35  ;;  %v2433_v42 = vadd.f32 %v2421_v29, %v7128_v19  ;;  %v2382_v21 = vpop.f32.mrb[62].mxu0  ;;  %v2423_v18 = vpop.f32.mrb[78].mxu1 }
 0x714   :  { %v3578_v34 = vmul.f32 -1.442695, %v2430_v36  ;;  %v2383_v20 = vpop.f32.mrb[63].mxu0  ;;  %v2424_v30 = vpop.f32.mrb[79].mxu1  ;;  %v5772_v21 = vsel %vm2257_vm2, %v2457_v59, %v5604_v61  ;;  %v7131_v61 = vld [vmem:[#allocation136_spill] sm:$0xff]  ;;  %v7133_v59 = vld [vmem:[#allocation137_spill] sm:$0xff] }
 0x715   :  { %v3579_v0 = vmul.f32 -1.442695, %v2431_v14  ;;  %v3580_v48 = vmul.f32 -1.442695, %v2433_v42  ;;  %v7134_v20 = vld [vmem:[#allocation112_spill] sm:$0xff]  ;;  %v7135_v30 = vld [vmem:[#allocation138_spill] sm:$0xff] }
 0x716   :  { %3820 = vpow2.f32 %v3578_v34 }
 0x717   :  { %3822 = vpow2.f32 %v3579_v0 }
 0x718   :  { %3824 = vpow2.f32 %v3580_v48  ;;  %v7136_v48 = vld [vmem:[#allocation114_spill] sm:$0xff] }
 0x719   :  { %3826 = vtanh.f32 %v2432_v60 }
 0x720   :  { %v3821_v16 = vpop.eup %3820 }
 0x721   :  { %v3823_v32 = vpop.eup %3822  ;;  %v2463_v17 = vadd.f32 1.0, %v3821_v16  ;;  %v7137_v16 = vld [vmem:[#allocation139_spill] sm:$0xff] }
 0x722   :  { %v2469_v7 = vadd.f32 1.0, %v3823_v32  ;;  %v3825_v2 = vpop.eup %3824 }
 0x723   :  { %3828 = vrcp.f32 %v2463_v17  ;;  %v3827_v38 = vpop.eup %3826  ;;  %v2476_v36 = vadd.f32 1.0, %v3825_v2  ;;  %v7138_v17 = vld [vmem:[#allocation116_spill] sm:$0xff]  ;;  %v7140_v2 = vld [vmem:[#allocation118_spill] sm:$0xff] }
 0x724   :  { %3830 = vrcp.f32 %v2469_v7  ;;  %v7139_v7 = vld [vmem:[#allocation140_spill] sm:$0xff] }
 0x725   :  { %3832 = vrcp.f32 %v2476_v36  ;;  %v7145_v36 = vld [vmem:[#allocation143_spill] sm:$0xff] }
 0x72d   :  { %v3829_v11 = vpop.eup %3828 }
 0x72e   :  { %v3831_v29 = vpop.eup %3830  ;;  %v2480_v35 = vmul.f32 %v3829_v11, %v3827_v38  ;;  %v7141_v38 = vld [vmem:[#allocation141_spill] sm:$0xff]  ;;  %v7142_v11 = vld [vmem:[#allocation120_spill] sm:$0xff] }
 0x72f   :  { %v2479_v19 = vmul.f32 %v3831_v29, %v5599_v47  ;;  %v3833_v60 = vpop.eup %3832  ;;  %v7143_v29 = vld [vmem:[#allocation142_spill] sm:$0xff] }
 0x731   :  { %v2481_v14 = vadd.f32 %v2480_v35, %v2479_v19  ;;  %v7144_v35 = vld [vmem:[#allocation122_spill] sm:$0xff]  ;;  %v7146_v19 = vld [vmem:[#allocation124_spill] sm:$0xff] }
 0x733   :  { %3834 = vtanh.f32 %v2481_v14  ;;  %v5767_v0 = vsel %vm2226_vm1, %v2481_v14, %v5599_v47  ;;  %v5783_v47 = vpack.c.bf16 %v5772_v21, %v5772_v21  ;;  %v7147_v14 = vld [vmem:[#allocation144_spill] sm:$0xff] }
 0x73d   :  { %v3835_v32 = vpop.eup %3834 }
 0x73e   :  { %v2483_v42 = vmul.f32 %v3835_v32, %v3833_v60  ;;  %v7148_v60 = vld [vmem:[#allocation126_spill] sm:$0xff]  ;;  %v7149_v32 = vld [vmem:[#allocation145_spill] sm:$0xff] }
 0x740   :  { %v5777_v18 = vsel %vm2226_vm1, %v2483_v42, %v5609_v15  ;;  %v7132_v15 = vld [vmem:[#allocation110_spill] sm:$0xff]  ;;  %v7150_v42 = vld [vmem:[#allocation128_spill] sm:$0xff] }
 0x741   :  { %v2487_v34 = vpack.c.bf16 %v5777_v18, %v5777_v18 }
 0x743   :  { %2520 = vmatprep.mubr.bf16.mxu0 %v2487_v34  ;;  %2561 = vmatprep.mubr.bf16.mxu1 %v2487_v34 }
 0x744   :  { %2521 = vmatmul.mubr.bf16.vlgmr.msra.gmra.mrb[64].mxu0 %v5783_v47  ;;  %2562 = vmatmul.mubr.bf16.vlgmr.msra.gmra.mrb[80].mxu1 %v5783_v47 }
 0x745   :  { %2571 = vmatpush1.bf16.msra.mxu0 %v6722_v52  ;;  %2612 = vmatpush1.bf16.msra.mxu1 %v6723_v1 }
 0x746   :  { %2602 = vmatprep.mubr.bf16.mxu0 %v2487_v34  ;;  %2643 = vmatprep.mubr.bf16.mxu1 %v2487_v34  ;;  %v7151_v34 = vld [vmem:[#allocation146_spill] sm:$0xff] }
 0x747   :  { %2572 = vmatprep.subr.bf16.mxu0 %v6724_v27  ;;  %2613 = vmatprep.subr.bf16.mxu1 %v6725_v43 }
 0x749   :  { %2573 = vmatpush1.bf16.msra.mxu0 %v6726_v41  ;;  %2614 = vmatpush1.bf16.msra.mxu1 %v6727_v23 }
 0x74a   :  { %2574 = vmatprep.subr.bf16.mxu0 %v6728_v54  ;;  %2615 = vmatprep.subr.bf16.mxu1 %v6729_v45 }
 0x74d   :  { %2575 = vmatpush1.bf16.msra.mxu0 %v6730_v44  ;;  %2616 = vmatpush1.bf16.msra.mxu1 %v6731_v12 }
 0x74e   :  { %2576 = vmatprep.subr.bf16.mxu0 %v6732_v22  ;;  %2617 = vmatprep.subr.bf16.mxu1 %v6733_v57 }
 0x751   :  { %2577 = vmatpush1.bf16.msra.mxu0 %v6734_v9  ;;  %2618 = vmatpush1.bf16.msra.mxu1 %v6735_v24 }
 0x752   :  { %2578 = vmatprep.subr.bf16.mxu0 %v6736_v37  ;;  %2619 = vmatprep.subr.bf16.mxu1 %v6827_v8 }
 0x755   :  { %2579 = vmatpush1.bf16.msra.mxu0 %v6738_v50  ;;  %2620 = vmatpush1.bf16.msra.mxu1 %v6828_v3 }
 0x756   :  { %2580 = vmatprep.subr.bf16.mxu0 %v6739_v56  ;;  %2621 = vmatprep.subr.bf16.mxu1 %v6829_v31 }
 0x759   :  { %2581 = vmatpush1.bf16.msra.mxu0 %v6741_v5  ;;  %2622 = vmatpush1.bf16.msra.mxu1 %v6830_v33 }
 0x75a   :  { %2582 = vmatprep.subr.bf16.mxu0 %v6742_v58  ;;  %2623 = vmatprep.subr.bf16.mxu1 %v6831_v39 }
 0x75d   :  { %2583 = vmatpush1.bf16.msra.mxu0 %v6744_v49  ;;  %2624 = vmatpush1.bf16.msra.mxu1 %v6832_v4 }
 0x75e   :  { %2584 = vmatprep.subr.bf16.mxu0 %v6745_v63  ;;  %2625 = vmatprep.subr.bf16.mxu1 %v6833_v6 }
 0x761   :  { %2585 = vmatpush1.bf16.msra.mxu0 %v6746_v62  ;;  %2626 = vmatpush1.bf16.msra.mxu1 %v6834_v25 }
 0x762   :  { %2586 = vmatprep.subr.bf16.mxu0 %v6747_v53  ;;  %2627 = vmatprep.subr.bf16.mxu1 %v6835_v40 }
 0x765   :  { %2587 = vmatpush1.bf16.msra.mxu0 %v6748_v26  ;;  %2628 = vmatpush1.bf16.msra.mxu1 %v6836_v13 }
 0x766   :  { %2588 = vmatprep.subr.bf16.mxu0 %v6749_v46  ;;  %2629 = vmatprep.subr.bf16.mxu1 %v6837_v10 }
 0x769   :  { %2589 = vmatpush1.bf16.msra.mxu0 %v6750_v51  ;;  %2630 = vmatpush1.bf16.msra.mxu1 %v7129_v28 }
 0x76a   :  { %2590 = vmatprep.subr.bf16.mxu0 %v7130_v55  ;;  %2631 = vmatprep.subr.bf16.mxu1 %v7131_v61 }
 0x76d   :  { %2591 = vmatpush1.bf16.msra.mxu0 %v7132_v15  ;;  %2632 = vmatpush1.bf16.msra.mxu1 %v7133_v59 }
 0x76e   :  { %2592 = vmatprep.subr.bf16.mxu0 %v7134_v20  ;;  %2633 = vmatprep.subr.bf16.mxu1 %v7135_v30 }
 0x771   :  { %2593 = vmatpush1.bf16.msra.mxu0 %v7136_v48  ;;  %2634 = vmatpush1.bf16.msra.mxu1 %v7137_v16  ;;  %v7223_v16 = vld [vmem:[#allocation182_spill] sm:$0xff] }
 0x772   :  { %2594 = vmatprep.subr.bf16.mxu0 %v7138_v17  ;;  %2635 = vmatprep.subr.bf16.mxu1 %v7139_v7  ;;  %v7222_v17 = vld [vmem:[#allocation152_spill] sm:$0xff] }
 0x775   :  { %2595 = vmatpush1.bf16.msra.mxu0 %v7140_v2  ;;  %2636 = vmatpush1.bf16.msra.mxu1 %v7141_v38  ;;  %v7152_v38 = vld [vmem:[#allocation130_spill] sm:$0xff]  ;;  %v7221_v2 = vld [vmem:[#allocation180_spill] sm:$0xff] }
 0x776   :  { %2596 = vmatprep.subr.bf16.mxu0 %v7142_v11  ;;  %2637 = vmatprep.subr.bf16.mxu1 %v7143_v29  ;;  %v7153_v11 = vld [vmem:[#allocation147_spill] sm:$0xff]  ;;  %v7154_v29 = vld [vmem:[#allocation20_spill] sm:$0xff] }
 0x779   :  { %2597 = vmatpush1.bf16.msra.mxu0 %v7144_v35  ;;  %2638 = vmatpush1.bf16.msra.mxu1 %v7145_v36  ;;  %v7155_v35 = vld [vmem:[#allocation23_spill] sm:$0xff]  ;;  %v7220_v36 = vld [vmem:[#allocation150_spill] sm:$0xff] }
 0x77a   :  { %2598 = vmatprep.subr.bf16.mxu0 %v7146_v19  ;;  %2639 = vmatprep.subr.bf16.mxu1 %v7147_v14  ;;  %v7156_v14 = vld [vmem:[#allocation21_spill] sm:$0xff]  ;;  %v7165_v19 = vld [vmem:[#allocation47_spill] sm:$0xff] }
 0x77d   :  { %2599 = vmatpush1.bf16.msra.mxu0 %v7148_v60  ;;  %2640 = vmatpush1.bf16.msra.mxu1 %v7149_v32  ;;  %v7157_v60 = vld [vmem:[#allocation39_spill] sm:$0xff]  ;;  %v7158_v32 = vld [vmem:[#allocation22_spill] sm:$0xff] }
 0x77e   :  { %2600 = vmatprep.subr.bf16.mxu0 %v7150_v42  ;;  %2641 = vmatprep.subr.bf16.mxu1 %v7151_v34  ;;  %v7159_v42 = vld [vmem:[#allocation41_spill] sm:$0xff]  ;;  %v7160_v34 = vld [vmem:[#allocation24_spill] sm:$0xff] }
 0x781   :  { %2601 = vmatpush1.bf16.msra.mxu0 %v7152_v38  ;;  %2642 = vmatpush1.bf16.msra.mxu1 %v7153_v11  ;;  %v7161_v38 = vld [vmem:[#allocation43_spill] sm:$0xff]  ;;  %v7162_v11 = vld [vmem:[#allocation25_spill] sm:$0xff] }
 0x782   :  { %2714 = vmatprep.subr.bf16.mxu0 %v7154_v29  ;;  %2755 = vmatprep.subr.bf16.mxu1 %v7155_v35  ;;  %v7163_v29 = vld [vmem:[#allocation45_spill] sm:$0xff]  ;;  %v7164_v35 = vld [vmem:[#allocation26_spill] sm:$0xff] }
 0x784   :  { %2603 = vmatmul.mubr.bf16.vlgmr.msra.gmra.mrb[68].mxu0 %v5783_v47  ;;  %2644 = vmatmul.mubr.bf16.vlgmr.msra.gmra.mrb[84].mxu1 %v5783_v47  ;;  %v7166_v47 = vld [vmem:[#allocation27_spill] sm:$0xff] }
 0x785   :  { %2715 = vmatpush1.bf16.msra.mxu0 %v7156_v14  ;;  %2756 = vmatpush1.bf16.msra.mxu1 %v7157_v60  ;;  %v7167_v14 = vld [vmem:[#allocation49_spill] sm:$0xff]  ;;  %v7168_v60 = vld [vmem:[#allocation28_spill] sm:$0xff] }
 0x786   :  { %2716 = vmatprep.subr.bf16.mxu0 %v7158_v32  ;;  %2757 = vmatprep.subr.bf16.mxu1 %v7159_v42  ;;  %v7169_v32 = vld [vmem:[#allocation51_spill] sm:$0xff]  ;;  %v7170_v42 = vld [vmem:[#allocation29_spill] sm:$0xff] }
 0x789   :  { %2717 = vmatpush1.bf16.msra.mxu0 %v7160_v34  ;;  %2758 = vmatpush1.bf16.msra.mxu1 %v7161_v38  ;;  %v7171_v34 = vld [vmem:[#allocation53_spill] sm:$0xff]  ;;  %v7172_v38 = vld [vmem:[#allocation30_spill] sm:$0xff] }
 0x78a   :  { %2718 = vmatprep.subr.bf16.mxu0 %v7162_v11  ;;  %2759 = vmatprep.subr.bf16.mxu1 %v7163_v29  ;;  %v7173_v11 = vld [vmem:[#allocation55_spill] sm:$0xff] }
 0x78b   :  { %v7174_v29 = vld [vmem:[#allocation31_spill] sm:$0xff] }
 0x78d   :  { %2719 = vmatpush1.bf16.msra.mxu0 %v7164_v35  ;;  %2760 = vmatpush1.bf16.msra.mxu1 %v7165_v19  ;;  %v7175_v35 = vld [vmem:[#allocation57_spill] sm:$0xff]  ;;  %v7176_v19 = vld [vmem:[#allocation32_spill] sm:$0xff] }
 0x78e   :  { %2720 = vmatprep.subr.bf16.mxu0 %v7166_v47  ;;  %2761 = vmatprep.subr.bf16.mxu1 %v7167_v14  ;;  %v7177_v47 = vld [vmem:[#allocation59_spill] sm:$0xff]  ;;  %v7178_v14 = vld [vmem:[#allocation33_spill] sm:$0xff] }
 0x791   :  { %2721 = vmatpush1.bf16.msra.mxu0 %v7168_v60  ;;  %2762 = vmatpush1.bf16.msra.mxu1 %v7169_v32  ;;  %v7179_v60 = vld [vmem:[#allocation61_spill] sm:$0xff]  ;;  %v7180_v32 = vld [vmem:[#allocation34_spill] sm:$0xff] }
 0x792   :  { %2722 = vmatprep.subr.bf16.mxu0 %v7170_v42  ;;  %2763 = vmatprep.subr.bf16.mxu1 %v7171_v34  ;;  %v7181_v42 = vld [vmem:[#allocation63_spill] sm:$0xff] }
 0x793   :  { %v7182_v34 = vld [vmem:[#allocation35_spill] sm:$0xff] }
 0x795   :  { %2723 = vmatpush1.bf16.msra.mxu0 %v7172_v38  ;;  %2764 = vmatpush1.bf16.msra.mxu1 %v7173_v11  ;;  %v7183_v38 = vld [vmem:[#allocation65_spill] sm:$0xff]  ;;  %v7184_v11 = vld [vmem:[#allocation36_spill] sm:$0xff] }
 0x796   :  { %2724 = vmatprep.subr.bf16.mxu0 %v7174_v29  ;;  %2765 = vmatprep.subr.bf16.mxu1 %v7175_v35  ;;  %v7185_v29 = vld [vmem:[#allocation67_spill] sm:$0xff]  ;;  %v7186_v35 = vld [vmem:[#allocation37_spill] sm:$0xff] }
 0x799   :  { %2725 = vmatpush1.bf16.msra.mxu0 %v7176_v19  ;;  %2766 = vmatpush1.bf16.msra.mxu1 %v7177_v47  ;;  %v7187_v19 = vld [vmem:[#allocation68_spill] sm:$0xff]  ;;  %v7188_v47 = vld [vmem:[#allocation38_spill] sm:$0xff] }
 0x79a   :  { %2726 = vmatprep.subr.bf16.mxu0 %v7178_v14  ;;  %2767 = vmatprep.subr.bf16.mxu1 %v7179_v60  ;;  %v7189_v14 = vld [vmem:[#allocation70_spill] sm:$0xff]  ;;  %v7190_v60 = vld [vmem:[#allocation40_spill] sm:$0xff] }
 0x79d   :  { %2727 = vmatpush1.bf16.msra.mxu0 %v7180_v32  ;;  %2768 = vmatpush1.bf16.msra.mxu1 %v7181_v42  ;;  %v7191_v32 = vld [vmem:[#allocation72_spill] sm:$0xff]  ;;  %v7192_v42 = vld [vmem:[#allocation42_spill] sm:$0xff] }
 0x79e   :  { %2728 = vmatprep.subr.bf16.mxu0 %v7182_v34  ;;  %2769 = vmatprep.subr.bf16.mxu1 %v7183_v38  ;;  %v7193_v34 = vld [vmem:[#allocation74_spill] sm:$0xff]  ;;  %v7194_v38 = vld [vmem:[#allocation44_spill] sm:$0xff] }
 0x7a1   :  { %2729 = vmatpush1.bf16.msra.mxu0 %v7184_v11  ;;  %2770 = vmatpush1.bf16.msra.mxu1 %v7185_v29  ;;  %v7195_v11 = vld [vmem:[#allocation76_spill] sm:$0xff]  ;;  %v7196_v29 = vld [vmem:[#allocation46_spill] sm:$0xff] }
 0x7a2   :  { %2730 = vmatprep.subr.bf16.mxu0 %v7186_v35  ;;  %2771 = vmatprep.subr.bf16.mxu1 %v7187_v19  ;;  %v7197_v35 = vld [vmem:[#allocation78_spill] sm:$0xff]  ;;  %v7198_v19 = vld [vmem:[#allocation48_spill] sm:$0xff] }
 0x7a5   :  { %2731 = vmatpush1.bf16.msra.mxu0 %v7188_v47  ;;  %2772 = vmatpush1.bf16.msra.mxu1 %v7189_v14  ;;  %v7199_v47 = vld [vmem:[#allocation80_spill] sm:$0xff]  ;;  %v7200_v14 = vld [vmem:[#allocation50_spill] sm:$0xff] }
 0x7a6   :  { %2732 = vmatprep.subr.bf16.mxu0 %v7190_v60  ;;  %2773 = vmatprep.subr.bf16.mxu1 %v7191_v32  ;;  %v7201_v60 = vld [vmem:[#allocation82_spill] sm:$0xff]  ;;  %v7202_v32 = vld [vmem:[#allocation52_spill] sm:$0xff] }
 0x7a9   :  { %2733 = vmatpush1.bf16.msra.mxu0 %v7192_v42  ;;  %2774 = vmatpush1.bf16.msra.mxu1 %v7193_v34  ;;  %v7203_v42 = vld [vmem:[#allocation84_spill] sm:$0xff]  ;;  %v7204_v34 = vld [vmem:[#allocation54_spill] sm:$0xff] }
 0x7aa   :  { %2734 = vmatprep.subr.bf16.mxu0 %v7194_v38  ;;  %2775 = vmatprep.subr.bf16.mxu1 %v7195_v11  ;;  %v7205_v38 = vld [vmem:[#allocation86_spill] sm:$0xff]  ;;  %v7206_v11 = vld [vmem:[#allocation56_spill] sm:$0xff] }
 0x7ad   :  { %2735 = vmatpush1.bf16.msra.mxu0 %v7196_v29  ;;  %2776 = vmatpush1.bf16.msra.mxu1 %v7197_v35  ;;  %v7207_v29 = vld [vmem:[#allocation88_spill] sm:$0xff]  ;;  %v7208_v35 = vld [vmem:[#allocation58_spill] sm:$0xff] }
 0x7ae   :  { %2736 = vmatprep.subr.bf16.mxu0 %v7198_v19  ;;  %2777 = vmatprep.subr.bf16.mxu1 %v7199_v47  ;;  %v7209_v19 = vld [vmem:[#allocation90_spill] sm:$0xff]  ;;  %v7210_v47 = vld [vmem:[#allocation60_spill] sm:$0xff] }
 0x7b1   :  { %2737 = vmatpush1.bf16.msra.mxu0 %v7200_v14  ;;  %2778 = vmatpush1.bf16.msra.mxu1 %v7201_v60  ;;  %v7211_v14 = vld [vmem:[#allocation92_spill] sm:$0xff]  ;;  %v7212_v60 = vld [vmem:[#allocation62_spill] sm:$0xff] }
 0x7b2   :  { %2738 = vmatprep.subr.bf16.mxu0 %v7202_v32  ;;  %2779 = vmatprep.subr.bf16.mxu1 %v7203_v42  ;;  %v7213_v32 = vld [vmem:[#allocation94_spill] sm:$0xff]  ;;  %v7214_v42 = vld [vmem:[#allocation64_spill] sm:$0xff] }
 0x7b5   :  { %2739 = vmatpush1.bf16.msra.mxu0 %v7204_v34  ;;  %2780 = vmatpush1.bf16.msra.mxu1 %v7205_v38  ;;  %v7215_v34 = vld [vmem:[#allocation96_spill] sm:$0xff]  ;;  %v7216_v38 = vld [vmem:[#allocation66_spill] sm:$0xff] }
 0x7b6   :  { %2740 = vmatprep.subr.bf16.mxu0 %v7206_v11  ;;  %2781 = vmatprep.subr.bf16.mxu1 %v7207_v29  ;;  %v7217_v11 = vld [vmem:[#allocation98_spill] sm:$0xff]  ;;  %v7218_v29 = vld [vmem:[#allocation69_spill] sm:$0xff] }
 0x7b9   :  { %2741 = vmatpush1.bf16.msra.mxu0 %v7208_v35  ;;  %2782 = vmatpush1.bf16.msra.mxu1 %v7209_v19  ;;  %v7219_v35 = vld [vmem:[#allocation101_spill] sm:$0xff] }
 0x7ba   :  { %2742 = vmatprep.subr.bf16.mxu0 %v7210_v47  ;;  %2783 = vmatprep.subr.bf16.mxu1 %v7211_v14 }
 0x7bd   :  { %2743 = vmatpush1.bf16.msra.mxu0 %v7212_v60  ;;  %2784 = vmatpush1.bf16.msra.mxu1 %v7213_v32 }
 0x7be   :  { %2744 = vmatprep.subr.bf16.mxu0 %v7214_v42  ;;  %2785 = vmatprep.subr.bf16.mxu1 %v7215_v34 }
 0x7c1   :  { %2745 = vmatpush1.bf16.msra.mxu0 %v7216_v38  ;;  %2786 = vmatpush1.bf16.msra.mxu1 %v7217_v11 }
 0x7c2   :  { %2796 = vmatprep.subr.bf16.mxu0 %v7218_v29  ;;  %2837 = vmatprep.subr.bf16.mxu1 %v7219_v35 }
 0x817   :  { %v2522_v19 = vpop.f32.mrb[64].mxu0  ;;  %v2563_v47 = vpop.f32.mrb[80].mxu1 }
 0x818   :  { %v2652_v14 = vadd.f32 %v2522_v19, %v7220_v36  ;;  %v2654_v60 = vadd.f32 %v2563_v47, %v7221_v2  ;;  %v2524_v7 = vpop.f32.mrb[65].mxu0  ;;  %v2565_v32 = vpop.f32.mrb[81].mxu1  ;;  %v7228_v47 = vld [vmem:[#allocation194_spill] sm:$0xff] }
 0x819   :  { %v2653_v42 = vadd.f32 %v2524_v7, %v7222_v17  ;;  %v2655_v34 = vadd.f32 %v2565_v32, %v7223_v16  ;;  %v2526_v48 = vpop.f32.mrb[66].mxu0  ;;  %v2567_v38 = vpop.f32.mrb[82].mxu1 }
 0x81a   :  { %v3581_v30 = vmul.f32 -1.442695, %v2652_v14  ;;  %v2527_v11 = vpop.f32.mrb[67].mxu0  ;;  %v2568_v20 = vpop.f32.mrb[83].mxu1 }
 0x81b   :  { %v3582_v29 = vmul.f32 -1.442695, %v2653_v42  ;;  %v3583_v35 = vmul.f32 -1.442695, %v2655_v34  ;;  %v7224_v11 = vld [vmem:[#allocation77_spill] sm:$0xff] }
 0x81c   :  { %3836 = vpow2.f32 %v3581_v30  ;;  %v7227_v42 = vld [vmem:[#allocation169_spill] sm:$0xff]  ;;  %v7234_v30 = vld [vmem:[#allocation110_spill] sm:$0xff] }
 0x81d   :  { %3838 = vpow2.f32 %v3582_v29 }
 0x81e   :  { %3840 = vpow2.f32 %v3583_v35 }
 0x81f   :  { %3842 = vtanh.f32 %v2654_v60 }
 0x826   :  { %v3837_v59 = vpop.eup %3836 }
 0x827   :  { %v3839_v15 = vpop.eup %3838  ;;  %v2663_v36 = vadd.f32 1.0, %v3837_v59 }
 0x828   :  { %v2669_v2 = vadd.f32 1.0, %v3839_v15  ;;  %v3841_v17 = vpop.eup %3840 }
 0x829   :  { %3844 = vrcp.f32 %v2663_v36  ;;  %v3843_v7 = vpop.eup %3842  ;;  %v2676_v19 = vadd.f32 1.0, %v3841_v17 }
 0x82a   :  { %3846 = vrcp.f32 %v2669_v2 }
 0x82b   :  { %3848 = vrcp.f32 %v2676_v19 }
 0x833   :  { %v3845_v16 = vpop.eup %3844 }
 0x834   :  { %v3847_v48 = vpop.eup %3846  ;;  %v2680_v38 = vmul.f32 %v3845_v16, %v3843_v7  ;;  %v7229_v7 = vld [vmem:[#allocation171_spill] sm:$0xff] }
 0x835   :  { %v2679_v20 = vmul.f32 %v3847_v48, %v7224_v11  ;;  %v3849_v29 = vpop.eup %3848  ;;  %v7230_v48 = vld [vmem:[#allocation195_spill] sm:$0xff] }
 0x837   :  { %v2681_v14 = vadd.f32 %v2680_v38, %v2679_v20 }
 0x839   :  { %3850 = vtanh.f32 %v2681_v14  ;;  %v5925_v59 = vsel %vm2019_vm0, %v2681_v14, %v7224_v11 }
 0x83a   :  { %7226 = vst [vmem:[#allocation109_spill] sm:$0xff] %v5925_v59 }
 0x843   :  { %v3851_v15 = vpop.eup %3850 }
 0x844   :  { %v2683_v35 = vmul.f32 %v3851_v15, %v3849_v29 }
 0x857   :  { %v2604_v60 = vpop.f32.mrb[68].mxu0  ;;  %v2645_v32 = vpop.f32.mrb[84].mxu1 }
 0x858   :  { %v2656_v34 = vadd.f32 %v2604_v60, %v7227_v42  ;;  %v2658_v36 = vadd.f32 %v2645_v32, %v7228_v47  ;;  %v2606_v2 = vpop.f32.mrb[69].mxu0  ;;  %v2647_v17 = vpop.f32.mrb[85].mxu1 }
 0x859   :  { %v2657_v16 = vadd.f32 %v2606_v2, %v7229_v7  ;;  %v2659_v38 = vadd.f32 %v2647_v17, %v7230_v48  ;;  %v2608_v19 = vpop.f32.mrb[70].mxu0  ;;  %v2649_v20 = vpop.f32.mrb[86].mxu1 }
 0x85a   :  { %v3584_v61 = vmul.f32 -1.442695, %v2656_v34  ;;  %v2609_v11 = vpop.f32.mrb[71].mxu0  ;;  %v2650_v14 = vpop.f32.mrb[87].mxu1  ;;  %v5940_v19 = vsel %vm2019_vm0, %v2683_v35, %v5772_v21  ;;  %v7232_v21 = vld [vmem:[#allocation108_spill] sm:$0xff]  ;;  %v7235_v35 = vld [vmem:[#allocation137_spill] sm:$0xff] }
 0x85b   :  { %v3585_v59 = vmul.f32 -1.442695, %v2657_v16  ;;  %v3586_v29 = vmul.f32 -1.442695, %v2659_v38  ;;  %v7236_v14 = vld [vmem:[#allocation112_spill] sm:$0xff] }
 0x85c   :  { %3852 = vpow2.f32 %v3584_v61  ;;  %v7249_v61 = vld [vmem:[#allocation144_spill] sm:$0xff] }
 0x85d   :  { %3854 = vpow2.f32 %v3585_v59 }
 0x85e   :  { %3856 = vpow2.f32 %v3586_v29  ;;  %v7237_v29 = vld [vmem:[#allocation138_spill] sm:$0xff] }
 0x85f   :  { %3858 = vtanh.f32 %v2658_v36 }
 0x866   :  { %v3853_v15 = vpop.eup %3852 }
 0x867   :  { %v3855_v55 = vpop.eup %3854  ;;  %v2689_v60 = vadd.f32 1.0, %v3853_v15  ;;  %v7238_v15 = vld [vmem:[#allocation114_spill] sm:$0xff] }
 0x868   :  { %v2695_v32 = vadd.f32 1.0, %v3855_v55  ;;  %v3857_v42 = vpop.eup %3856 }
 0x869   :  { %3860 = vrcp.f32 %v2689_v60  ;;  %v3859_v47 = vpop.eup %3858  ;;  %v2702_v34 = vadd.f32 1.0, %v3857_v42  ;;  %v7239_v60 = vld [vmem:[#allocation139_spill] sm:$0xff]  ;;  %v7241_v42 = vld [vmem:[#allocation140_spill] sm:$0xff] }
 0x86a   :  { %3862 = vrcp.f32 %v2695_v32  ;;  %v7240_v32 = vld [vmem:[#allocation116_spill] sm:$0xff] }
 0x86b   :  { %3864 = vrcp.f32 %v2702_v34  ;;  %v7246_v34 = vld [vmem:[#allocation122_spill] sm:$0xff] }
 0x873   :  { %v3861_v2 = vpop.eup %3860 }
 0x874   :  { %v3863_v17 = vpop.eup %3862  ;;  %v2706_v7 = vmul.f32 %v3861_v2, %v3859_v47  ;;  %v7242_v47 = vld [vmem:[#allocation118_spill] sm:$0xff]  ;;  %v7243_v2 = vld [vmem:[#allocation141_spill] sm:$0xff] }
 0x875   :  { %v2705_v48 = vmul.f32 %v3863_v17, %v5767_v0  ;;  %v3865_v36 = vpop.eup %3864  ;;  %v7244_v17 = vld [vmem:[#allocation120_spill] sm:$0xff] }
 0x877   :  { %v2707_v16 = vadd.f32 %v2706_v7, %v2705_v48  ;;  %v7245_v7 = vld [vmem:[#allocation142_spill] sm:$0xff]  ;;  %v7247_v48 = vld [vmem:[#allocation143_spill] sm:$0xff] }
 0x879   :  { %3866 = vtanh.f32 %v2707_v16  ;;  %v5935_v59 = vsel %vm1988_vm15, %v2707_v16, %v5767_v0  ;;  %v5951_v0 = vpack.c.bf16 %v5940_v19, %v5940_v19  ;;  %v7248_v16 = vld [vmem:[#allocation124_spill] sm:$0xff] }
 0x883   :  { %v3867_v55 = vpop.eup %3866 }
 0x884   :  { %v2709_v38 = vmul.f32 %v3867_v55, %v3865_v36  ;;  %v7250_v36 = vld [vmem:[#allocation126_spill] sm:$0xff]  ;;  %v7251_v55 = vld [vmem:[#allocation145_spill] sm:$0xff] }
 0x886   :  { %v5945_v20 = vsel %vm1988_vm15, %v2709_v38, %v5777_v18  ;;  %v7233_v18 = vld [vmem:[#allocation136_spill] sm:$0xff] }
 0x887   :  { %v2713_v11 = vpack.c.bf16 %v5945_v20, %v5945_v20  ;;  %v7252_v38 = vld [vmem:[#allocation128_spill] sm:$0xff] }
 0x889   :  { %2746 = vmatprep.mubr.bf16.mxu0 %v2713_v11  ;;  %2787 = vmatprep.mubr.bf16.mxu1 %v2713_v11 }
 0x88a   :  { %2747 = vmatmul.mubr.bf16.vlgmr.msra.gmra.mrb[72].mxu0 %v5951_v0  ;;  %2788 = vmatmul.mubr.bf16.vlgmr.msra.gmra.mrb[88].mxu1 %v5951_v0 }
 0x88b   :  { %2797 = vmatpush1.bf16.msra.mxu0 %v6722_v52  ;;  %2838 = vmatpush1.bf16.msra.mxu1 %v6723_v1 }
 0x88c   :  { %2828 = vmatprep.mubr.bf16.mxu0 %v2713_v11  ;;  %2869 = vmatprep.mubr.bf16.mxu1 %v2713_v11  ;;  %v7253_v11 = vld [vmem:[#allocation146_spill] sm:$0xff] }
 0x88d   :  { %2798 = vmatprep.subr.bf16.mxu0 %v6724_v27  ;;  %2839 = vmatprep.subr.bf16.mxu1 %v6725_v43 }
 0x88f   :  { %2799 = vmatpush1.bf16.msra.mxu0 %v6726_v41  ;;  %2840 = vmatpush1.bf16.msra.mxu1 %v6727_v23 }
 0x890   :  { %2800 = vmatprep.subr.bf16.mxu0 %v6728_v54  ;;  %2841 = vmatprep.subr.bf16.mxu1 %v6729_v45 }
 0x893   :  { %2801 = vmatpush1.bf16.msra.mxu0 %v6730_v44  ;;  %2842 = vmatpush1.bf16.msra.mxu1 %v6731_v12 }
 0x894   :  { %2802 = vmatprep.subr.bf16.mxu0 %v6732_v22  ;;  %2843 = vmatprep.subr.bf16.mxu1 %v6733_v57 }
 0x897   :  { %2803 = vmatpush1.bf16.msra.mxu0 %v6734_v9  ;;  %2844 = vmatpush1.bf16.msra.mxu1 %v6735_v24 }
 0x898   :  { %2804 = vmatprep.subr.bf16.mxu0 %v6736_v37  ;;  %2845 = vmatprep.subr.bf16.mxu1 %v6827_v8 }
 0x89b   :  { %2805 = vmatpush1.bf16.msra.mxu0 %v6738_v50  ;;  %2846 = vmatpush1.bf16.msra.mxu1 %v6828_v3 }
 0x89c   :  { %2806 = vmatprep.subr.bf16.mxu0 %v6739_v56  ;;  %2847 = vmatprep.subr.bf16.mxu1 %v6829_v31 }
 0x89f   :  { %2807 = vmatpush1.bf16.msra.mxu0 %v6741_v5  ;;  %2848 = vmatpush1.bf16.msra.mxu1 %v6830_v33 }
 0x8a0   :  { %2808 = vmatprep.subr.bf16.mxu0 %v6742_v58  ;;  %2849 = vmatprep.subr.bf16.mxu1 %v6831_v39 }
 0x8a3   :  { %2809 = vmatpush1.bf16.msra.mxu0 %v6744_v49  ;;  %2850 = vmatpush1.bf16.msra.mxu1 %v6832_v4 }
 0x8a4   :  { %2810 = vmatprep.subr.bf16.mxu0 %v6745_v63  ;;  %2851 = vmatprep.subr.bf16.mxu1 %v6833_v6 }
 0x8a7   :  { %2811 = vmatpush1.bf16.msra.mxu0 %v6746_v62  ;;  %2852 = vmatpush1.bf16.msra.mxu1 %v6834_v25 }
 0x8a8   :  { %2812 = vmatprep.subr.bf16.mxu0 %v6747_v53  ;;  %2853 = vmatprep.subr.bf16.mxu1 %v6835_v40 }
 0x8ab   :  { %2813 = vmatpush1.bf16.msra.mxu0 %v6748_v26  ;;  %2854 = vmatpush1.bf16.msra.mxu1 %v6836_v13 }
 0x8ac   :  { %2814 = vmatprep.subr.bf16.mxu0 %v6749_v46  ;;  %2855 = vmatprep.subr.bf16.mxu1 %v6837_v10 }
 0x8af   :  { %2815 = vmatpush1.bf16.msra.mxu0 %v6750_v51  ;;  %2856 = vmatpush1.bf16.msra.mxu1 %v7129_v28 }
 0x8b0   :  { %2816 = vmatprep.subr.bf16.mxu0 %v7232_v21  ;;  %2857 = vmatprep.subr.bf16.mxu1 %v7233_v18 }
 0x8b3   :  { %2817 = vmatpush1.bf16.msra.mxu0 %v7234_v30  ;;  %2858 = vmatpush1.bf16.msra.mxu1 %v7235_v35 }
 0x8b4   :  { %2818 = vmatprep.subr.bf16.mxu0 %v7236_v14  ;;  %2859 = vmatprep.subr.bf16.mxu1 %v7237_v29 }
 0x8b7   :  { %2819 = vmatpush1.bf16.msra.mxu0 %v7238_v15  ;;  %2860 = vmatpush1.bf16.msra.mxu1 %v7239_v60  ;;  %v7325_v60 = vld [vmem:[#allocation186_spill] sm:$0xff] }
 0x8b8   :  { %2820 = vmatprep.subr.bf16.mxu0 %v7240_v32  ;;  %2861 = vmatprep.subr.bf16.mxu1 %v7241_v42  ;;  %v7324_v32 = vld [vmem:[#allocation156_spill] sm:$0xff] }
 0x8bb   :  { %2821 = vmatpush1.bf16.msra.mxu0 %v7242_v47  ;;  %2862 = vmatpush1.bf16.msra.mxu1 %v7243_v2  ;;  %v7254_v2 = vld [vmem:[#allocation130_spill] sm:$0xff]  ;;  %v7323_v47 = vld [vmem:[#allocation184_spill] sm:$0xff] }
 0x8bc   :  { %2822 = vmatprep.subr.bf16.mxu0 %v7244_v17  ;;  %2863 = vmatprep.subr.bf16.mxu1 %v7245_v7  ;;  %v7255_v17 = vld [vmem:[#allocation147_spill] sm:$0xff]  ;;  %v7256_v7 = vld [vmem:[#allocation20_spill] sm:$0xff] }
 0x8bf   :  { %2823 = vmatpush1.bf16.msra.mxu0 %v7246_v34  ;;  %2864 = vmatpush1.bf16.msra.mxu1 %v7247_v48  ;;  %v7257_v34 = vld [vmem:[#allocation23_spill] sm:$0xff]  ;;  %v7322_v48 = vld [vmem:[#allocation154_spill] sm:$0xff] }
 0x8c0   :  { %2824 = vmatprep.subr.bf16.mxu0 %v7248_v16  ;;  %2865 = vmatprep.subr.bf16.mxu1 %v7249_v61  ;;  %v7258_v61 = vld [vmem:[#allocation21_spill] sm:$0xff]  ;;  %v7267_v16 = vld [vmem:[#allocation47_spill] sm:$0xff] }
 0x8c3   :  { %2825 = vmatpush1.bf16.msra.mxu0 %v7250_v36  ;;  %2866 = vmatpush1.bf16.msra.mxu1 %v7251_v55  ;;  %v7259_v36 = vld [vmem:[#allocation39_spill] sm:$0xff]  ;;  %v7260_v55 = vld [vmem:[#allocation22_spill] sm:$0xff] }
 0x8c4   :  { %2826 = vmatprep.subr.bf16.mxu0 %v7252_v38  ;;  %2867 = vmatprep.subr.bf16.mxu1 %v7253_v11  ;;  %v7261_v38 = vld [vmem:[#allocation41_spill] sm:$0xff]  ;;  %v7262_v11 = vld [vmem:[#allocation24_spill] sm:$0xff] }
 0x8c7   :  { %2827 = vmatpush1.bf16.msra.mxu0 %v7254_v2  ;;  %2868 = vmatpush1.bf16.msra.mxu1 %v7255_v17  ;;  %v7263_v2 = vld [vmem:[#allocation43_spill] sm:$0xff]  ;;  %v7264_v17 = vld [vmem:[#allocation25_spill] sm:$0xff] }
 0x8c8   :  { %2940 = vmatprep.subr.bf16.mxu0 %v7256_v7  ;;  %2981 = vmatprep.subr.bf16.mxu1 %v7257_v34  ;;  %v7265_v7 = vld [vmem:[#allocation45_spill] sm:$0xff]  ;;  %v7266_v34 = vld [vmem:[#allocation26_spill] sm:$0xff] }
 0x8ca   :  { %2829 = vmatmul.mubr.bf16.vlgmr.msra.gmra.mrb[76].mxu0 %v5951_v0  ;;  %2870 = vmatmul.mubr.bf16.vlgmr.msra.gmra.mrb[92].mxu1 %v5951_v0  ;;  %v7268_v0 = vld [vmem:[#allocation27_spill] sm:$0xff] }
 0x8cb   :  { %2941 = vmatpush1.bf16.msra.mxu0 %v7258_v61  ;;  %2982 = vmatpush1.bf16.msra.mxu1 %v7259_v36  ;;  %v7269_v61 = vld [vmem:[#allocation49_spill] sm:$0xff]  ;;  %v7270_v36 = vld [vmem:[#allocation28_spill] sm:$0xff] }
 0x8cc   :  { %2942 = vmatprep.subr.bf16.mxu0 %v7260_v55  ;;  %2983 = vmatprep.subr.bf16.mxu1 %v7261_v38  ;;  %v7271_v55 = vld [vmem:[#allocation51_spill] sm:$0xff]  ;;  %v7272_v38 = vld [vmem:[#allocation29_spill] sm:$0xff] }
 0x8cf   :  { %2943 = vmatpush1.bf16.msra.mxu0 %v7262_v11  ;;  %2984 = vmatpush1.bf16.msra.mxu1 %v7263_v2  ;;  %v7273_v11 = vld [vmem:[#allocation53_spill] sm:$0xff]  ;;  %v7274_v2 = vld [vmem:[#allocation30_spill] sm:$0xff] }
 0x8d0   :  { %2944 = vmatprep.subr.bf16.mxu0 %v7264_v17  ;;  %2985 = vmatprep.subr.bf16.mxu1 %v7265_v7  ;;  %v7275_v17 = vld [vmem:[#allocation55_spill] sm:$0xff] }
 0x8d1   :  { %v7276_v7 = vld [vmem:[#allocation31_spill] sm:$0xff] }
 0x8d3   :  { %2945 = vmatpush1.bf16.msra.mxu0 %v7266_v34  ;;  %2986 = vmatpush1.bf16.msra.mxu1 %v7267_v16  ;;  %v7277_v34 = vld [vmem:[#allocation57_spill] sm:$0xff]  ;;  %v7278_v16 = vld [vmem:[#allocation32_spill] sm:$0xff] }
 0x8d4   :  { %2946 = vmatprep.subr.bf16.mxu0 %v7268_v0  ;;  %2987 = vmatprep.subr.bf16.mxu1 %v7269_v61  ;;  %v7279_v0 = vld [vmem:[#allocation59_spill] sm:$0xff]  ;;  %v7280_v61 = vld [vmem:[#allocation33_spill] sm:$0xff] }
 0x8d7   :  { %2947 = vmatpush1.bf16.msra.mxu0 %v7270_v36  ;;  %2988 = vmatpush1.bf16.msra.mxu1 %v7271_v55  ;;  %v7281_v36 = vld [vmem:[#allocation61_spill] sm:$0xff]  ;;  %v7282_v55 = vld [vmem:[#allocation34_spill] sm:$0xff] }
 0x8d8   :  { %2948 = vmatprep.subr.bf16.mxu0 %v7272_v38  ;;  %2989 = vmatprep.subr.bf16.mxu1 %v7273_v11  ;;  %v7283_v38 = vld [vmem:[#allocation63_spill] sm:$0xff] }
 0x8d9   :  { %v7284_v11 = vld [vmem:[#allocation35_spill] sm:$0xff] }
 0x8db   :  { %2949 = vmatpush1.bf16.msra.mxu0 %v7274_v2  ;;  %2990 = vmatpush1.bf16.msra.mxu1 %v7275_v17  ;;  %v7285_v2 = vld [vmem:[#allocation65_spill] sm:$0xff]  ;;  %v7286_v17 = vld [vmem:[#allocation36_spill] sm:$0xff] }
 0x8dc   :  { %2950 = vmatprep.subr.bf16.mxu0 %v7276_v7  ;;  %2991 = vmatprep.subr.bf16.mxu1 %v7277_v34  ;;  %v7287_v7 = vld [vmem:[#allocation67_spill] sm:$0xff]  ;;  %v7288_v34 = vld [vmem:[#allocation37_spill] sm:$0xff] }
 0x8df   :  { %2951 = vmatpush1.bf16.msra.mxu0 %v7278_v16  ;;  %2992 = vmatpush1.bf16.msra.mxu1 %v7279_v0  ;;  %v7289_v16 = vld [vmem:[#allocation68_spill] sm:$0xff]  ;;  %v7290_v0 = vld [vmem:[#allocation38_spill] sm:$0xff] }
 0x8e0   :  { %2952 = vmatprep.subr.bf16.mxu0 %v7280_v61  ;;  %2993 = vmatprep.subr.bf16.mxu1 %v7281_v36  ;;  %v7291_v61 = vld [vmem:[#allocation70_spill] sm:$0xff]  ;;  %v7292_v36 = vld [vmem:[#allocation40_spill] sm:$0xff] }
 0x8e3   :  { %2953 = vmatpush1.bf16.msra.mxu0 %v7282_v55  ;;  %2994 = vmatpush1.bf16.msra.mxu1 %v7283_v38  ;;  %v7293_v55 = vld [vmem:[#allocation72_spill] sm:$0xff]  ;;  %v7294_v38 = vld [vmem:[#allocation42_spill] sm:$0xff] }
 0x8e4   :  { %2954 = vmatprep.subr.bf16.mxu0 %v7284_v11  ;;  %2995 = vmatprep.subr.bf16.mxu1 %v7285_v2  ;;  %v7295_v11 = vld [vmem:[#allocation74_spill] sm:$0xff]  ;;  %v7296_v2 = vld [vmem:[#allocation44_spill] sm:$0xff] }
 0x8e7   :  { %2955 = vmatpush1.bf16.msra.mxu0 %v7286_v17  ;;  %2996 = vmatpush1.bf16.msra.mxu1 %v7287_v7  ;;  %v7297_v17 = vld [vmem:[#allocation76_spill] sm:$0xff]  ;;  %v7298_v7 = vld [vmem:[#allocation46_spill] sm:$0xff] }
 0x8e8   :  { %2956 = vmatprep.subr.bf16.mxu0 %v7288_v34  ;;  %2997 = vmatprep.subr.bf16.mxu1 %v7289_v16  ;;  %v7299_v34 = vld [vmem:[#allocation78_spill] sm:$0xff]  ;;  %v7300_v16 = vld [vmem:[#allocation48_spill] sm:$0xff] }
 0x8eb   :  { %2957 = vmatpush1.bf16.msra.mxu0 %v7290_v0  ;;  %2998 = vmatpush1.bf16.msra.mxu1 %v7291_v61  ;;  %v7301_v0 = vld [vmem:[#allocation80_spill] sm:$0xff]  ;;  %v7302_v61 = vld [vmem:[#allocation50_spill] sm:$0xff] }
 0x8ec   :  { %2958 = vmatprep.subr.bf16.mxu0 %v7292_v36  ;;  %2999 = vmatprep.subr.bf16.mxu1 %v7293_v55  ;;  %v7303_v36 = vld [vmem:[#allocation82_spill] sm:$0xff]  ;;  %v7304_v55 = vld [vmem:[#allocation52_spill] sm:$0xff] }
 0x8ef   :  { %2959 = vmatpush1.bf16.msra.mxu0 %v7294_v38  ;;  %3000 = vmatpush1.bf16.msra.mxu1 %v7295_v11  ;;  %v7305_v38 = vld [vmem:[#allocation84_spill] sm:$0xff]  ;;  %v7306_v11 = vld [vmem:[#allocation54_spill] sm:$0xff] }
 0x8f0   :  { %2960 = vmatprep.subr.bf16.mxu0 %v7296_v2  ;;  %3001 = vmatprep.subr.bf16.mxu1 %v7297_v17  ;;  %v7307_v2 = vld [vmem:[#allocation86_spill] sm:$0xff]  ;;  %v7308_v17 = vld [vmem:[#allocation56_spill] sm:$0xff] }
 0x8f3   :  { %2961 = vmatpush1.bf16.msra.mxu0 %v7298_v7  ;;  %3002 = vmatpush1.bf16.msra.mxu1 %v7299_v34  ;;  %v7309_v7 = vld [vmem:[#allocation88_spill] sm:$0xff]  ;;  %v7310_v34 = vld [vmem:[#allocation58_spill] sm:$0xff] }
 0x8f4   :  { %2962 = vmatprep.subr.bf16.mxu0 %v7300_v16  ;;  %3003 = vmatprep.subr.bf16.mxu1 %v7301_v0  ;;  %v7311_v16 = vld [vmem:[#allocation90_spill] sm:$0xff]  ;;  %v7312_v0 = vld [vmem:[#allocation60_spill] sm:$0xff] }
 0x8f7   :  { %2963 = vmatpush1.bf16.msra.mxu0 %v7302_v61  ;;  %3004 = vmatpush1.bf16.msra.mxu1 %v7303_v36  ;;  %v7313_v61 = vld [vmem:[#allocation92_spill] sm:$0xff]  ;;  %v7314_v36 = vld [vmem:[#allocation62_spill] sm:$0xff] }
 0x8f8   :  { %2964 = vmatprep.subr.bf16.mxu0 %v7304_v55  ;;  %3005 = vmatprep.subr.bf16.mxu1 %v7305_v38  ;;  %v7315_v55 = vld [vmem:[#allocation94_spill] sm:$0xff]  ;;  %v7316_v38 = vld [vmem:[#allocation64_spill] sm:$0xff] }
 0x8fb   :  { %2965 = vmatpush1.bf16.msra.mxu0 %v7306_v11  ;;  %3006 = vmatpush1.bf16.msra.mxu1 %v7307_v2  ;;  %v7317_v11 = vld [vmem:[#allocation96_spill] sm:$0xff]  ;;  %v7318_v2 = vld [vmem:[#allocation66_spill] sm:$0xff] }
 0x8fc   :  { %2966 = vmatprep.subr.bf16.mxu0 %v7308_v17  ;;  %3007 = vmatprep.subr.bf16.mxu1 %v7309_v7  ;;  %v7319_v17 = vld [vmem:[#allocation98_spill] sm:$0xff]  ;;  %v7320_v7 = vld [vmem:[#allocation69_spill] sm:$0xff] }
 0x8ff   :  { %2967 = vmatpush1.bf16.msra.mxu0 %v7310_v34  ;;  %3008 = vmatpush1.bf16.msra.mxu1 %v7311_v16  ;;  %v7321_v34 = vld [vmem:[#allocation101_spill] sm:$0xff] }
 0x900   :  { %2968 = vmatprep.subr.bf16.mxu0 %v7312_v0  ;;  %3009 = vmatprep.subr.bf16.mxu1 %v7313_v61 }
 0x903   :  { %2969 = vmatpush1.bf16.msra.mxu0 %v7314_v36  ;;  %3010 = vmatpush1.bf16.msra.mxu1 %v7315_v55 }
 0x904   :  { %2970 = vmatprep.subr.bf16.mxu0 %v7316_v38  ;;  %3011 = vmatprep.subr.bf16.mxu1 %v7317_v11 }
 0x907   :  { %2971 = vmatpush1.bf16.msra.mxu0 %v7318_v2  ;;  %3012 = vmatpush1.bf16.msra.mxu1 %v7319_v17 }
 0x908   :  { %3022 = vmatprep.subr.bf16.mxu0 %v7320_v7  ;;  %3063 = vmatprep.subr.bf16.mxu1 %v7321_v34 }
 0x95d   :  { %v2748_v16 = vpop.f32.mrb[72].mxu0  ;;  %v2789_v0 = vpop.f32.mrb[88].mxu1 }
 0x95e   :  { %v2878_v61 = vadd.f32 %v2748_v16, %v7322_v48  ;;  %v2880_v36 = vadd.f32 %v2789_v0, %v7323_v47  ;;  %v2750_v42 = vpop.f32.mrb[73].mxu0  ;;  %v2791_v55 = vpop.f32.mrb[89].mxu1 }
 0x95f   :  { %v2879_v38 = vadd.f32 %v2750_v42, %v7324_v32  ;;  %v2881_v11 = vadd.f32 %v2791_v55, %v7325_v60  ;;  %v2752_v15 = vpop.f32.mrb[74].mxu0  ;;  %v2793_v2 = vpop.f32.mrb[90].mxu1 }
 0x960   :  { %v3587_v29 = vmul.f32 -1.442695, %v2878_v61  ;;  %v2753_v17 = vpop.f32.mrb[75].mxu0  ;;  %v2794_v14 = vpop.f32.mrb[91].mxu1  ;;  %v7326_v61 = vld [vmem:[#allocation109_spill] sm:$0xff] }
 0x961   :  { %v3588_v7 = vmul.f32 -1.442695, %v2879_v38  ;;  %v3589_v34 = vmul.f32 -1.442695, %v2881_v11  ;;  %v7329_v17 = vld [vmem:[#allocation165_spill] sm:$0xff] }
 0x962   :  { %3868 = vpow2.f32 %v3587_v29 }
 0x963   :  { %3870 = vpow2.f32 %v3588_v7 }
 0x964   :  { %3872 = vpow2.f32 %v3589_v34  ;;  %v7330_v34 = vld [vmem:[#allocation192_spill] sm:$0xff] }
 0x965   :  { %3874 = vtanh.f32 %v2880_v36 }
 0x96c   :  { %v3869_v35 = vpop.eup %3868 }
 0x96d   :  { %v3871_v30 = vpop.eup %3870  ;;  %v2889_v48 = vadd.f32 1.0, %v3869_v35 }
 0x96e   :  { %v2895_v47 = vadd.f32 1.0, %v3871_v30  ;;  %v3873_v32 = vpop.eup %3872 }
 0x96f   :  { %3876 = vrcp.f32 %v2889_v48  ;;  %v3875_v42 = vpop.eup %3874  ;;  %v2902_v0 = vadd.f32 1.0, %v3873_v32 }
 0x970   :  { %3878 = vrcp.f32 %v2895_v47 }
 0x971   :  { %3880 = vrcp.f32 %v2902_v0 }
 0x979   :  { %v3877_v60 = vpop.eup %3876 }
 0x97a   :  { %v3879_v15 = vpop.eup %3878  ;;  %v2906_v16 = vmul.f32 %v3877_v60, %v3875_v42  ;;  %v7331_v42 = vld [vmem:[#allocation167_spill] sm:$0xff] }
 0x97b   :  { %v2905_v14 = vmul.f32 %v3879_v15, %v7326_v61  ;;  %v3881_v36 = vpop.eup %3880  ;;  %v7332_v15 = vld [vmem:[#allocation193_spill] sm:$0xff] }
 0x97d   :  { %v2907_v55 = vadd.f32 %v2906_v16, %v2905_v14 }
 0x97f   :  { %3882 = vtanh.f32 %v2907_v55  ;;  %v6093_v35 = vsel %vm1781_vm14, %v2907_v55, %v7326_v61 }
 0x980   :  { %7328 = vst [vmem:[#allocation79_spill] sm:$0xff] %v6093_v35 }
 0x989   :  { %v3883_v30 = vpop.eup %3882 }
 0x98a   :  { %v2909_v38 = vmul.f32 %v3883_v30, %v3881_v36 }
 0x99d   :  { %v2830_v11 = vpop.f32.mrb[76].mxu0  ;;  %v2871_v2 = vpop.f32.mrb[92].mxu1 }
 0x99e   :  { %v2882_v7 = vadd.f32 %v2830_v11, %v7329_v17  ;;  %v2884_v48 = vadd.f32 %v2871_v2, %v7330_v34  ;;  %v2832_v47 = vpop.f32.mrb[77].mxu0  ;;  %v2873_v32 = vpop.f32.mrb[93].mxu1 }
 0x99f   :  { %v2883_v60 = vadd.f32 %v2832_v47, %v7331_v42  ;;  %v2885_v16 = vadd.f32 %v2873_v32, %v7332_v15  ;;  %v2834_v0 = vpop.f32.mrb[78].mxu0  ;;  %v2875_v14 = vpop.f32.mrb[94].mxu1 }
 0x9a0   :  { %v3590_v18 = vmul.f32 -1.442695, %v2882_v7  ;;  %v2835_v61 = vpop.f32.mrb[79].mxu0  ;;  %v2876_v55 = vpop.f32.mrb[95].mxu1  ;;  %v6108_v0 = vsel %vm1781_vm14, %v2909_v38, %v5940_v19  ;;  %v3674_v19 = vld [vmem:[#allocation11 + $0x78] sm:$0xff]  }
 0x9a1   :  { %v3591_v35 = vmul.f32 -1.442695, %v2883_v60  ;;  %v3592_v36 = vmul.f32 -1.442695, %v2885_v16  ;;  %v7358_v55 = vld [vmem:[#allocation158_spill] sm:$0xff] }
 0x9a2   :  { %3884 = vpow2.f32 %v3590_v18 }
 0x9a3   :  { %3886 = vpow2.f32 %v3591_v35 }
 0x9a4   :  { %3888 = vpow2.f32 %v3592_v36 }
 0x9a5   :  { %3890 = vtanh.f32 %v2884_v48 }
 0x9ac   :  { %v3885_v30 = vpop.eup %3884 }
 0x9ad   :  { %v3887_v21 = vpop.eup %3886  ;;  %v2915_v11 = vadd.f32 1.0, %v3885_v30  ;;  %v7359_v30 = vld [vmem:[#allocation188_spill] sm:$0xff] }
 0x9ae   :  { %v2921_v2 = vadd.f32 1.0, %v3887_v21  ;;  %v3889_v17 = vpop.eup %3888 }
 0x9af   :  { %3892 = vrcp.f32 %v2915_v11  ;;  %v3891_v34 = vpop.eup %3890  ;;  %v2928_v7 = vadd.f32 1.0, %v3889_v17 }
 0x9b0   :  { %3894 = vrcp.f32 %v2921_v2 }
 0x9b1   :  { %3896 = vrcp.f32 %v2928_v7 }
 0x9b9   :  { %v3893_v47 = vpop.eup %3892 }
 0x9ba   :  { %v3895_v32 = vpop.eup %3894  ;;  %v2932_v42 = vmul.f32 %v3893_v47, %v3891_v34  ;;  %v7360_v34 = vld [vmem:[#allocation160_spill] sm:$0xff] }
 0x9bb   :  { %v2931_v15 = vmul.f32 %v3895_v32, %v5935_v59  ;;  %v3897_v48 = vpop.eup %3896  ;;  %v7361_v32 = vld [vmem:[#allocation189_spill] sm:$0xff] }
 0x9bd   :  { %v2933_v60 = vadd.f32 %v2932_v42, %v2931_v15 }
 0x9bf   :  { %3898 = vtanh.f32 %v2933_v60  ;;  %v6103_v35 = vsel %vm1750_vm13, %v2933_v60, %v5935_v59  ;;  %v6119_v59 = vpack.c.bf16 %v6108_v0, %v6108_v0 }
 0x9c9   :  { %v3899_v21 = vpop.eup %3898 }
 0x9ca   :  { %v2935_v16 = vmul.f32 %v3899_v21, %v3897_v48 }
 0x9cc   :  { %v6113_v14 = vsel %vm1750_vm13, %v2935_v16, %v5945_v20  ;;  %v3675_v20 = vld [vmem:[#allocation11 + $0x38] sm:$0xff]  }
 0x9cd   :  { %v2939_v61 = vpack.c.bf16 %v6113_v14, %v6113_v14 }
 0x9cf   :  { %2972 = vmatprep.mubr.bf16.mxu0 %v2939_v61  ;;  %3013 = vmatprep.mubr.bf16.mxu1 %v2939_v61 }
 0x9d0   :  { %2973 = vmatmul.mubr.bf16.vlgmr.msra.gmra.mrb[80].mxu0 %v6119_v59  ;;  %3014 = vmatmul.mubr.bf16.vlgmr.msra.gmra.mrb[96].mxu1 %v6119_v59 }
 0x9d1   :  { %3023 = vmatpush1.bf16.msra.mxu0 %v6722_v52  ;;  %3064 = vmatpush1.bf16.msra.mxu1 %v6723_v1  ;;  %v7334_v52 = vld [vmem:[#allocation108_spill] sm:$0xff]  ;;  %v7336_v1 = vld [vmem:[#allocation110_spill] sm:$0xff] }
 0x9d2   :  { %3054 = vmatprep.mubr.bf16.mxu0 %v2939_v61  ;;  %3095 = vmatprep.mubr.bf16.mxu1 %v2939_v61 }
 0x9d3   :  { %3024 = vmatprep.subr.bf16.mxu0 %v6724_v27  ;;  %3065 = vmatprep.subr.bf16.mxu1 %v6725_v43  ;;  %v7337_v27 = vld [vmem:[#allocation137_spill] sm:$0xff]  ;;  %v7338_v43 = vld [vmem:[#allocation112_spill] sm:$0xff] }
 0x9d5   :  { %3025 = vmatpush1.bf16.msra.mxu0 %v6726_v41  ;;  %3066 = vmatpush1.bf16.msra.mxu1 %v6727_v23  ;;  %v7340_v41 = vld [vmem:[#allocation114_spill] sm:$0xff]  ;;  %v7341_v23 = vld [vmem:[#allocation139_spill] sm:$0xff] }
 0x9d6   :  { %3026 = vmatprep.subr.bf16.mxu0 %v6728_v54  ;;  %3067 = vmatprep.subr.bf16.mxu1 %v6729_v45  ;;  %v7342_v54 = vld [vmem:[#allocation116_spill] sm:$0xff]  ;;  %v7344_v45 = vld [vmem:[#allocation118_spill] sm:$0xff] }
 0x9d9   :  { %3027 = vmatpush1.bf16.msra.mxu0 %v6730_v44  ;;  %3068 = vmatpush1.bf16.msra.mxu1 %v6731_v12  ;;  %v7345_v44 = vld [vmem:[#allocation141_spill] sm:$0xff]  ;;  %v7346_v12 = vld [vmem:[#allocation120_spill] sm:$0xff] }
 0x9da   :  { %3028 = vmatprep.subr.bf16.mxu0 %v6732_v22  ;;  %3069 = vmatprep.subr.bf16.mxu1 %v6733_v57  ;;  %v7347_v22 = vld [vmem:[#allocation142_spill] sm:$0xff] }
 0x9db   :  { %v7348_v57 = vld [vmem:[#allocation122_spill] sm:$0xff] }
 0x9dd   :  { %3029 = vmatpush1.bf16.msra.mxu0 %v6734_v9  ;;  %3070 = vmatpush1.bf16.msra.mxu1 %v6735_v24  ;;  %v7349_v9 = vld [vmem:[#allocation143_spill] sm:$0xff]  ;;  %v7350_v24 = vld [vmem:[#allocation124_spill] sm:$0xff] }
 0x9de   :  { %3030 = vmatprep.subr.bf16.mxu0 %v6736_v37  ;;  %3071 = vmatprep.subr.bf16.mxu1 %v6827_v8  ;;  %v7351_v37 = vld [vmem:[#allocation144_spill] sm:$0xff] }
 0x9df   :  { %v3662_v8 = vld [vmem:[#allocation11 + $0x48] sm:$0xff]  }
 0x9e1   :  { %3031 = vmatpush1.bf16.msra.mxu0 %v6738_v50  ;;  %3072 = vmatpush1.bf16.msra.mxu1 %v6828_v3  ;;  %v7353_v50 = vld [vmem:[#allocation145_spill] sm:$0xff]  ;;  %v3663_v3 = vld [vmem:[#allocation11 + $0x8] sm:$0xff]  }
 0x9e2   :  { %3032 = vmatprep.subr.bf16.mxu0 %v6739_v56  ;;  %3073 = vmatprep.subr.bf16.mxu1 %v6829_v31  ;;  %v7354_v56 = vld [vmem:[#allocation128_spill] sm:$0xff] }
 0x9e3   :  { %v3664_v31 = vld [vmem:[#allocation11 + $0x50] sm:$0xff]  }
 0x9e5   :  { %3033 = vmatpush1.bf16.msra.mxu0 %v6741_v5  ;;  %3074 = vmatpush1.bf16.msra.mxu1 %v6830_v33  ;;  %v7356_v5 = vld [vmem:[#allocation130_spill] sm:$0xff]  ;;  %v3665_v33 = vld [vmem:[#allocation11 + $0x10] sm:$0xff]  }
 0x9e6   :  { %3034 = vmatprep.subr.bf16.mxu0 %v6742_v58  ;;  %3075 = vmatprep.subr.bf16.mxu1 %v6831_v39  ;;  %v7357_v58 = vld [vmem:[#allocation147_spill] sm:$0xff]  ;;  %v3666_v39 = vld [vmem:[#allocation11 + $0x58] sm:$0xff]  }
 0x9e9   :  { %3035 = vmatpush1.bf16.msra.mxu0 %v6744_v49  ;;  %3076 = vmatpush1.bf16.msra.mxu1 %v6832_v4  ;;  %v3661_v49 = vld [vmem:[#allocation11] sm:$0xff]   ;;  %v3667_v4 = vld [vmem:[#allocation11 + $0x18] sm:$0xff]  }
 0x9ea   :  { %3036 = vmatprep.subr.bf16.mxu0 %v6745_v63  ;;  %3077 = vmatprep.subr.bf16.mxu1 %v6833_v6  ;;  %v7352_v63 = vld [vmem:[#allocation126_spill] sm:$0xff] }
 0x9eb   :  { %v3668_v6 = vld [vmem:[#allocation11 + $0x60] sm:$0xff]  }
 0x9ed   :  { %3037 = vmatpush1.bf16.msra.mxu0 %v6746_v62  ;;  %3078 = vmatpush1.bf16.msra.mxu1 %v6834_v25  ;;  %v7335_v62 = vld [vmem:[#allocation136_spill] sm:$0xff]  ;;  %v3669_v25 = vld [vmem:[#allocation11 + $0x20] sm:$0xff]  }
 0x9ee   :  { %3038 = vmatprep.subr.bf16.mxu0 %v6747_v53  ;;  %3079 = vmatprep.subr.bf16.mxu1 %v6835_v40  ;;  %v7355_v53 = vld [vmem:[#allocation146_spill] sm:$0xff]  ;;  %v3670_v40 = vld [vmem:[#allocation11 + $0x68] sm:$0xff]  }
 0x9f1   :  { %3039 = vmatpush1.bf16.msra.mxu0 %v6748_v26  ;;  %3080 = vmatpush1.bf16.msra.mxu1 %v6836_v13  ;;  %v7339_v26 = vld [vmem:[#allocation138_spill] sm:$0xff]  ;;  %v3671_v13 = vld [vmem:[#allocation11 + $0x28] sm:$0xff]  }
 0x9f2   :  { %3040 = vmatprep.subr.bf16.mxu0 %v6749_v46  ;;  %3081 = vmatprep.subr.bf16.mxu1 %v6837_v10  ;;  %v3660_v46 = vld [vmem:[#allocation11 + $0x40] sm:$0xff]   ;;  %v3672_v10 = vld [vmem:[#allocation11 + $0x70] sm:$0xff]  }
 0x9f5   :  { %3041 = vmatpush1.bf16.msra.mxu0 %v6750_v51  ;;  %3082 = vmatpush1.bf16.msra.mxu1 %v7129_v28  ;;  %v7343_v51 = vld [vmem:[#allocation140_spill] sm:$0xff] }
 0x9f6   :  { %3042 = vmatprep.subr.bf16.mxu0 %v7334_v52  ;;  %3083 = vmatprep.subr.bf16.mxu1 %v7335_v62  ;;  %v3673_v28 = vld [vmem:[#allocation11 + $0x30] sm:$0xff]  }
 0x9f9   :  { %3043 = vmatpush1.bf16.msra.mxu0 %v7336_v1  ;;  %3084 = vmatpush1.bf16.msra.mxu1 %v7337_v27 }
 0x9fa   :  { %3044 = vmatprep.subr.bf16.mxu0 %v7338_v43  ;;  %3085 = vmatprep.subr.bf16.mxu1 %v7339_v26 }
 0x9fd   :  { %3045 = vmatpush1.bf16.msra.mxu0 %v7340_v41  ;;  %3086 = vmatpush1.bf16.msra.mxu1 %v7341_v23 }
 0x9fe   :  { %3046 = vmatprep.subr.bf16.mxu0 %v7342_v54  ;;  %3087 = vmatprep.subr.bf16.mxu1 %v7343_v51  ;;  %v7362_v54 = vld [vmem:[#allocation79_spill] sm:$0xff] }
 0xa01   :  { %3047 = vmatpush1.bf16.msra.mxu0 %v7344_v45  ;;  %3088 = vmatpush1.bf16.msra.mxu1 %v7345_v44 }
 0xa02   :  { %3048 = vmatprep.subr.bf16.mxu0 %v7346_v12  ;;  %3089 = vmatprep.subr.bf16.mxu1 %v7347_v22 }
 0xa05   :  { %3049 = vmatpush1.bf16.msra.mxu0 %v7348_v57  ;;  %3090 = vmatpush1.bf16.msra.mxu1 %v7349_v9 }
 0xa06   :  { %3050 = vmatprep.subr.bf16.mxu0 %v7350_v24  ;;  %3091 = vmatprep.subr.bf16.mxu1 %v7351_v37  ;;  %v7363_v24 = vld [vmem:[#allocation162_spill] sm:$0xff] }
 0xa09   :  { %3051 = vmatpush1.bf16.msra.mxu0 %v7352_v63  ;;  %3092 = vmatpush1.bf16.msra.mxu1 %v7353_v50  ;;  %v7364_v63 = vld [vmem:[#allocation190_spill] sm:$0xff] }
 0xa0a   :  { %3052 = vmatprep.subr.bf16.mxu0 %v7354_v56  ;;  %3093 = vmatprep.subr.bf16.mxu1 %v7355_v53 }
 0xa0d   :  { %3053 = vmatpush1.bf16.msra.mxu0 %v7356_v5  ;;  %3094 = vmatpush1.bf16.msra.mxu1 %v7357_v58  ;;  %v7365_v5 = vld [vmem:[#allocation163_spill] sm:$0xff] }
 0xa0e   :  { %3616 = vmatprep.subr.bf16.mxu0 %v3660_v46  ;;  %v7366_v46 = vld [vmem:[#allocation191_spill] sm:$0xff] }
 0xa10   :  { %3055 = vmatmul.mubr.bf16.vlgmr.msra.gmra.mrb[84].mxu0 %v6119_v59  ;;  %3096 = vmatmul.mubr.bf16.vlgmr.msra.gmra.mrb[100].mxu1 %v6119_v59 }
 0xa11   :  { %3617 = vmatpush3.bf16.msra.mxu0 %v3661_v49 }
 0xa12   :  { %3618 = vmatprep.subr.bf16.mxu0 %v3662_v8 }
 0xa15   :  { %3619 = vmatpush3.bf16.msra.mxu0 %v3663_v3 }
 0xa16   :  { %3620 = vmatprep.subr.bf16.mxu0 %v3664_v31 }
 0xa19   :  { %3621 = vmatpush3.bf16.msra.mxu0 %v3665_v33 }
 0xa1a   :  { %3622 = vmatprep.subr.bf16.mxu0 %v3666_v39 }
 0xa1d   :  { %3623 = vmatpush3.bf16.msra.mxu0 %v3667_v4 }
 0xa1e   :  { %3624 = vmatprep.subr.bf16.mxu0 %v3668_v6 }
 0xa21   :  { %3625 = vmatpush3.bf16.msra.mxu0 %v3669_v25 }
 0xa22   :  { %3626 = vmatprep.subr.bf16.mxu0 %v3670_v40 }
 0xa25   :  { %3627 = vmatpush3.bf16.msra.mxu0 %v3671_v13 }
 0xa26   :  { %3628 = vmatprep.subr.bf16.mxu0 %v3672_v10 }
 0xa29   :  { %3629 = vmatpush3.bf16.msra.mxu0 %v3673_v28 }
 0xa2a   :  { %3630 = vmatprep.subr.bf16.mxu0 %v3674_v19 }
 0xa2d   :  { %3631 = vmatpush3.bf16.msra.mxu0 %v3675_v20 }
 0xaa3   :  { %v2974_v29 = vpop.f32.mrb[80].mxu0  ;;  %v3015_v38 = vpop.f32.mrb[96].mxu1 }
 0xaa4   :  { %v3104_v36 = vadd.f32 %v2974_v29, %v7358_v55  ;;  %v3106_v11 = vadd.f32 %v3015_v38, %v7359_v30  ;;  %v2976_v2 = vpop.f32.mrb[81].mxu0  ;;  %v3017_v17 = vpop.f32.mrb[97].mxu1 }
 0xaa5   :  { %v3105_v47 = vadd.f32 %v2976_v2, %v7360_v34  ;;  %v3107_v42 = vadd.f32 %v3017_v17, %v7361_v32  ;;  %v2978_v7 = vpop.f32.mrb[82].mxu0  ;;  %v3019_v15 = vpop.f32.mrb[98].mxu1 }
 0xaa6   :  { %v3593_v60 = vmul.f32 -1.442695, %v3104_v36  ;;  %v2979_v18 = vpop.f32.mrb[83].mxu0  ;;  %v3020_v48 = vpop.f32.mrb[99].mxu1 }
 0xaa7   :  { %v3594_v21 = vmul.f32 -1.442695, %v3105_v47  ;;  %v3595_v16 = vmul.f32 -1.442695, %v3107_v42 }
 0xaa8   :  { %3900 = vpow2.f32 %v3593_v60  ;;  %v7369_v60 = vlaneseq }
 0xaa9   :  { %3902 = vpow2.f32 %v3594_v21  ;;  %v3599_v21 = vld [vmem:[#allocation13] ss:$0 sm:$0xff] }
 0xaaa   :  { %3904 = vpow2.f32 %v3595_v16 }
 0xaab   :  { %3906 = vtanh.f32 %v3106_v11 }
 0xab2   :  { %v3901_v61 = vpop.eup %3900 }
 0xab3   :  { %v3903_v59 = vpop.eup %3902  ;;  %v3115_v52 = vadd.f32 1.0, %v3901_v61 }
 0xab4   :  { %v3121_v62 = vadd.f32 1.0, %v3903_v59  ;;  %v3905_v1 = vpop.eup %3904 }
 0xab5   :  { %3908 = vrcp.f32 %v3115_v52  ;;  %v3907_v27 = vpop.eup %3906  ;;  %v3128_v23 = vadd.f32 1.0, %v3905_v1 }
 0xab6   :  { %3910 = vrcp.f32 %v3121_v62 }
 0xab7   :  { %3912 = vrcp.f32 %v3128_v23 }
 0xabf   :  { %v3909_v43 = vpop.eup %3908 }
 0xac0   :  { %v3911_v26 = vpop.eup %3910  ;;  %v3132_v41 = vmul.f32 %v3909_v43, %v3907_v27 }
 0xac1   :  { %v3131_v51 = vmul.f32 %v3911_v26, %v7362_v54  ;;  %v3913_v44 = vpop.eup %3912 }
 0xac3   :  { %v3133_v45 = vadd.f32 %v3132_v41, %v3131_v51 }
 0xac5   :  { %3914 = vtanh.f32 %v3133_v45 }
 0xacf   :  { %v3915_v12 = vpop.eup %3914 }
 0xad0   :  { %v3135_v22 = vmul.f32 %v3915_v12, %v3913_v44 }
 0xad2   :  { %v3136_v47 = vsel %vm1543_vm9, %v3135_v22, %v6108_v0 }
 0xad3   :  { %v3162_v15 = vpack.c.bf16 %v3136_v47, %v3136_v47 }
 0xae3   :  { %v3056_v57 = vpop.f32.mrb[84].mxu0  ;;  %v3097_v9 = vpop.f32.mrb[100].mxu1 }
 0xae4   :  { %v3108_v37 = vadd.f32 %v3056_v57, %v7363_v24  ;;  %v3110_v50 = vadd.f32 %v3097_v9, %v7364_v63  ;;  %v3058_v56 = vpop.f32.mrb[85].mxu0  ;;  %v3099_v53 = vpop.f32.mrb[101].mxu1 }
 0xae5   :  { %v3109_v58 = vadd.f32 %v3058_v56, %v7365_v5  ;;  %v3111_v49 = vadd.f32 %v3099_v53, %v7366_v46  ;;  %v3060_v8 = vpop.f32.mrb[86].mxu0  ;;  %v3101_v3 = vpop.f32.mrb[102].mxu1 }
 0xae6   :  { %v3596_v31 = vmul.f32 -1.442695, %v3108_v37  ;;  %v3061_v33 = vpop.f32.mrb[87].mxu0  ;;  %v3102_v39 = vpop.f32.mrb[103].mxu1 }
 0xae7   :  { %v3597_v4 = vmul.f32 -1.442695, %v3109_v58  ;;  %v3598_v6 = vmul.f32 -1.442695, %v3111_v49 }
 0xae8   :  { %3916 = vpow2.f32 %v3596_v31 }
 0xae9   :  { %3918 = vpow2.f32 %v3597_v4 }
 0xaea   :  { %3920 = vpow2.f32 %v3598_v6 }
 0xaeb   :  { %3922 = vtanh.f32 %v3110_v50 }
 0xaf2   :  { %v3917_v25 = vpop.eup %3916 }
 0xaf3   :  { %v3919_v40 = vpop.eup %3918  ;;  %v3140_v13 = vadd.f32 1.0, %v3917_v25 }
 0xaf4   :  { %v3146_v10 = vadd.f32 1.0, %v3919_v40  ;;  %v3921_v28 = vpop.eup %3920 }
 0xaf5   :  { %3924 = vrcp.f32 %v3140_v13  ;;  %v3923_v19 = vpop.eup %3922  ;;  %v3153_v55 = vadd.f32 1.0, %v3921_v28 }
 0xaf6   :  { %3926 = vrcp.f32 %v3146_v10 }
 0xaf7   :  { %3928 = vrcp.f32 %v3153_v55 }
 0xaff   :  { %v3925_v20 = vpop.eup %3924 }
 0xb00   :  { %v3927_v29 = vpop.eup %3926  ;;  %v3157_v38 = vmul.f32 %v3925_v20, %v3923_v19 }
 0xb01   :  { %v3156_v36 = vmul.f32 %v3927_v29, %v6103_v35  ;;  %v3929_v11 = vpop.eup %3928  ;;  %v3340_v35 = vand.u32 127, %v7369_v60 }
 0xb03   :  { %v3158_v30 = vadd.f32 %v3157_v38, %v3156_v36  ;;  %vm3341_vm3 = vcmp.lt.s32.totalorder %v3340_v35, 4 }
 0xb05   :  { %3930 = vtanh.f32 %v3158_v30 }
 0xb0f   :  { %v3931_v2 = vpop.eup %3930 }
 0xb10   :  { %v3160_v17 = vmul.f32 %v3931_v2, %v3929_v11 }
 0xb12   :  { %v3161_v42 = vsel %vm1512_vm10, %v3160_v17, %v6113_v14 }
 0xb13   :  { %v3163_v7 = vpack.c.bf16 %v3161_v42, %v3161_v42 }
 0xb15   :  { %3331 = vmatprep.mubr.bf16.mxu0 %v3163_v7 }
 0xb16   :  { %3332 = vmatmul.mubr.bf16.vlgmr.msra.gmra.mrb[88].mxu0 %v3162_v15 }
 0xbe9   :  { %v3632_v18 = vpop.f32.mrb[88].mxu0 }
 0xbea   :  { %v3633_v48 = vpop.f32.mrb[89].mxu0 }
 0xbeb   :  { %v3634_v16 = vadd.f32 %v3633_v48, %v3632_v18  ;;  %v3635_v61 = vpop.f32.mrb[90].mxu0 }
 0xbec   :  { %v3636_v59 = vpop.f32.mrb[91].mxu0 }
 0xbed   :  { %v3334_v52 = vadd.f32 %v3634_v16, %v3599_v21 }
 0xbef   :  { %v3342_v62 = vsel %vm3341_vm3, %v3334_v52, -1e+30 }
 0xbf0   :  { %3343 = vmax.xlane.f32.xlu0 %v3342_v62 }
 0xc7d   :  { %v3344_v0 = vpop.xlane.xlu0 %3343 }
 0xc7e   :  { %v3345_v1 = vsub.f32 %v3342_v62, %v3344_v0 }
 0xc80   :  { %v3346_v27 = vmul.f32 1.442695, %v3345_v1 }
 0xc82   :  { %3932 = vpow2.f32 %v3346_v27 }
 0xc8c   :  { %v3933_v14 = vpop.eup %3932 }
 0xc8d   :  { %3348 = vadd.xlane.f32.xlu1 %v3933_v14 }
 0xd1a   :  { %v3349_v43 = vpop.xlane.xlu1 %3348 }
 0xd1b   :  { %3934 = vrcp.f32 %v3349_v43 }
 0xd25   :  { %v3935_v26 = vpop.eup %3934 }
 0xd26   :  { %v3351_v41 = vmul.f32 %v3935_v26, %v3933_v14 }
 0xd28   :  { %3352 = vst [vmem:[#allocation14] sm:$0xff] %v3351_v41 }
 0xd29   :  { %4102 = shalt.err (!%p4099_p4)
}
 0xd2a   :  { %s4103_s29 = scalar_lea.hbm %s6223_s7, 128 }
 0xd2b   :  { %p4104_p5 = scmp.ne.s32.totalorder %s6223_s7, %s4103_s29  ;;  %p4107_p6 = scmp.lt.u32.totalorder %s4103_s29, %s6223_s7 }
 0xd2d   :  { %p4109_p7 = pnand %p4107_p6, %p4104_p5 }
 0xd2f   :  { %4112 = shalt.err (!%p4109_p7)
}
 0xd30   :  { %3362 = dma.vmem_to_hbm [thread:$0]  %s3360_s3, 128, %s6223_s7, [#allocation4]  }
 0xd31   :  { %4121 = dma.done.wait [#allocation4], 128  }
 0xd32   :  { %4122 = vsyncadd [#allocation4], 4294967168 }
 0xd33   :  { %3366 = vsyncpa [#allocation3], 1 }
 0xd34   :  { %3367 = vsyncpa [#allocation6], 1 }
 0xd35   :  { %3368 = vsyncpa [#allocation9], 1 }
 0xd36   :  { %3369 = vsyncpa [#allocation12], 1 }
 0xd37   :  { %3370 = vsyncpa [#allocation4], 1 }

</bundles_post_ra>
